<compile_context>
chip_gen: v6e
topology: v6e:2x2x1
jax: 0.10.0
libtpu: 0.0.40
codegen_flags: <defaults>
</compile_context>

<pallas_src>
import math

import jax
import jax.numpy as jnp
from jax.experimental import pallas as pl
from jax.experimental.pallas import tpu as pltpu

# ----- small ViT config (stand-in for ViT-base) ------------------------------
B = 2                    # batch per view
C = 3                    # image channels
IMG = 16                 # spatial size
P = 8                    # patch size
NP = (IMG // P) ** 2     # num patches = 4
S = NP + 1               # sequence length (CLS + patches) = 5
BS = B * S               # batch folded into sublanes = 10
NM = 2                   # models folded: 0 = student, 1 = teacher
R = NM * BS              # total folded rows = 20
D = 32                   # hidden size
H = 4                    # attention heads
DH = D // H              # head dim = 8
MLP = 4 * D              # MLP intermediate = 128
LAYERS = 2               # encoder layers
EPS = 1e-12              # ViT layer_norm_eps
CPP = C * P * P          # flattened patch size = 192
NEG = -1e30              # additive mask value
LANES = 128              # lane-dense store width


def _layer_norm(x, g, b):
    mu = jnp.mean(x, axis=-1, keepdims=True)
    var = jnp.mean((x - mu) ** 2, axis=-1, keepdims=True)
    return (x - mu) * jax.lax.rsqrt(var + EPS) * g + b


# ----- fused Pallas kernel ----------------------------------------------------

def fused_vit_kernel(patches_ref, pw_ref, vecs_ref, wqkv_ref, wo_ref, w1_ref,
                     w2_ref, amask_ref, hid_ref, attn_ref):
    # vecs_ref: [LAYERS+1, R, 128]; slab LAYERS carries emb_add | lnf_g | lnf_b.
    misc = vecs_ref[LAYERS]
    emb_add = misc[:, 0:D]
    lnf_g = misc[:, D:2 * D]
    lnf_b = misc[:, 2 * D:3 * D]
    amask = amask_ref[...]                                   # [H*R, R]

    # Hoisted constants (JAX does not CSE broadcasts; build once, reuse/layer).
    row = jax.lax.broadcasted_iota(jnp.int32, (R, 1), 0)
    ms = (row < BS).astype(jnp.float32)                      # student rows
    mt = 1.0 - ms                                            # teacher rows
    lane = jax.lax.broadcasted_iota(jnp.int32, (1, D), 1)
    head_masks = [((lane >= hd * DH) & (lane < (hd + 1) * DH)).astype(jnp.float32)
                  for hd in range(H)]
    attn_pad = jnp.zeros((H * R, LANES - R), jnp.float32)

    def expand(x):
        # [R, F] -> [R, 2F+2]: per-model activation columns + indicator lanes
        # that pick up the per-model bias rows appended to each stacked weight.
        return jnp.concatenate([x * ms, x * mt, ms, mt], axis=1)

    # Patch embedding: CLS rows of `patches` are zero; emb_add carries
    # cls + pos (+ the patch-embedding bias folded into the patch rows).
    x = jnp.dot(patches_ref[...], pw_ref[...],
                preferred_element_type=jnp.float32) + emb_add            # [R, D]

    scale = 1.0 / math.sqrt(DH)
    for layer in range(LAYERS):                              # static unroll
        wqkv = wqkv_ref[layer]                               # [2D+2, 3D]
        wo = wo_ref[layer]                                   # [2D+2, D]
        w1 = w1_ref[layer]                                   # [2D+2, MLP]
        w2 = w2_ref[layer]                                   # [2*MLP+2, D]
        vec = vecs_ref[layer]                                # [R, 128]
        ln1g, ln1b = vec[:, 0:D], vec[:, D:2 * D]
        ln2g, ln2b = vec[:, 2 * D:3 * D], vec[:, 3 * D:4 * D]

        # ---- MHSA (pre-LN): heads batched into 2 MXU pushes + 1 softmax ----
        h = _layer_norm(x, ln1g, ln1b)
        qkv = jnp.dot(expand(h), wqkv, preferred_element_type=jnp.float32)  # [R,3D]
        q = qkv[:, 0:D]
        k = qkv[:, D:2 * D]
        v = qkv[:, 2 * D:3 * D]

        # Masked-per-head q stacked along sublanes -> one score matmul for all
        # heads (masking q alone selects head-h lanes of both q and k).
        q_big = jnp.concatenate([q * hm for hm in head_masks], axis=0)   # [H*R, D]
        s = jax.lax.dot_general(q_big, k, (((1,), (1,)), ((), ())),
                                preferred_element_type=jnp.float32)       # [H*R, R]
        s = s * scale + amask
        s = s - jnp.max(s, axis=-1, keepdims=True)
        p = jnp.exp(s)
        p = p / jnp.sum(p, axis=-1, keepdims=True)       # exact: probs are returned
        attn_ref[layer] = jnp.concatenate([p, attn_pad], axis=1)  # lane-dense store

        ctx_big = jnp.dot(p, v, preferred_element_type=jnp.float32)       # [H*R, D]
        ctx = ctx_big[0:R] * head_masks[0]               # (p@v)*mask == p@(v*mask)
        for hd in range(1, H):
            ctx = ctx + ctx_big[hd * R:(hd + 1) * R] * head_masks[hd]
        x = x + jnp.dot(expand(ctx), wo, preferred_element_type=jnp.float32)

        # ---- MLP (pre-LN) ----
        h2 = _layer_norm(x, ln2g, ln2b)
        # TODO(synk): HF ViT uses exact (erf) GELU; tanh approximation kept for
        # guaranteed Mosaic lowering.
        m = jax.nn.gelu(jnp.dot(expand(h2), w1, preferred_element_type=jnp.float32),
                        approximate=True)
        x = x + jnp.dot(expand(m), w2, preferred_element_type=jnp.float32)

    hid_ref[...] = _layer_norm(x, lnf_g, lnf_b)


def _run_fused(inp):
    # Single invocation: every array fits comfortably in VMEM (~0.4 MB total),
    # so whole-array VMEM blocks (no grid, no pipelining) are used.
    def vmem():
        return pl.BlockSpec(memory_space=pltpu.MemorySpace.VMEM)

    return pl.pallas_call(
        fused_vit_kernel,
        out_shape=(jax.ShapeDtypeStruct((R, D), jnp.float32),
                   jax.ShapeDtypeStruct((LAYERS, H * R, LANES), jnp.float32)),
        in_specs=[vmem() for _ in range(8)],
        out_specs=(vmem(), vmem()),
    )(inp["patches"], inp["patch_w"], inp["vecs"], inp["wqkv"], inp["wo"],
      inp["w1"], inp["w2"], inp["amask"])


# ----- parameter init (deterministic, synthetic) ------------------------------

def init_vit_params(key):
    ks = jax.random.split(key, 3 + LAYERS)

    def nrm(k, shape):
        return 0.02 * jax.random.normal(k, shape, jnp.float32)

    params = {
        "patch_w": nrm(ks[0], (CPP, D)),            # Conv2d(stride=P) as matmul
        "patch_b": jnp.zeros((D,), jnp.float32),
        "cls": nrm(ks[1], (1, 1, D)),
        "pos": nrm(ks[2], (1, S, D)),
        "ln_f_g": jnp.ones((D,), jnp.float32),
        "ln_f_b": jnp.zeros((D,), jnp.float32),
        "layers": [],
    }
    for i in range(LAYERS):
        lk = jax.random.split(ks[3 + i], 6)
        params["layers"].append({
            "ln1g": jnp.ones((D,), jnp.float32),
            "ln1b": jnp.zeros((D,), jnp.float32),
            "wq": nrm(lk[0], (D, D)), "bq": jnp.zeros((D,), jnp.float32),
            "wk": nrm(lk[1], (D, D)), "bk": jnp.zeros((D,), jnp.float32),
            "wv": nrm(lk[2], (D, D)), "bv": jnp.zeros((D,), jnp.float32),
            "wo": nrm(lk[3], (D, D)), "bo": jnp.zeros((D,), jnp.float32),
            "ln2g": jnp.ones((D,), jnp.float32),
            "ln2b": jnp.zeros((D,), jnp.float32),
            "w1": nrm(lk[4], (D, MLP)), "b1": jnp.zeros((MLP,), jnp.float32),
            "w2": nrm(lk[5], (MLP, D)), "b2": jnp.zeros((D,), jnp.float32),
        })
    return params


# ----- host-side packing / glue ------------------------------------------------

def _patch_rows(pixel_values):
    """[B,C,IMG,IMG] NCHW -> [B*S, C*P*P]; one zero row per CLS token.

    Window flattening order is (c, ph, pw), matching Conv2d(stride=P) weights.
    """
    b, c, hh, ww = pixel_values.shape
    gh, gw = hh // P, ww // P
    xp = pixel_values.reshape(b, c, gh, P, gw, P).transpose(0, 2, 4, 1, 3, 5)
    xp = xp.reshape(b, gh * gw, c * P * P)
    xp = jnp.concatenate([jnp.zeros((b, 1, c * P * P), xp.dtype), xp], axis=1)
    return xp.reshape(b * S, c * P * P)                           # [BS, CPP]


def _row_tile(v_student, v_teacher):
    """Per-model vector [W] -> per-row slab [R, W] (student rows, teacher rows)."""
    return jnp.concatenate([jnp.tile(v_student[None, :], (BS, 1)),
                            jnp.tile(v_teacher[None, :], (BS, 1))], axis=0)


def _aug(w_s, w_t, b_s, b_t):
    """Stack per-model weights on the contraction axis; biases as extra rows."""
    return jnp.concatenate([w_s, w_t, b_s[None, :], b_t[None, :]], axis=0)


def _pack_inputs(local_view, global_view, sp, tp):
    p_s = _patch_rows(local_view)                                 # student patches
    p_t = _patch_rows(global_view)                                # teacher patches
    z = jnp.zeros((BS, CPP), jnp.float32)
    patches = jnp.concatenate(
        [jnp.concatenate([p_s, z], axis=1),
         jnp.concatenate([z, p_t], axis=1)], axis=0)              # [R, 2*CPP]
    patch_w = jnp.concatenate([sp["patch_w"], tp["patch_w"]], axis=0)  # [2*CPP, D]

    def emb_rows(pp):
        e = pp["pos"][0]                                          # [S, D]
        e = e.at[0].add(pp["cls"][0, 0])
        e = e.at[1:].add(pp["patch_b"])
        return jnp.tile(e, (B, 1))                                # [BS, D]

    misc = jnp.concatenate(
        [jnp.concatenate([emb_rows(sp), emb_rows(tp)], axis=0),
         _row_tile(sp["ln_f_g"], tp["ln_f_g"]),
         _row_tile(sp["ln_f_b"], tp["ln_f_b"]),
         jnp.zeros((R, LANES - 3 * D), jnp.float32)], axis=1)     # [R, 128]

    wqkv, wo, w1, w2, vec_layers = [], [], [], [], []
    for ls, lt in zip(sp["layers"], tp["layers"]):
        wqkv.append(_aug(jnp.concatenate([ls["wq"], ls["wk"], ls["wv"]], axis=1),
                         jnp.concatenate([lt["wq"], lt["wk"], lt["wv"]], axis=1),
                         jnp.concatenate([ls["bq"], ls["bk"], ls["bv"]]),
                         jnp.concatenate([lt["bq"], lt["bk"], lt["bv"]])))
        wo.append(_aug(ls["wo"], lt["wo"], ls["bo"], lt["bo"]))
        w1.append(_aug(ls["w1"], lt["w1"], ls["b1"], lt["b1"]))
        w2.append(_aug(ls["w2"], lt["w2"], ls["b2"], lt["b2"]))
        vec_layers.append(jnp.concatenate(
            [_row_tile(ls["ln1g"], lt["ln1g"]),
             _row_tile(ls["ln1b"], lt["ln1b"]),
             _row_tile(ls["ln2g"], lt["ln2g"]),
             _row_tile(ls["ln2b"], lt["ln2b"])], axis=1))         # [R, 128]

    # Block-diagonal additive mask (per image); masks cross-batch AND
    # cross-model attention exactly.  Tiled over heads once (hoisted).
    img = jnp.arange(R) // S
    amask = jnp.where(img[:, None] == img[None, :], 0.0, NEG).astype(jnp.float32)
    amask = jnp.tile(amask, (H, 1))                               # [H*R, R]

    return dict(patches=patches, patch_w=patch_w,
                vecs=jnp.stack(vec_layers + [misc], axis=0),      # [L+1, R, 128]
                wqkv=jnp.stack(wqkv), wo=jnp.stack(wo),
                w1=jnp.stack(w1), w2=jnp.stack(w2), amask=amask)


@jax.jit
def vit_contrastive_forward(local_view, global_view, student_params,
                            teacher_params):
    # Teacher is frozen in the reference module -> forward-only here as well.
    inp = _pack_inputs(local_view, global_view, student_params, teacher_params)
    hid, attn = _run_fused(inp)

    student_output = hid[0:BS].reshape(B, S, D)
    teacher_output = hid[BS:R].reshape(B, S, D)
    probs = attn[:, :, :R].reshape(LAYERS, H, R, R)               # head-major rows
    student_attentions = tuple(
        jnp.stack([probs[l, :, b * S:(b + 1) * S, b * S:(b + 1) * S]
                   for b in range(B)], axis=0)                    # [B, H, S, S]
        for l in range(LAYERS))
    return student_output, teacher_output, student_attentions


if __name__ == "__main__":
    key = jax.random.PRNGKey(0)
    k_student, k_teacher, k_local, k_global = jax.random.split(key, 4)

    student_params = init_vit_params(k_student)
    teacher_params = init_vit_params(k_teacher)

    local_view = jax.random.normal(k_local, (B, C, IMG, IMG), jnp.float32)
    global_view = jax.random.normal(k_global, (B, C, IMG, IMG), jnp.float32)

    s_out, t_out, s_attn = vit_contrastive_forward(
        local_view, global_view, student_params, teacher_params)
    jax.block_until_ready((s_out, t_out) + tuple(s_attn))

    assert s_out.shape == (B, S, D)
    assert t_out.shape == (B, S, D)
    assert len(s_attn) == LAYERS
    assert all(a.shape == (B, H, S, S) for a in s_attn)
    assert all(bool(jnp.all(jnp.isfinite(a)))
               for a in (s_out, t_out) + tuple(s_attn))
    # attention rows should sum to ~1 (exact softmax divide)
    assert all(bool(jnp.allclose(jnp.sum(a, axis=-1), 1.0, atol=1e-3))
               for a in s_attn)
    print("KERNEL_OK")
</pallas_src>

<mosaic_0001>
module attributes {stable_mosaic.version = 11 : i64} {
  func.func @fused_vit_kernel(%arg0: memref<20x384xf32, #tpu.memory_space<vmem>>, %arg1: memref<384x32xf32, #tpu.memory_space<vmem>>, %arg2: memref<3x20x128xf32, #tpu.memory_space<vmem>>, %arg3: memref<2x66x96xf32, #tpu.memory_space<vmem>>, %arg4: memref<2x66x32xf32, #tpu.memory_space<vmem>>, %arg5: memref<2x66x128xf32, #tpu.memory_space<vmem>>, %arg6: memref<2x258x32xf32, #tpu.memory_space<vmem>>, %arg7: memref<80x20xf32, #tpu.memory_space<vmem>>, %arg8: memref<20x32xf32, #tpu.memory_space<vmem>>, %arg9: memref<2x80x128xf32, #tpu.memory_space<vmem>>) attributes {dimension_semantics = [], scalar_prefetch = 0 : i64, scratch_operands = 0 : i64, tpu.core_type = #tpu.core_type<tc>} {
    %c2 = arith.constant 2 : index
    %c0 = arith.constant 0 : index
    %c0_0 = arith.constant 0 : index
    %0 = vector.load %arg2[%c2, %c0, %c0_0] : memref<3x20x128xf32, #tpu.memory_space<vmem>>, vector<1x20x128xf32>
    %1 = vector.shape_cast %0 : vector<1x20x128xf32> to vector<20x128xf32>
    %2 = vector.extract_strided_slice %1 {offsets = [0, 0], sizes = [20, 32], strides = [1, 1]} : vector<20x128xf32> to vector<20x32xf32>
    %3 = vector.extract_strided_slice %1 {offsets = [0, 32], sizes = [20, 32], strides = [1, 1]} : vector<20x128xf32> to vector<20x32xf32>
    %4 = vector.extract_strided_slice %1 {offsets = [0, 64], sizes = [20, 32], strides = [1, 1]} : vector<20x128xf32> to vector<20x32xf32>
    %c0_1 = arith.constant 0 : index
    %c0_2 = arith.constant 0 : index
    %5 = vector.load %arg7[%c0_1, %c0_2] : memref<80x20xf32, #tpu.memory_space<vmem>>, vector<80x20xf32>
    %6 = tpu.iota {dimensions = array<i32: 0>} : vector<20x1xi32>
    %c10_i32 = arith.constant 10 : i32
    %7 = vector.broadcast %c10_i32 : i32 to vector<20x1xi32>
    %8 = arith.cmpi slt, %6, %7 : vector<20x1xi32>
    %9 = arith.extui %8 : vector<20x1xi1> to vector<20x1xi32>
    %10 = arith.sitofp %9 : vector<20x1xi32> to vector<20x1xf32>
    %cst = arith.constant 1.000000e+00 : f32
    %11 = vector.broadcast %cst : f32 to vector<20x1xf32>
    %12 = arith.subf %11, %10 : vector<20x1xf32>
    %13 = tpu.iota {dimensions = array<i32: 1>} : vector<1x32xi32>
    %c0_i32 = arith.constant 0 : i32
    %14 = vector.broadcast %c0_i32 : i32 to vector<1x32xi32>
    %15 = arith.cmpi sge, %13, %14 : vector<1x32xi32>
    %c8_i32 = arith.constant 8 : i32
    %16 = vector.broadcast %c8_i32 : i32 to vector<1x32xi32>
    %17 = arith.cmpi slt, %13, %16 : vector<1x32xi32>
    %18 = arith.andi %15, %17 : vector<1x32xi1>
    %19 = arith.extui %18 : vector<1x32xi1> to vector<1x32xi32>
    %20 = arith.sitofp %19 : vector<1x32xi32> to vector<1x32xf32>
    %c8_i32_3 = arith.constant 8 : i32
    %21 = vector.broadcast %c8_i32_3 : i32 to vector<1x32xi32>
    %22 = arith.cmpi sge, %13, %21 : vector<1x32xi32>
    %c16_i32 = arith.constant 16 : i32
    %23 = vector.broadcast %c16_i32 : i32 to vector<1x32xi32>
    %24 = arith.cmpi slt, %13, %23 : vector<1x32xi32>
    %25 = arith.andi %22, %24 : vector<1x32xi1>
    %26 = arith.extui %25 : vector<1x32xi1> to vector<1x32xi32>
    %27 = arith.sitofp %26 : vector<1x32xi32> to vector<1x32xf32>
    %c16_i32_4 = arith.constant 16 : i32
    %28 = vector.broadcast %c16_i32_4 : i32 to vector<1x32xi32>
    %29 = arith.cmpi sge, %13, %28 : vector<1x32xi32>
    %c24_i32 = arith.constant 24 : i32
    %30 = vector.broadcast %c24_i32 : i32 to vector<1x32xi32>
    %31 = arith.cmpi slt, %13, %30 : vector<1x32xi32>
    %32 = arith.andi %29, %31 : vector<1x32xi1>
    %33 = arith.extui %32 : vector<1x32xi1> to vector<1x32xi32>
    %34 = arith.sitofp %33 : vector<1x32xi32> to vector<1x32xf32>
    %c24_i32_5 = arith.constant 24 : i32
    %35 = vector.broadcast %c24_i32_5 : i32 to vector<1x32xi32>
    %36 = arith.cmpi sge, %13, %35 : vector<1x32xi32>
    %c32_i32 = arith.constant 32 : i32
    %37 = vector.broadcast %c32_i32 : i32 to vector<1x32xi32>
    %38 = arith.cmpi slt, %13, %37 : vector<1x32xi32>
    %39 = arith.andi %36, %38 : vector<1x32xi1>
    %40 = arith.extui %39 : vector<1x32xi1> to vector<1x32xi32>
    %41 = arith.sitofp %40 : vector<1x32xi32> to vector<1x32xf32>
    %cst_6 = arith.constant 0.000000e+00 : f32
    %42 = vector.broadcast %cst_6 : f32 to vector<80x108xf32>
    %c0_7 = arith.constant 0 : index
    %c0_8 = arith.constant 0 : index
    %43 = vector.load %arg0[%c0_7, %c0_8] : memref<20x384xf32, #tpu.memory_space<vmem>>, vector<20x384xf32>
    %c0_9 = arith.constant 0 : index
    %c0_10 = arith.constant 0 : index
    %44 = vector.load %arg1[%c0_9, %c0_10] : memref<384x32xf32, #tpu.memory_space<vmem>>, vector<384x32xf32>
    %cst_11 = arith.constant dense<0.000000e+00> : vector<20x32xf32>
    %45 = tpu.matmul %43, %44, %cst_11 {dimension_numbers = #tpu.dot_dimension_numbers<[1], [0], [0], [1], [0, 0, 1, 1], [], []>} : vector<20x384xf32>, vector<384x32xf32>, vector<20x32xf32> -> vector<20x32xf32>
    %46 = arith.addf %45, %2 : vector<20x32xf32>
    %c0_12 = arith.constant 0 : index
    %c0_13 = arith.constant 0 : index
    %c0_14 = arith.constant 0 : index
    %47 = vector.load %arg3[%c0_12, %c0_13, %c0_14] : memref<2x66x96xf32, #tpu.memory_space<vmem>>, vector<1x66x96xf32>
    %48 = vector.shape_cast %47 : vector<1x66x96xf32> to vector<66x96xf32>
    %c0_15 = arith.constant 0 : index
    %c0_16 = arith.constant 0 : index
    %c0_17 = arith.constant 0 : index
    %49 = vector.load %arg4[%c0_15, %c0_16, %c0_17] : memref<2x66x32xf32, #tpu.memory_space<vmem>>, vector<1x66x32xf32>
    %50 = vector.shape_cast %49 : vector<1x66x32xf32> to vector<66x32xf32>
    %c0_18 = arith.constant 0 : index
    %c0_19 = arith.constant 0 : index
    %c0_20 = arith.constant 0 : index
    %51 = vector.load %arg5[%c0_18, %c0_19, %c0_20] : memref<2x66x128xf32, #tpu.memory_space<vmem>>, vector<1x66x128xf32>
    %52 = vector.shape_cast %51 : vector<1x66x128xf32> to vector<66x128xf32>
    %c0_21 = arith.constant 0 : index
    %c0_22 = arith.constant 0 : index
    %c0_23 = arith.constant 0 : index
    %53 = vector.load %arg6[%c0_21, %c0_22, %c0_23] : memref<2x258x32xf32, #tpu.memory_space<vmem>>, vector<1x258x32xf32>
    %54 = vector.shape_cast %53 : vector<1x258x32xf32> to vector<258x32xf32>
    %c0_24 = arith.constant 0 : index
    %c0_25 = arith.constant 0 : index
    %c0_26 = arith.constant 0 : index
    %55 = vector.load %arg2[%c0_24, %c0_25, %c0_26] : memref<3x20x128xf32, #tpu.memory_space<vmem>>, vector<1x20x128xf32>
    %56 = vector.shape_cast %55 : vector<1x20x128xf32> to vector<20x128xf32>
    %57 = vector.extract_strided_slice %56 {offsets = [0, 0], sizes = [20, 32], strides = [1, 1]} : vector<20x128xf32> to vector<20x32xf32>
    %58 = vector.extract_strided_slice %56 {offsets = [0, 32], sizes = [20, 32], strides = [1, 1]} : vector<20x128xf32> to vector<20x32xf32>
    %59 = vector.extract_strided_slice %56 {offsets = [0, 64], sizes = [20, 32], strides = [1, 1]} : vector<20x128xf32> to vector<20x32xf32>
    %60 = vector.extract_strided_slice %56 {offsets = [0, 96], sizes = [20, 32], strides = [1, 1]} : vector<20x128xf32> to vector<20x32xf32>
    %cst_27 = arith.constant dense<0.000000e+00> : vector<20xf32>
    %61 = vector.multi_reduction <add>, %46, %cst_27 [1] : vector<20x32xf32> to vector<20xf32>
    %62 = vector.shape_cast %61 : vector<20xf32> to vector<20x1xf32>
    %cst_28 = arith.constant 3.200000e+01 : f32
    %63 = vector.broadcast %cst_28 : f32 to vector<20x1xf32>
    %64 = arith.divf %62, %63 : vector<20x1xf32>
    %65 = vector.broadcast %64 : vector<20x1xf32> to vector<20x32xf32>
    %66 = arith.subf %46, %65 : vector<20x32xf32>
    %67 = arith.mulf %66, %66 : vector<20x32xf32>
    %cst_29 = arith.constant dense<0.000000e+00> : vector<20xf32>
    %68 = vector.multi_reduction <add>, %67, %cst_29 [1] : vector<20x32xf32> to vector<20xf32>
    %69 = vector.shape_cast %68 : vector<20xf32> to vector<20x1xf32>
    %cst_30 = arith.constant 3.200000e+01 : f32
    %70 = vector.broadcast %cst_30 : f32 to vector<20x1xf32>
    %71 = arith.divf %69, %70 : vector<20x1xf32>
    %72 = vector.broadcast %64 : vector<20x1xf32> to vector<20x32xf32>
    %73 = arith.subf %46, %72 : vector<20x32xf32>
    %cst_31 = arith.constant 9.99999996E-13 : f32
    %74 = vector.broadcast %cst_31 : f32 to vector<20x1xf32>
    %75 = arith.addf %71, %74 : vector<20x1xf32>
    %76 = math.rsqrt %75 : vector<20x1xf32>
    %77 = vector.broadcast %76 : vector<20x1xf32> to vector<20x32xf32>
    %78 = arith.mulf %73, %77 : vector<20x32xf32>
    %79 = arith.mulf %78, %57 : vector<20x32xf32>
    %80 = arith.addf %79, %58 : vector<20x32xf32>
    %81 = vector.broadcast %10 : vector<20x1xf32> to vector<20x32xf32>
    %82 = arith.mulf %80, %81 : vector<20x32xf32>
    %83 = vector.broadcast %12 : vector<20x1xf32> to vector<20x32xf32>
    %84 = arith.mulf %80, %83 : vector<20x32xf32>
    %85 = tpu.concatenate %82, %84, %10, %12 in 1 : vector<20x32xf32>, vector<20x32xf32>, vector<20x1xf32>, vector<20x1xf32> -> vector<20x66xf32>
    %cst_32 = arith.constant dense<0.000000e+00> : vector<20x96xf32>
    %86 = tpu.matmul %85, %48, %cst_32 {dimension_numbers = #tpu.dot_dimension_numbers<[1], [0], [0], [1], [0, 0, 1, 1], [], []>} : vector<20x66xf32>, vector<66x96xf32>, vector<20x96xf32> -> vector<20x96xf32>
    %87 = vector.extract_strided_slice %86 {offsets = [0, 0], sizes = [20, 32], strides = [1, 1]} : vector<20x96xf32> to vector<20x32xf32>
    %88 = vector.extract_strided_slice %86 {offsets = [0, 32], sizes = [20, 32], strides = [1, 1]} : vector<20x96xf32> to vector<20x32xf32>
    %89 = vector.extract_strided_slice %86 {offsets = [0, 64], sizes = [20, 32], strides = [1, 1]} : vector<20x96xf32> to vector<20x32xf32>
    %90 = vector.broadcast %20 : vector<1x32xf32> to vector<20x32xf32>
    %91 = arith.mulf %87, %90 : vector<20x32xf32>
    %92 = vector.broadcast %27 : vector<1x32xf32> to vector<20x32xf32>
    %93 = arith.mulf %87, %92 : vector<20x32xf32>
    %94 = vector.broadcast %34 : vector<1x32xf32> to vector<20x32xf32>
    %95 = arith.mulf %87, %94 : vector<20x32xf32>
    %96 = vector.broadcast %41 : vector<1x32xf32> to vector<20x32xf32>
    %97 = arith.mulf %87, %96 : vector<20x32xf32>
    %98 = tpu.concatenate %91, %93, %95, %97 in 0 : vector<20x32xf32>, vector<20x32xf32>, vector<20x32xf32>, vector<20x32xf32> -> vector<80x32xf32>
    %cst_33 = arith.constant dense<0.000000e+00> : vector<80x20xf32>
    %99 = tpu.matmul %98, %88, %cst_33 {dimension_numbers = #tpu.dot_dimension_numbers<[1], [1], [0], [0], [0, 0, 1, 0], [], []>} : vector<80x32xf32>, vector<20x32xf32>, vector<80x20xf32> -> vector<80x20xf32>
    %cst_34 = arith.constant 0.353553385 : f32
    %100 = vector.broadcast %cst_34 : f32 to vector<80x20xf32>
    %101 = arith.mulf %99, %100 : vector<80x20xf32>
    %102 = arith.addf %101, %5 : vector<80x20xf32>
    %cst_35 = arith.constant dense<0xFF800000> : vector<80xf32>
    %103 = vector.multi_reduction <maximumf>, %102, %cst_35 [1] : vector<80x20xf32> to vector<80xf32>
    %104 = vector.shape_cast %103 : vector<80xf32> to vector<80x1xf32>
    %105 = vector.broadcast %104 : vector<80x1xf32> to vector<80x20xf32>
    %106 = arith.subf %102, %105 : vector<80x20xf32>
    %107 = math.exp %106 : vector<80x20xf32>
    %cst_36 = arith.constant dense<0.000000e+00> : vector<80xf32>
    %108 = vector.multi_reduction <add>, %107, %cst_36 [1] : vector<80x20xf32> to vector<80xf32>
    %109 = vector.shape_cast %108 : vector<80xf32> to vector<80x1xf32>
    %110 = vector.broadcast %109 : vector<80x1xf32> to vector<80x20xf32>
    %111 = arith.divf %107, %110 : vector<80x20xf32>
    %112 = tpu.concatenate %111, %42 in 1 : vector<80x20xf32>, vector<80x108xf32> -> vector<80x128xf32>
    %c0_37 = arith.constant 0 : index
    %c0_38 = arith.constant 0 : index
    %c0_39 = arith.constant 0 : index
    %113 = vector.load %arg9[%c0_37, %c0_38, %c0_39] : memref<2x80x128xf32, #tpu.memory_space<vmem>>, vector<1x80x128xf32>
    %114 = vector.shape_cast %113 : vector<1x80x128xf32> to vector<80x128xf32>
    %115 = vector.shape_cast %112 : vector<80x128xf32> to vector<1x80x128xf32>
    tpu.vector_store %arg9[%c0_37, %c0_38, %c0_39], %115 {strides = array<i32>} : memref<2x80x128xf32, #tpu.memory_space<vmem>>, vector<1x80x128xf32>,
    %cst_40 = arith.constant dense<0.000000e+00> : vector<80x32xf32>
    %116 = tpu.matmul %111, %89, %cst_40 {dimension_numbers = #tpu.dot_dimension_numbers<[1], [0], [0], [1], [0, 0, 1, 1], [], []>} : vector<80x20xf32>, vector<20x32xf32>, vector<80x32xf32> -> vector<80x32xf32>
    %117 = vector.extract_strided_slice %116 {offsets = [0, 0], sizes = [20, 32], strides = [1, 1]} : vector<80x32xf32> to vector<20x32xf32>
    %118 = vector.broadcast %20 : vector<1x32xf32> to vector<20x32xf32>
    %119 = arith.mulf %117, %118 : vector<20x32xf32>
    %120 = vector.extract_strided_slice %116 {offsets = [20, 0], sizes = [20, 32], strides = [1, 1]} : vector<80x32xf32> to vector<20x32xf32>
    %121 = vector.broadcast %27 : vector<1x32xf32> to vector<20x32xf32>
    %122 = arith.mulf %120, %121 : vector<20x32xf32>
    %123 = arith.addf %119, %122 : vector<20x32xf32>
    %124 = vector.extract_strided_slice %116 {offsets = [40, 0], sizes = [20, 32], strides = [1, 1]} : vector<80x32xf32> to vector<20x32xf32>
    %125 = vector.broadcast %34 : vector<1x32xf32> to vector<20x32xf32>
    %126 = arith.mulf %124, %125 : vector<20x32xf32>
    %127 = arith.addf %123, %126 : vector<20x32xf32>
    %128 = vector.extract_strided_slice %116 {offsets = [60, 0], sizes = [20, 32], strides = [1, 1]} : vector<80x32xf32> to vector<20x32xf32>
    %129 = vector.broadcast %41 : vector<1x32xf32> to vector<20x32xf32>
    %130 = arith.mulf %128, %129 : vector<20x32xf32>
    %131 = arith.addf %127, %130 : vector<20x32xf32>
    %132 = vector.broadcast %10 : vector<20x1xf32> to vector<20x32xf32>
    %133 = arith.mulf %131, %132 : vector<20x32xf32>
    %134 = vector.broadcast %12 : vector<20x1xf32> to vector<20x32xf32>
    %135 = arith.mulf %131, %134 : vector<20x32xf32>
    %136 = tpu.concatenate %133, %135, %10, %12 in 1 : vector<20x32xf32>, vector<20x32xf32>, vector<20x1xf32>, vector<20x1xf32> -> vector<20x66xf32>
    %cst_41 = arith.constant dense<0.000000e+00> : vector<20x32xf32>
    %137 = tpu.matmul %136, %50, %cst_41 {dimension_numbers = #tpu.dot_dimension_numbers<[1], [0], [0], [1], [0, 0, 1, 1], [], []>} : vector<20x66xf32>, vector<66x32xf32>, vector<20x32xf32> -> vector<20x32xf32>
    %138 = arith.addf %46, %137 : vector<20x32xf32>
    %cst_42 = arith.constant dense<0.000000e+00> : vector<20xf32>
    %139 = vector.multi_reduction <add>, %138, %cst_42 [1] : vector<20x32xf32> to vector<20xf32>
    %140 = vector.shape_cast %139 : vector<20xf32> to vector<20x1xf32>
    %cst_43 = arith.constant 3.200000e+01 : f32
    %141 = vector.broadcast %cst_43 : f32 to vector<20x1xf32>
    %142 = arith.divf %140, %141 : vector<20x1xf32>
    %143 = vector.broadcast %142 : vector<20x1xf32> to vector<20x32xf32>
    %144 = arith.subf %138, %143 : vector<20x32xf32>
    %145 = arith.mulf %144, %144 : vector<20x32xf32>
    %cst_44 = arith.constant dense<0.000000e+00> : vector<20xf32>
    %146 = vector.multi_reduction <add>, %145, %cst_44 [1] : vector<20x32xf32> to vector<20xf32>
    %147 = vector.shape_cast %146 : vector<20xf32> to vector<20x1xf32>
    %cst_45 = arith.constant 3.200000e+01 : f32
    %148 = vector.broadcast %cst_45 : f32 to vector<20x1xf32>
    %149 = arith.divf %147, %148 : vector<20x1xf32>
    %150 = vector.broadcast %142 : vector<20x1xf32> to vector<20x32xf32>
    %151 = arith.subf %138, %150 : vector<20x32xf32>
    %cst_46 = arith.constant 9.99999996E-13 : f32
    %152 = vector.broadcast %cst_46 : f32 to vector<20x1xf32>
    %153 = arith.addf %149, %152 : vector<20x1xf32>
    %154 = math.rsqrt %153 : vector<20x1xf32>
    %155 = vector.broadcast %154 : vector<20x1xf32> to vector<20x32xf32>
    %156 = arith.mulf %151, %155 : vector<20x32xf32>
    %157 = arith.mulf %156, %59 : vector<20x32xf32>
    %158 = arith.addf %157, %60 : vector<20x32xf32>
    %159 = vector.broadcast %10 : vector<20x1xf32> to vector<20x32xf32>
    %160 = arith.mulf %158, %159 : vector<20x32xf32>
    %161 = vector.broadcast %12 : vector<20x1xf32> to vector<20x32xf32>
    %162 = arith.mulf %158, %161 : vector<20x32xf32>
    %163 = tpu.concatenate %160, %162, %10, %12 in 1 : vector<20x32xf32>, vector<20x32xf32>, vector<20x1xf32>, vector<20x1xf32> -> vector<20x66xf32>
    %cst_47 = arith.constant dense<0.000000e+00> : vector<20x128xf32>
    %164 = tpu.matmul %163, %52, %cst_47 {dimension_numbers = #tpu.dot_dimension_numbers<[1], [0], [0], [1], [0, 0, 1, 1], [], []>} : vector<20x66xf32>, vector<66x128xf32>, vector<20x128xf32> -> vector<20x128xf32>
    %165 = arith.mulf %164, %164 : vector<20x128xf32>
    %166 = arith.mulf %164, %165 : vector<20x128xf32>
    %cst_48 = arith.constant 4.471500e-02 : f32
    %167 = vector.broadcast %cst_48 : f32 to vector<20x128xf32>
    %168 = arith.mulf %167, %166 : vector<20x128xf32>
    %169 = arith.addf %164, %168 : vector<20x128xf32>
    %cst_49 = arith.constant 0.797884583 : f32
    %170 = vector.broadcast %cst_49 : f32 to vector<20x128xf32>
    %171 = arith.mulf %170, %169 : vector<20x128xf32>
    %172 = math.tanh %171 : vector<20x128xf32>
    %cst_50 = arith.constant 1.000000e+00 : f32
    %173 = vector.broadcast %cst_50 : f32 to vector<20x128xf32>
    %174 = arith.addf %173, %172 : vector<20x128xf32>
    %cst_51 = arith.constant 5.000000e-01 : f32
    %175 = vector.broadcast %cst_51 : f32 to vector<20x128xf32>
    %176 = arith.mulf %175, %174 : vector<20x128xf32>
    %177 = arith.mulf %164, %176 : vector<20x128xf32>
    %178 = vector.broadcast %10 : vector<20x1xf32> to vector<20x128xf32>
    %179 = arith.mulf %177, %178 : vector<20x128xf32>
    %180 = vector.broadcast %12 : vector<20x1xf32> to vector<20x128xf32>
    %181 = arith.mulf %177, %180 : vector<20x128xf32>
    %182 = tpu.concatenate %179, %181, %10, %12 in 1 : vector<20x128xf32>, vector<20x128xf32>, vector<20x1xf32>, vector<20x1xf32> -> vector<20x258xf32>
    %cst_52 = arith.constant dense<0.000000e+00> : vector<20x32xf32>
    %183 = tpu.matmul %182, %54, %cst_52 {dimension_numbers = #tpu.dot_dimension_numbers<[1], [0], [0], [1], [0, 0, 1, 1], [], []>} : vector<20x258xf32>, vector<258x32xf32>, vector<20x32xf32> -> vector<20x32xf32>
    %184 = arith.addf %138, %183 : vector<20x32xf32>
    %c1 = arith.constant 1 : index
    %c0_53 = arith.constant 0 : index
    %c0_54 = arith.constant 0 : index
    %185 = vector.load %arg3[%c1, %c0_53, %c0_54] : memref<2x66x96xf32, #tpu.memory_space<vmem>>, vector<1x66x96xf32>
    %186 = vector.shape_cast %185 : vector<1x66x96xf32> to vector<66x96xf32>
    %c1_55 = arith.constant 1 : index
    %c0_56 = arith.constant 0 : index
    %c0_57 = arith.constant 0 : index
    %187 = vector.load %arg4[%c1_55, %c0_56, %c0_57] : memref<2x66x32xf32, #tpu.memory_space<vmem>>, vector<1x66x32xf32>
    %188 = vector.shape_cast %187 : vector<1x66x32xf32> to vector<66x32xf32>
    %c1_58 = arith.constant 1 : index
    %c0_59 = arith.constant 0 : index
    %c0_60 = arith.constant 0 : index
    %189 = vector.load %arg5[%c1_58, %c0_59, %c0_60] : memref<2x66x128xf32, #tpu.memory_space<vmem>>, vector<1x66x128xf32>
    %190 = vector.shape_cast %189 : vector<1x66x128xf32> to vector<66x128xf32>
    %c1_61 = arith.constant 1 : index
    %c0_62 = arith.constant 0 : index
    %c0_63 = arith.constant 0 : index
    %191 = vector.load %arg6[%c1_61, %c0_62, %c0_63] : memref<2x258x32xf32, #tpu.memory_space<vmem>>, vector<1x258x32xf32>
    %192 = vector.shape_cast %191 : vector<1x258x32xf32> to vector<258x32xf32>
    %c1_64 = arith.constant 1 : index
    %c0_65 = arith.constant 0 : index
    %c0_66 = arith.constant 0 : index
    %193 = vector.load %arg2[%c1_64, %c0_65, %c0_66] : memref<3x20x128xf32, #tpu.memory_space<vmem>>, vector<1x20x128xf32>
    %194 = vector.shape_cast %193 : vector<1x20x128xf32> to vector<20x128xf32>
    %195 = vector.extract_strided_slice %194 {offsets = [0, 0], sizes = [20, 32], strides = [1, 1]} : vector<20x128xf32> to vector<20x32xf32>
    %196 = vector.extract_strided_slice %194 {offsets = [0, 32], sizes = [20, 32], strides = [1, 1]} : vector<20x128xf32> to vector<20x32xf32>
    %197 = vector.extract_strided_slice %194 {offsets = [0, 64], sizes = [20, 32], strides = [1, 1]} : vector<20x128xf32> to vector<20x32xf32>
    %198 = vector.extract_strided_slice %194 {offsets = [0, 96], sizes = [20, 32], strides = [1, 1]} : vector<20x128xf32> to vector<20x32xf32>
    %cst_67 = arith.constant dense<0.000000e+00> : vector<20xf32>
    %199 = vector.multi_reduction <add>, %184, %cst_67 [1] : vector<20x32xf32> to vector<20xf32>
    %200 = vector.shape_cast %199 : vector<20xf32> to vector<20x1xf32>
    %cst_68 = arith.constant 3.200000e+01 : f32
    %201 = vector.broadcast %cst_68 : f32 to vector<20x1xf32>
    %202 = arith.divf %200, %201 : vector<20x1xf32>
    %203 = vector.broadcast %202 : vector<20x1xf32> to vector<20x32xf32>
    %204 = arith.subf %184, %203 : vector<20x32xf32>
    %205 = arith.mulf %204, %204 : vector<20x32xf32>
    %cst_69 = arith.constant dense<0.000000e+00> : vector<20xf32>
    %206 = vector.multi_reduction <add>, %205, %cst_69 [1] : vector<20x32xf32> to vector<20xf32>
    %207 = vector.shape_cast %206 : vector<20xf32> to vector<20x1xf32>
    %cst_70 = arith.constant 3.200000e+01 : f32
    %208 = vector.broadcast %cst_70 : f32 to vector<20x1xf32>
    %209 = arith.divf %207, %208 : vector<20x1xf32>
    %210 = vector.broadcast %202 : vector<20x1xf32> to vector<20x32xf32>
    %211 = arith.subf %184, %210 : vector<20x32xf32>
    %cst_71 = arith.constant 9.99999996E-13 : f32
    %212 = vector.broadcast %cst_71 : f32 to vector<20x1xf32>
    %213 = arith.addf %209, %212 : vector<20x1xf32>
    %214 = math.rsqrt %213 : vector<20x1xf32>
    %215 = vector.broadcast %214 : vector<20x1xf32> to vector<20x32xf32>
    %216 = arith.mulf %211, %215 : vector<20x32xf32>
    %217 = arith.mulf %216, %195 : vector<20x32xf32>
    %218 = arith.addf %217, %196 : vector<20x32xf32>
    %219 = vector.broadcast %10 : vector<20x1xf32> to vector<20x32xf32>
    %220 = arith.mulf %218, %219 : vector<20x32xf32>
    %221 = vector.broadcast %12 : vector<20x1xf32> to vector<20x32xf32>
    %222 = arith.mulf %218, %221 : vector<20x32xf32>
    %223 = tpu.concatenate %220, %222, %10, %12 in 1 : vector<20x32xf32>, vector<20x32xf32>, vector<20x1xf32>, vector<20x1xf32> -> vector<20x66xf32>
    %cst_72 = arith.constant dense<0.000000e+00> : vector<20x96xf32>
    %224 = tpu.matmul %223, %186, %cst_72 {dimension_numbers = #tpu.dot_dimension_numbers<[1], [0], [0], [1], [0, 0, 1, 1], [], []>} : vector<20x66xf32>, vector<66x96xf32>, vector<20x96xf32> -> vector<20x96xf32>
    %225 = vector.extract_strided_slice %224 {offsets = [0, 0], sizes = [20, 32], strides = [1, 1]} : vector<20x96xf32> to vector<20x32xf32>
    %226 = vector.extract_strided_slice %224 {offsets = [0, 32], sizes = [20, 32], strides = [1, 1]} : vector<20x96xf32> to vector<20x32xf32>
    %227 = vector.extract_strided_slice %224 {offsets = [0, 64], sizes = [20, 32], strides = [1, 1]} : vector<20x96xf32> to vector<20x32xf32>
    %228 = vector.broadcast %20 : vector<1x32xf32> to vector<20x32xf32>
    %229 = arith.mulf %225, %228 : vector<20x32xf32>
    %230 = vector.broadcast %27 : vector<1x32xf32> to vector<20x32xf32>
    %231 = arith.mulf %225, %230 : vector<20x32xf32>
    %232 = vector.broadcast %34 : vector<1x32xf32> to vector<20x32xf32>
    %233 = arith.mulf %225, %232 : vector<20x32xf32>
    %234 = vector.broadcast %41 : vector<1x32xf32> to vector<20x32xf32>
    %235 = arith.mulf %225, %234 : vector<20x32xf32>
    %236 = tpu.concatenate %229, %231, %233, %235 in 0 : vector<20x32xf32>, vector<20x32xf32>, vector<20x32xf32>, vector<20x32xf32> -> vector<80x32xf32>
    %cst_73 = arith.constant dense<0.000000e+00> : vector<80x20xf32>
    %237 = tpu.matmul %236, %226, %cst_73 {dimension_numbers = #tpu.dot_dimension_numbers<[1], [1], [0], [0], [0, 0, 1, 0], [], []>} : vector<80x32xf32>, vector<20x32xf32>, vector<80x20xf32> -> vector<80x20xf32>
    %cst_74 = arith.constant 0.353553385 : f32
    %238 = vector.broadcast %cst_74 : f32 to vector<80x20xf32>
    %239 = arith.mulf %237, %238 : vector<80x20xf32>
    %240 = arith.addf %239, %5 : vector<80x20xf32>
    %cst_75 = arith.constant dense<0xFF800000> : vector<80xf32>
    %241 = vector.multi_reduction <maximumf>, %240, %cst_75 [1] : vector<80x20xf32> to vector<80xf32>
    %242 = vector.shape_cast %241 : vector<80xf32> to vector<80x1xf32>
    %243 = vector.broadcast %242 : vector<80x1xf32> to vector<80x20xf32>
    %244 = arith.subf %240, %243 : vector<80x20xf32>
    %245 = math.exp %244 : vector<80x20xf32>
    %cst_76 = arith.constant dense<0.000000e+00> : vector<80xf32>
    %246 = vector.multi_reduction <add>, %245, %cst_76 [1] : vector<80x20xf32> to vector<80xf32>
    %247 = vector.shape_cast %246 : vector<80xf32> to vector<80x1xf32>
    %248 = vector.broadcast %247 : vector<80x1xf32> to vector<80x20xf32>
    %249 = arith.divf %245, %248 : vector<80x20xf32>
    %250 = tpu.concatenate %249, %42 in 1 : vector<80x20xf32>, vector<80x108xf32> -> vector<80x128xf32>
    %c1_77 = arith.constant 1 : index
    %c0_78 = arith.constant 0 : index
    %c0_79 = arith.constant 0 : index
    %251 = vector.load %arg9[%c1_77, %c0_78, %c0_79] : memref<2x80x128xf32, #tpu.memory_space<vmem>>, vector<1x80x128xf32>
    %252 = vector.shape_cast %251 : vector<1x80x128xf32> to vector<80x128xf32>
    %253 = vector.shape_cast %250 : vector<80x128xf32> to vector<1x80x128xf32>
    tpu.vector_store %arg9[%c1_77, %c0_78, %c0_79], %253 {strides = array<i32>} : memref<2x80x128xf32, #tpu.memory_space<vmem>>, vector<1x80x128xf32>,
    %cst_80 = arith.constant dense<0.000000e+00> : vector<80x32xf32>
    %254 = tpu.matmul %249, %227, %cst_80 {dimension_numbers = #tpu.dot_dimension_numbers<[1], [0], [0], [1], [0, 0, 1, 1], [], []>} : vector<80x20xf32>, vector<20x32xf32>, vector<80x32xf32> -> vector<80x32xf32>
    %255 = vector.extract_strided_slice %254 {offsets = [0, 0], sizes = [20, 32], strides = [1, 1]} : vector<80x32xf32> to vector<20x32xf32>
    %256 = vector.broadcast %20 : vector<1x32xf32> to vector<20x32xf32>
    %257 = arith.mulf %255, %256 : vector<20x32xf32>
    %258 = vector.extract_strided_slice %254 {offsets = [20, 0], sizes = [20, 32], strides = [1, 1]} : vector<80x32xf32> to vector<20x32xf32>
    %259 = vector.broadcast %27 : vector<1x32xf32> to vector<20x32xf32>
    %260 = arith.mulf %258, %259 : vector<20x32xf32>
    %261 = arith.addf %257, %260 : vector<20x32xf32>
    %262 = vector.extract_strided_slice %254 {offsets = [40, 0], sizes = [20, 32], strides = [1, 1]} : vector<80x32xf32> to vector<20x32xf32>
    %263 = vector.broadcast %34 : vector<1x32xf32> to vector<20x32xf32>
    %264 = arith.mulf %262, %263 : vector<20x32xf32>
    %265 = arith.addf %261, %264 : vector<20x32xf32>
    %266 = vector.extract_strided_slice %254 {offsets = [60, 0], sizes = [20, 32], strides = [1, 1]} : vector<80x32xf32> to vector<20x32xf32>
    %267 = vector.broadcast %41 : vector<1x32xf32> to vector<20x32xf32>
    %268 = arith.mulf %266, %267 : vector<20x32xf32>
    %269 = arith.addf %265, %268 : vector<20x32xf32>
    %270 = vector.broadcast %10 : vector<20x1xf32> to vector<20x32xf32>
    %271 = arith.mulf %269, %270 : vector<20x32xf32>
    %272 = vector.broadcast %12 : vector<20x1xf32> to vector<20x32xf32>
    %273 = arith.mulf %269, %272 : vector<20x32xf32>
    %274 = tpu.concatenate %271, %273, %10, %12 in 1 : vector<20x32xf32>, vector<20x32xf32>, vector<20x1xf32>, vector<20x1xf32> -> vector<20x66xf32>
    %cst_81 = arith.constant dense<0.000000e+00> : vector<20x32xf32>
    %275 = tpu.matmul %274, %188, %cst_81 {dimension_numbers = #tpu.dot_dimension_numbers<[1], [0], [0], [1], [0, 0, 1, 1], [], []>} : vector<20x66xf32>, vector<66x32xf32>, vector<20x32xf32> -> vector<20x32xf32>
    %276 = arith.addf %184, %275 : vector<20x32xf32>
    %cst_82 = arith.constant dense<0.000000e+00> : vector<20xf32>
    %277 = vector.multi_reduction <add>, %276, %cst_82 [1] : vector<20x32xf32> to vector<20xf32>
    %278 = vector.shape_cast %277 : vector<20xf32> to vector<20x1xf32>
    %cst_83 = arith.constant 3.200000e+01 : f32
    %279 = vector.broadcast %cst_83 : f32 to vector<20x1xf32>
    %280 = arith.divf %278, %279 : vector<20x1xf32>
    %281 = vector.broadcast %280 : vector<20x1xf32> to vector<20x32xf32>
    %282 = arith.subf %276, %281 : vector<20x32xf32>
    %283 = arith.mulf %282, %282 : vector<20x32xf32>
    %cst_84 = arith.constant dense<0.000000e+00> : vector<20xf32>
    %284 = vector.multi_reduction <add>, %283, %cst_84 [1] : vector<20x32xf32> to vector<20xf32>
    %285 = vector.shape_cast %284 : vector<20xf32> to vector<20x1xf32>
    %cst_85 = arith.constant 3.200000e+01 : f32
    %286 = vector.broadcast %cst_85 : f32 to vector<20x1xf32>
    %287 = arith.divf %285, %286 : vector<20x1xf32>
    %288 = vector.broadcast %280 : vector<20x1xf32> to vector<20x32xf32>
    %289 = arith.subf %276, %288 : vector<20x32xf32>
    %cst_86 = arith.constant 9.99999996E-13 : f32
    %290 = vector.broadcast %cst_86 : f32 to vector<20x1xf32>
    %291 = arith.addf %287, %290 : vector<20x1xf32>
    %292 = math.rsqrt %291 : vector<20x1xf32>
    %293 = vector.broadcast %292 : vector<20x1xf32> to vector<20x32xf32>
    %294 = arith.mulf %289, %293 : vector<20x32xf32>
    %295 = arith.mulf %294, %197 : vector<20x32xf32>
    %296 = arith.addf %295, %198 : vector<20x32xf32>
    %297 = vector.broadcast %10 : vector<20x1xf32> to vector<20x32xf32>
    %298 = arith.mulf %296, %297 : vector<20x32xf32>
    %299 = vector.broadcast %12 : vector<20x1xf32> to vector<20x32xf32>
    %300 = arith.mulf %296, %299 : vector<20x32xf32>
    %301 = tpu.concatenate %298, %300, %10, %12 in 1 : vector<20x32xf32>, vector<20x32xf32>, vector<20x1xf32>, vector<20x1xf32> -> vector<20x66xf32>
    %cst_87 = arith.constant dense<0.000000e+00> : vector<20x128xf32>
    %302 = tpu.matmul %301, %190, %cst_87 {dimension_numbers = #tpu.dot_dimension_numbers<[1], [0], [0], [1], [0, 0, 1, 1], [], []>} : vector<20x66xf32>, vector<66x128xf32>, vector<20x128xf32> -> vector<20x128xf32>
    %303 = arith.mulf %302, %302 : vector<20x128xf32>
    %304 = arith.mulf %302, %303 : vector<20x128xf32>
    %cst_88 = arith.constant 4.471500e-02 : f32
    %305 = vector.broadcast %cst_88 : f32 to vector<20x128xf32>
    %306 = arith.mulf %305, %304 : vector<20x128xf32>
    %307 = arith.addf %302, %306 : vector<20x128xf32>
    %cst_89 = arith.constant 0.797884583 : f32
    %308 = vector.broadcast %cst_89 : f32 to vector<20x128xf32>
    %309 = arith.mulf %308, %307 : vector<20x128xf32>
    %310 = math.tanh %309 : vector<20x128xf32>
    %cst_90 = arith.constant 1.000000e+00 : f32
    %311 = vector.broadcast %cst_90 : f32 to vector<20x128xf32>
    %312 = arith.addf %311, %310 : vector<20x128xf32>
    %cst_91 = arith.constant 5.000000e-01 : f32
    %313 = vector.broadcast %cst_91 : f32 to vector<20x128xf32>
    %314 = arith.mulf %313, %312 : vector<20x128xf32>
    %315 = arith.mulf %302, %314 : vector<20x128xf32>
    %316 = vector.broadcast %10 : vector<20x1xf32> to vector<20x128xf32>
    %317 = arith.mulf %315, %316 : vector<20x128xf32>
    %318 = vector.broadcast %12 : vector<20x1xf32> to vector<20x128xf32>
    %319 = arith.mulf %315, %318 : vector<20x128xf32>
    %320 = tpu.concatenate %317, %319, %10, %12 in 1 : vector<20x128xf32>, vector<20x128xf32>, vector<20x1xf32>, vector<20x1xf32> -> vector<20x258xf32>
    %cst_92 = arith.constant dense<0.000000e+00> : vector<20x32xf32>
    %321 = tpu.matmul %320, %192, %cst_92 {dimension_numbers = #tpu.dot_dimension_numbers<[1], [0], [0], [1], [0, 0, 1, 1], [], []>} : vector<20x258xf32>, vector<258x32xf32>, vector<20x32xf32> -> vector<20x32xf32>
    %322 = arith.addf %276, %321 : vector<20x32xf32>
    %cst_93 = arith.constant dense<0.000000e+00> : vector<20xf32>
    %323 = vector.multi_reduction <add>, %322, %cst_93 [1] : vector<20x32xf32> to vector<20xf32>
    %324 = vector.shape_cast %323 : vector<20xf32> to vector<20x1xf32>
    %cst_94 = arith.constant 3.200000e+01 : f32
    %325 = vector.broadcast %cst_94 : f32 to vector<20x1xf32>
    %326 = arith.divf %324, %325 : vector<20x1xf32>
    %327 = vector.broadcast %326 : vector<20x1xf32> to vector<20x32xf32>
    %328 = arith.subf %322, %327 : vector<20x32xf32>
    %329 = arith.mulf %328, %328 : vector<20x32xf32>
    %cst_95 = arith.constant dense<0.000000e+00> : vector<20xf32>
    %330 = vector.multi_reduction <add>, %329, %cst_95 [1] : vector<20x32xf32> to vector<20xf32>
    %331 = vector.shape_cast %330 : vector<20xf32> to vector<20x1xf32>
    %cst_96 = arith.constant 3.200000e+01 : f32
    %332 = vector.broadcast %cst_96 : f32 to vector<20x1xf32>
    %333 = arith.divf %331, %332 : vector<20x1xf32>
    %334 = vector.broadcast %326 : vector<20x1xf32> to vector<20x32xf32>
    %335 = arith.subf %322, %334 : vector<20x32xf32>
    %cst_97 = arith.constant 9.99999996E-13 : f32
    %336 = vector.broadcast %cst_97 : f32 to vector<20x1xf32>
    %337 = arith.addf %333, %336 : vector<20x1xf32>
    %338 = math.rsqrt %337 : vector<20x1xf32>
    %339 = vector.broadcast %338 : vector<20x1xf32> to vector<20x32xf32>
    %340 = arith.mulf %335, %339 : vector<20x32xf32>
    %341 = arith.mulf %340, %3 : vector<20x32xf32>
    %342 = arith.addf %341, %4 : vector<20x32xf32>
    %c0_98 = arith.constant 0 : index
    %c0_99 = arith.constant 0 : index
    %343 = vector.load %arg8[%c0_98, %c0_99] : memref<20x32xf32, #tpu.memory_space<vmem>>, vector<20x32xf32>
    tpu.vector_store %arg8[%c0_98, %c0_99], %342 {strides = array<i32>} : memref<20x32xf32, #tpu.memory_space<vmem>>, vector<20x32xf32>,
    return
  }
}

</mosaic_0001>

<bundles_post_ra>
// kernel: tile.104
= control target key start
LH: loop header
LB: loop body
LE: loop exit
PB: predicated region body
PF: predicated region fallthrough
CT: control target
= control target key end

     0   :  { %vm3_vm0 = vcmask 261120   ;;  %s34_s0 = inlined_call_operand.vmem [shape: f32[2,5,32], index: 0, kind: input, shape index: {}]   ;;  %s35_s1 = inlined_call_operand.vmem [shape: f32[10,32], index: 1, kind: output, shape index: {}]  }
   0x1   :  { %v2_v0 = vld [vmem:[%s34_s0] sm:$0x1f]   ;;  %v10_v1 = vld [vmem:[%s34_s0 + $0x8] sm:$0x1f]  }
   0x2   :  { %4 = vst.msk [vmem:[%s35_s1] sm:$0x1f] %vm3_vm0, %v2_v0   ;;  %11 = vst.msk [vmem:[%s35_s1 + $0x5] sm:$0x1f] %vm3_vm0, %v10_v1  }

// kernel: tile.189
= control target key start
LH: loop header
LB: loop body
LE: loop exit
PB: predicated region body
PF: predicated region fallthrough
CT: control target
= control target key end

     0   :  { %vm103_vm0 = vcmask 1047556   ;;  %vm105_vm1 = vcmask 162816   ;;  %s254_s17 = smov 40   ;;  %s255_s24 = smov 20   ;;  %vm129_vm2 = vcmask 654816   ;;  %vm157_vm3 = vcmask 490816   ;;  %s373_s0 = inlined_call_operand.vmem [shape: f32[4,20,20], index: 0, kind: input, shape index: {}]   ;;  %s374_s1 = inlined_call_operand.vmem [shape: f32[80,20], index: 1, kind: output, shape index: {}]  }
   0x1   :  { %v235_v0 = vld [vmem:[%s373_s0 + $0x1c] sm:$0xf]  ;;  %v236_v1 = vld [vmem:[%s373_s0 + $0x18] sm:$0xf]  ;;  %v237_v2 = vld [vmem:[%s373_s0 + $0x14] sm:$0xf] }
   0x2   :  { %69 = vst [vmem:[#allocation0 + $0x38] sm:$0xf] %v235_v0  ;;  %74 = vst [vmem:[#allocation0 + $0x30] sm:$0xf] %v236_v1  ;;  %v238_v3 = vld [vmem:[%s373_s0 + $0x10] sm:$0xf] }
   0x3   :  { %79 = vst [vmem:[#allocation0 + $0x28] sm:$0xf] %v237_v2  ;;  %v239_v4 = vld [vmem:[%s373_s0 + $0xc] sm:$0xf]  ;;  %v240_v5 = vld [vmem:[%s373_s0 + $0x8] sm:$0xf] }
   0x4   :  { %84 = vst [vmem:[#allocation0 + $0x20] sm:$0xf] %v238_v3  ;;  %89 = vst [vmem:[#allocation0 + $0x18] sm:$0xf] %v239_v4  ;;  %v241_v6 = vld [vmem:[%s373_s0 + $0x4] sm:$0xf] }
   0x5   :  { %94 = vst [vmem:[#allocation0 + $0x10] sm:$0xf] %v240_v5  ;;  %v99_v7 = vld [vmem:[%s373_s0] sm:$0xf]  ;;  %98 = vst [vmem:[#allocation0 + $0x8] sm:$0xf] %v241_v6 }
   0x6   :  { %100 = vst [vmem:[#allocation0] sm:$0xf] %v99_v7  ;;  %v223_v8 = vld [vmem:[%s373_s0 + $0x4c] sm:$0xf]  ;;  %v224_v9 = vld [vmem:[%s373_s0 + $0x48] sm:$0xf] }
   0x7   :  { %v225_v10 = vld [vmem:[%s373_s0 + $0x44] sm:$0xf]  ;;  %9 = vst [vmem:[#allocation0 + $0x98] sm:$0xf] %v223_v8  ;;  %14 = vst [vmem:[#allocation0 + $0x90] sm:$0xf] %v224_v9 }
   0x8   :  { %19 = vst [vmem:[#allocation0 + $0x88] sm:$0xf] %v225_v10  ;;  %v226_v11 = vld [vmem:[%s373_s0 + $0x40] sm:$0xf]  ;;  %v227_v12 = vld [vmem:[%s373_s0 + $0x3c] sm:$0xf] }
   0x9   :  { %v228_v13 = vld [vmem:[%s373_s0 + $0x38] sm:$0xf]  ;;  %24 = vst [vmem:[#allocation0 + $0x80] sm:$0xf] %v226_v11  ;;  %29 = vst [vmem:[#allocation0 + $0x78] sm:$0xf] %v227_v12 }
   0xa   :  { %34 = vst [vmem:[#allocation0 + $0x70] sm:$0xf] %v228_v13  ;;  %v229_v14 = vld [vmem:[%s373_s0 + $0x34] sm:$0xf]  ;;  %v230_v15 = vld [vmem:[%s373_s0 + $0x30] sm:$0xf] }
   0xb   :  { %v231_v16 = vld [vmem:[%s373_s0 + $0x2c] sm:$0xf]  ;;  %39 = vst [vmem:[#allocation0 + $0x68] sm:$0xf] %v229_v14  ;;  %44 = vst [vmem:[#allocation0 + $0x60] sm:$0xf] %v230_v15 }
   0xc   :  { %49 = vst [vmem:[#allocation0 + $0x58] sm:$0xf] %v231_v16  ;;  %v232_v17 = vld [vmem:[%s373_s0 + $0x28] sm:$0xf]  ;;  %v233_v18 = vld [vmem:[%s373_s0 + $0x24] sm:$0xf] }
   0xd   :  { %v234_v19 = vld [vmem:[%s373_s0 + $0x20] sm:$0xf]  ;;  %54 = vst [vmem:[#allocation0 + $0x50] sm:$0xf] %v232_v17  ;;  %59 = vst [vmem:[#allocation0 + $0x48] sm:$0xf] %v233_v18 }
   0xe   :  { %64 = vst [vmem:[#allocation0 + $0x40] sm:$0xf] %v234_v19  ;;  %v124_v20 = vld [vmem:[#allocation0 + $0x3] ss:$8 sm:$0xf0]   ;;  %s253_s0 = smov 60  }
   0xf   :  { %v122_v21 = vld [vmem:[#allocation0 + $0x3] ss:$8 sm:$0xf]   ;;  %v150_v30 = vld [vmem:[#allocation0 + $0x2] ss:$8 sm:$0xf]  }
  0x10   :  { %v126_v22 = vsel %vm103_vm0, %v124_v20, %v122_v21  ;;  %v143_v23 = vld [vmem:[#allocation0 + $0x83] ss:$8 sm:$0xf]   ;;  %v171_v24 = vld [vmem:[#allocation0 + $0x82] ss:$8 sm:$0xf]  }
  0x11   :  { %127 = vrot.lane.b32.xlu0 %v126_v22, %s253_s0  ;;  %144 = vrot.lane.b32.xlu1 %v143_v23, %s253_s0  ;;  %v152_v31 = vld [vmem:[#allocation0 + $0x2] ss:$8 sm:$0xf0]   ;;  %v178_v32 = vld [vmem:[#allocation0 + $0x1] ss:$8 sm:$0xf]  }
  0x12   :  { %v134_v25 = vld [vmem:[#allocation0 + $0x43] ss:$8 sm:$0xf0]   ;;  %v162_v26 = vld [vmem:[#allocation0 + $0x42] ss:$8 sm:$0xf0]   ;;  %v154_v38 = vsel %vm103_vm0, %v152_v31, %v150_v30 }
  0x13   :  { %v180_v33 = vld [vmem:[#allocation0 + $0x1] ss:$8 sm:$0xf0]   ;;  %v101_v34 = vld [vmem:[#allocation0] ss:$8 sm:$0xf]  }
  0x14   :  { %v102_v36 = vld [vmem:[#allocation0] ss:$8 sm:$0xf0]   ;;  %v190_v43 = vld [vmem:[#allocation0 + $0x41] ss:$8 sm:$0xf0]   ;;  %v182_v45 = vsel %vm103_vm0, %v180_v33, %v178_v32 }
  0x15   :  { %v132_v27 = vld [vmem:[#allocation0 + $0x43] ss:$8 sm:$0xf]   ;;  %v160_v28 = vld [vmem:[#allocation0 + $0x42] ss:$8 sm:$0xf]   ;;  %172 = vrot.lane.b32.xlu1 %v171_v24, %s254_s17  ;;  %v104_v39 = vsel %vm103_vm0, %v102_v36, %v101_v34 }
  0x16   :  { %v136_v29 = vsel %vm103_vm0, %v134_v25, %v132_v27  ;;  %v164_v35 = vsel %vm103_vm0, %v162_v26, %v160_v28  ;;  %v117_v37 = vld [vmem:[#allocation0 + $0x80] ss:$8 sm:$0xf]   ;;  %v188_v42 = vld [vmem:[#allocation0 + $0x41] ss:$8 sm:$0xf]  }
  0x17   :  { %137 = vrot.lane.b32.xlu0 %v136_v29, %s253_s0  ;;  %243 = vst.msk [vmem:[%s374_s1 + $0x10] sm:$0xf] %vm105_vm1, %v117_v37   ;;  %v108_v40 = vld [vmem:[#allocation0 + $0x40] ss:$8 sm:$0xf]   ;;  %106 = vst.msk [vmem:[%s374_s1] sm:$0xff] %vm105_vm1, %v104_v39   ;;  %v192_v46 = vsel %vm103_vm0, %v190_v43, %v188_v42 }
  0x18   :  { %v110_v41 = vld [vmem:[#allocation0 + $0x40] ss:$8 sm:$0xf0]   ;;  %v199_v47 = vld [vmem:[#allocation0 + $0x81] ss:$8 sm:$0xf]  }
  0x19   :  { %v112_v44 = vsel %vm103_vm0, %v110_v41, %v108_v40  ;;  %155 = vrot.lane.b32.xlu1 %v154_v38, %s254_s17  ;;  %vm185_vm4 = vcmask 326816  }
  0x1a   :  { %242 = vst.msk [vmem:[%s374_s1 + $0x8] sm:$0xff] %vm105_vm1, %v112_v44  }
  0x1b   :  { %165 = vrot.lane.b32.xlu0 %v164_v35, %s254_s17 }
  0x1d   :  { %193 = vrot.lane.b32.xlu1 %v192_v46, %s255_s24 }
  0x1f   :  { %183 = vrot.lane.b32.xlu0 %v182_v45, %s255_s24 }
  0x23   :  { %200 = vrot.lane.b32.xlu0 %v199_v47, %s255_s24 }
  0x83   :  { %v128_v48 = vpop.permute.xlu0 %127   ;;  %v145_v49 = vpop.permute.xlu1 %144  }
  0x84   :  { %130 = vst.msk [vmem:[%s374_s1] sm:$0xff] %vm129_vm2, %v128_v48   ;;  %245 = vst.msk [vmem:[%s374_s1 + $0x10] sm:$0xf] %vm129_vm2, %v145_v49  }
  0x87   :  { %v173_v51 = vpop.permute.xlu1 %172  }
  0x88   :  { %247 = vst.msk [vmem:[%s374_s1 + $0x10] sm:$0xf] %vm157_vm3, %v173_v51  }
  0x89   :  { %v138_v50 = vpop.permute.xlu0 %137  }
  0x8a   :  { %244 = vst.msk [vmem:[%s374_s1 + $0x8] sm:$0xff] %vm129_vm2, %v138_v50  }
  0x8b   :  { %v156_v53 = vpop.permute.xlu1 %155  }
  0x8c   :  { %158 = vst.msk [vmem:[%s374_s1] sm:$0xff] %vm157_vm3, %v156_v53  }
  0x8d   :  { %v166_v52 = vpop.permute.xlu0 %165  }
  0x8e   :  { %246 = vst.msk [vmem:[%s374_s1 + $0x8] sm:$0xff] %vm157_vm3, %v166_v52  }
  0x8f   :  { %v194_v55 = vpop.permute.xlu1 %193  }
  0x90   :  { %248 = vst.msk [vmem:[%s374_s1 + $0x8] sm:$0xff] %vm185_vm4, %v194_v55  }
  0x91   :  { %v184_v54 = vpop.permute.xlu0 %183  }
  0x92   :  { %186 = vst.msk [vmem:[%s374_s1] sm:$0xff] %vm185_vm4, %v184_v54  }
  0x95   :  { %v201_v56 = vpop.permute.xlu0 %200  }
  0x96   :  { %249 = vst.msk [vmem:[%s374_s1 + $0x10] sm:$0xf] %vm185_vm4, %v201_v56  }

// kernel: vit_contrastive_forward.1
= control target key start
LH: loop header
LB: loop body
LE: loop exit
PB: predicated region body
PF: predicated region fallthrough
CT: control target
= control target key end

     0   :  { %v3849_v3 = vmov 0.0   ;;  %vm3850_vm0 = vmmov 0   ;;  %vm363_vm1 = vcmask 261120   ;;  %vm370_vm2 = vcmask 257024   ;;  %s3851_s24 = smov 96   ;;  %s3852_s25 = smov 32   ;;  %s5377_s1 = inlined_call_operand.vmem [shape: f32[384,32], index: 1, kind: input, shape index: {}]   ;;  %s5378_s0 = inlined_call_operand.vmem [shape: f32[20,384], index: 0, kind: input, shape index: {}]   ;;  %s5379_s2 = inlined_call_operand.vmem [shape: f32[3,20,128], index: 2, kind: input, shape index: {}]   ;;  %s5380_s3 = inlined_call_operand.vmem [shape: f32[2,66,96], index: 3, kind: input, shape index: {}]   ;;  %s5381_s7 = inlined_call_operand.vmem [shape: f32[80,20], index: 7, kind: input, shape index: {}]   ;;  %s5382_s9 = inlined_call_operand.vmem [shape: f32[2,80,128], index: 9, kind: output, shape index: {1}]   ;;  %s5383_s4 = inlined_call_operand.vmem [shape: f32[2,66,32], index: 4, kind: input, shape index: {}]   ;;  %s5384_s5 = inlined_call_operand.vmem [shape: f32[2,66,128], index: 5, kind: input, shape index: {}]   ;;  %s5385_s6 = inlined_call_operand.vmem [shape: f32[2,258,32], index: 6, kind: input, shape index: {}]   ;;  %s5386_s8 = inlined_call_operand.vmem [shape: f32[20,32], index: 8, kind: output, shape index: {0}]  }
   0x1   :  { %v123_v0 = vld [vmem:[%s5377_s1 + $0xf8] sm:$0xff]  ;;  %v122_v2 = vld [vmem:[%s5377_s1 + $0xf0] sm:$0xff]  ;;  %3397 = vmatprep.subr.mxu1 %v3849_v3  ;;  %3429 = vmatprep.mubr.msk.f32.mxu1 %vm3850_vm0, %v3849_v3  ;;  %v121_v5 = vld [vmem:[%s5377_s1 + $0xe8] sm:$0xff]  ;;  %vm462_vm3 = vcmask 1041408   ;;  %vm444_vm5 = vcmask 523264   ;;  %vm448_vm6 = vcmask 531456  }
   0x2   :  { %v107_v1 = vld [vmem:[%s5377_s1 + $0x78] sm:$0xff]  ;;  %3123 = vmatprep.subr.mxu0 %v123_v0  ;;  %v106_v4 = vld [vmem:[%s5377_s1 + $0x70] sm:$0xff]  ;;  %v105_v7 = vld [vmem:[%s5377_s1 + $0x68] sm:$0xff]  ;;  %vm452_vm7 = vcmask 539648   ;;  %s3853_s23 = smov 64  }
   0x3   :  { %3124 = vmatpush3.msra.mxu0 %v107_v1  ;;  %v139_v6 = vld [vmem:[%s5377_s1 + $0x178] sm:$0xff]  ;;  %v138_v8 = vld [vmem:[%s5377_s1 + $0x170] sm:$0xff]  ;;  %v120_v9 = vld [vmem:[%s5377_s1 + $0xe0] sm:$0xff] }
   0x4   :  { %3125 = vmatprep.subr.mxu0 %v122_v2  ;;  %3398 = vmatpush3.msra.mxu1 %v139_v6  ;;  %v137_v10 = vld [vmem:[%s5377_s1 + $0x168] sm:$0xff]  ;;  %v104_v11 = vld [vmem:[%s5377_s1 + $0x60] sm:$0xff]  ;;  %v119_v12 = vld [vmem:[%s5377_s1 + $0xd8] sm:$0xff] }
   0x5   :  { %3126 = vmatpush3.msra.mxu0 %v106_v4  ;;  %3399 = vmatprep.subr.mxu1 %v3849_v3  ;;  %v136_v13 = vld [vmem:[%s5377_s1 + $0x160] sm:$0xff]  ;;  %v103_v14 = vld [vmem:[%s5377_s1 + $0x58] sm:$0xff]  ;;  %v118_v15 = vld [vmem:[%s5377_s1 + $0xd0] sm:$0xff] }
   0x6   :  { %3127 = vmatprep.subr.mxu0 %v121_v5  ;;  %3400 = vmatpush3.msra.mxu1 %v138_v8  ;;  %v135_v16 = vld [vmem:[%s5377_s1 + $0x158] sm:$0xff]  ;;  %v102_v17 = vld [vmem:[%s5377_s1 + $0x50] sm:$0xff]  ;;  %v117_v18 = vld [vmem:[%s5377_s1 + $0xc8] sm:$0xff] }
   0x7   :  { %3128 = vmatpush3.msra.mxu0 %v105_v7  ;;  %3401 = vmatprep.subr.mxu1 %v3849_v3  ;;  %v134_v19 = vld [vmem:[%s5377_s1 + $0x150] sm:$0xff]  ;;  %v101_v20 = vld [vmem:[%s5377_s1 + $0x48] sm:$0xff]  ;;  %v116_v21 = vld [vmem:[%s5377_s1 + $0xc0] sm:$0xff] }
   0x8   :  { %3129 = vmatprep.subr.mxu0 %v120_v9  ;;  %3402 = vmatpush3.msra.mxu1 %v137_v10  ;;  %v133_v22 = vld [vmem:[%s5377_s1 + $0x148] sm:$0xff]  ;;  %v100_v23 = vld [vmem:[%s5377_s1 + $0x40] sm:$0xff]  ;;  %v115_v24 = vld [vmem:[%s5377_s1 + $0xb8] sm:$0xff] }
   0x9   :  { %3130 = vmatpush3.msra.mxu0 %v104_v11  ;;  %3403 = vmatprep.subr.mxu1 %v3849_v3  ;;  %v132_v25 = vld [vmem:[%s5377_s1 + $0x140] sm:$0xff]  ;;  %v99_v26 = vld [vmem:[%s5377_s1 + $0x38] sm:$0xff]  ;;  %v114_v27 = vld [vmem:[%s5377_s1 + $0xb0] sm:$0xff] }
   0xa   :  { %3131 = vmatprep.subr.mxu0 %v119_v12  ;;  %3404 = vmatpush3.msra.mxu1 %v136_v13  ;;  %v131_v28 = vld [vmem:[%s5377_s1 + $0x138] sm:$0xff]  ;;  %v98_v29 = vld [vmem:[%s5377_s1 + $0x30] sm:$0xff]  ;;  %v113_v30 = vld [vmem:[%s5377_s1 + $0xa8] sm:$0xff] }
   0xb   :  { %3132 = vmatpush3.msra.mxu0 %v103_v14  ;;  %3405 = vmatprep.subr.mxu1 %v3849_v3  ;;  %v130_v31 = vld [vmem:[%s5377_s1 + $0x130] sm:$0xff]  ;;  %v97_v32 = vld [vmem:[%s5377_s1 + $0x28] sm:$0xff]  ;;  %v112_v33 = vld [vmem:[%s5377_s1 + $0xa0] sm:$0xff] }
   0xc   :  { %3133 = vmatprep.subr.mxu0 %v118_v15  ;;  %3406 = vmatpush3.msra.mxu1 %v135_v16  ;;  %v129_v34 = vld [vmem:[%s5377_s1 + $0x128] sm:$0xff]  ;;  %v96_v35 = vld [vmem:[%s5377_s1 + $0x20] sm:$0xff]  ;;  %v111_v36 = vld [vmem:[%s5377_s1 + $0x98] sm:$0xff] }
   0xd   :  { %3134 = vmatpush3.msra.mxu0 %v102_v17  ;;  %3407 = vmatprep.subr.mxu1 %v3849_v3  ;;  %v128_v37 = vld [vmem:[%s5377_s1 + $0x120] sm:$0xff]  ;;  %v95_v38 = vld [vmem:[%s5377_s1 + $0x18] sm:$0xff]  ;;  %v110_v39 = vld [vmem:[%s5377_s1 + $0x90] sm:$0xff] }
   0xe   :  { %3135 = vmatprep.subr.mxu0 %v117_v18  ;;  %3408 = vmatpush3.msra.mxu1 %v134_v19  ;;  %v127_v40 = vld [vmem:[%s5377_s1 + $0x118] sm:$0xff]  ;;  %v94_v41 = vld [vmem:[%s5377_s1 + $0x10] sm:$0xff]  ;;  %v109_v42 = vld [vmem:[%s5377_s1 + $0x88] sm:$0xff] }
   0xf   :  { %3136 = vmatpush3.msra.mxu0 %v101_v20  ;;  %3409 = vmatprep.subr.mxu1 %v3849_v3  ;;  %v84_v43 = vld [vmem:[%s5378_s0 + $0x8] sm:$0xff]  ;;  %v126_v45 = vld [vmem:[%s5377_s1 + $0x110] sm:$0xff]  ;;  %v108_v46 = vld [vmem:[%s5377_s1 + $0x80] sm:$0xff] }
  0x10   :  { %3137 = vmatprep.subr.mxu0 %v116_v21  ;;  %3410 = vmatpush3.msra.mxu1 %v133_v22  ;;  %v93_v44 = vld [vmem:[%s5377_s1 + $0x8] sm:$0xff]  ;;  %v92_v47 = vld [vmem:[%s5377_s1] sm:$0xff]  ;;  %v85_v52 = vld [vmem:[%s5378_s0 + $0x10] sm:$0xff] }
  0x11   :  { %3138 = vmatpush3.msra.mxu0 %v100_v23  ;;  %3411 = vmatprep.subr.mxu1 %v3849_v3  ;;  %v125_v48 = vld [vmem:[%s5377_s1 + $0x108] sm:$0xff]  ;;  %v83_v49 = vld [vmem:[%s5378_s0] sm:$0xff]  ;;  %v86_v53 = vld [vmem:[%s5378_s0 + $0x18] sm:$0xff] }
  0x12   :  { %3139 = vmatprep.subr.mxu0 %v115_v24  ;;  %3412 = vmatpush3.msra.mxu1 %v132_v25  ;;  %v87_v50 = vld [vmem:[%s5378_s0 + $0x20] sm:$0xff]  ;;  %v90_v54 = vld [vmem:[%s5378_s0 + $0x38] sm:$0xf]  ;;  %v88_v55 = vld [vmem:[%s5378_s0 + $0x28] sm:$0xff] }
  0x13   :  { %3140 = vmatpush3.msra.mxu0 %v99_v26  ;;  %3413 = vmatprep.subr.mxu1 %v3849_v3  ;;  %v124_v51 = vld [vmem:[%s5377_s1 + $0x100] sm:$0xff]  ;;  %v89_v56 = vld [vmem:[%s5378_s0 + $0x30] sm:$0xf]  ;;  %v2963_v4 = vld [vmem:[%s5379_s2 + $0x38] sm:$0xff] }
  0x14   :  { %3141 = vmatprep.subr.mxu0 %v114_v27  ;;  %3414 = vmatpush3.msra.mxu1 %v131_v28  ;;  %v91_v57 = vld [vmem:[%s5378_s0 + $0x40] sm:$0xf]  ;;  %v2962_v60 = vld [vmem:[%s5379_s2 + $0x30] sm:$0xff] }
  0x15   :  { %3142 = vmatpush3.msra.mxu0 %v98_v29  ;;  %3415 = vmatprep.subr.mxu1 %v3849_v3  ;;  %v2964_v13 = vld [vmem:[%s5379_s2 + $0x40] sm:$0xf] }
  0x16   :  { %3143 = vmatprep.subr.mxu0 %v113_v30  ;;  %3416 = vmatpush3.msra.mxu1 %v130_v31 }
  0x17   :  { %3144 = vmatpush3.msra.mxu0 %v97_v32  ;;  %3417 = vmatprep.subr.mxu1 %v3849_v3  ;;  %v4137_v32 = vld [vmem:[%s5379_s2 + $0x8] sm:$0xff] }
  0x18   :  { %3145 = vmatprep.subr.mxu0 %v112_v33  ;;  %3418 = vmatpush3.msra.mxu1 %v129_v34  ;;  %v4144_v33 = vld [vmem:[%s5379_s2] sm:$0xff] }
  0x19   :  { %3146 = vmatpush3.msra.mxu0 %v96_v35  ;;  %3419 = vmatprep.subr.mxu1 %v3849_v3 }
  0x1a   :  { %3147 = vmatprep.subr.mxu0 %v111_v36  ;;  %3420 = vmatpush3.msra.mxu1 %v128_v37 }
  0x1b   :  { %3148 = vmatpush3.msra.mxu0 %v95_v38  ;;  %3421 = vmatprep.subr.mxu1 %v3849_v3 }
  0x1c   :  { %3149 = vmatprep.subr.mxu0 %v110_v39  ;;  %3422 = vmatpush3.msra.mxu1 %v127_v40  ;;  %v4157_v39 = vld [vmem:[%s5379_s2 + $0x10] sm:$0xf]  ;;  %v308_v40 = vld [vmem:[%s5380_s3 + $0x40] sm:$0x3] }
  0x1d   :  { %3150 = vmatpush3.msra.mxu0 %v94_v41  ;;  %3423 = vmatprep.subr.mxu1 %v3849_v3  ;;  %v307_v41 = vld [vmem:[%s5380_s3 + $0x38] sm:$0xff] }
  0x1e   :  { %3151 = vmatprep.subr.mxu0 %v109_v42  ;;  %204 = vmatprep.mubr.f32.mxu0 %v84_v43  ;;  %v306_v42 = vld [vmem:[%s5380_s3 + $0x30] sm:$0xff]  ;;  %v305_v43 = vld [vmem:[%s5380_s3 + $0x28] sm:$0xff] }
  0x1f   :  { %3152 = vmatpush3.msra.mxu0 %v93_v44  ;;  %3424 = vmatpush3.msra.mxu1 %v126_v45  ;;  %v304_v44 = vld [vmem:[%s5380_s3 + $0x20] sm:$0xff]  ;;  %v303_v45 = vld [vmem:[%s5380_s3 + $0x18] sm:$0xff] }
  0x20   :  { %3153 = vmatprep.subr.mxu0 %v108_v46  ;;  %3425 = vmatprep.subr.mxu1 %v3849_v3  ;;  %v302_v46 = vld [vmem:[%s5380_s3 + $0x10] sm:$0xff] }
  0x21   :  { %3154 = vmatpush3.msra.mxu0 %v92_v47  ;;  %3426 = vmatpush3.msra.mxu1 %v125_v48 }
  0x22   :  { %205 = vmatmul.mubr.f32.vlgmr.msra.gmra.mxu0 %v83_v49  ;;  %3427 = vmatprep.subr.mxu1 %v3849_v3 }
  0x23   :  { %209 = vmatprep.mubr.f32.mxu0 %v87_v50  ;;  %3428 = vmatpush3.msra.mxu1 %v124_v51 }
  0x24   :  { %3430 = vmatmul.mubr.f32.vlgmr.msra.gmra.mxu1 %v85_v52  ;;  %3438 = vmatprep.subr.mxu0 %v3849_v3 }
  0x25   :  { %3432 = vmatprep.mubr.msk.f32.mxu1 %vm3850_vm0, %v3849_v3  ;;  %3439 = vmatpush3.msk.msra.mxu0 %vm462_vm3, %v308_v40 }
  0x26   :  { %210 = vmatmul.mubr.f32.gmra.mxu0 %v86_v53  ;;  %3440 = vmatprep.subr.mxu0 %v3849_v3  ;;  %v45_v53 = vlaneseq }
  0x27   :  { %214 = vmatprep.mubr.f32.mxu0 %v90_v54  ;;  %3441 = vmatpush3.msra.mxu0 %v307_v41 }
  0x28   :  { %3433 = vmatmul.mubr.f32.gmra.mxu1 %v88_v55  ;;  %3442 = vmatprep.subr.mxu0 %v3849_v3  ;;  %v46_v54 = vshrl.u32 %v45_v53, 7  ;;  %v301_v55 = vld [vmem:[%s5380_s3 + $0x8] sm:$0xff] }
  0x29   :  { %3435 = vmatprep.mubr.msk.f32.mxu1 %vm3850_vm0, %v3849_v3  ;;  %3443 = vmatpush3.msra.mxu0 %v306_v42 }
  0x2a   :  { %215 = vmatmul.mubr.f32.gmra.mxu0 %v89_v56  ;;  %3444 = vmatprep.subr.mxu0 %v3849_v3  ;;  %v47_v56 = vadd.s32 8, %v46_v54 }
  0x2b   :  { %3456 = vmatprep.mubr.msk.f32.mxu0 %vm3850_vm0, %v3849_v3  ;;  %3445 = vmatpush3.msra.mxu0 %v305_v43 }
  0x2c   :  { %3436 = vmatmul.mubr.f32.gmra.mxu1 %v91_v57  ;;  %3446 = vmatprep.subr.mxu0 %v3849_v3  ;;  %v300_v57 = vld [vmem:[%s5380_s3] sm:$0xff]  ;;  %vm50_vm4 = vcmp.lt.s32.totalorder %v47_v56, 10 }
  0x2d   :  { %3447 = vmatpush3.msra.mxu0 %v304_v44 }
  0x2e   :  { %3448 = vmatprep.subr.mxu0 %v3849_v3 }
  0x2f   :  { %3449 = vmatpush3.msra.mxu0 %v303_v45 }
  0x30   :  { %3450 = vmatprep.subr.mxu0 %v3849_v3 }
  0x31   :  { %3451 = vmatpush3.msra.mxu0 %v302_v46 }
  0x32   :  { %3452 = vmatprep.subr.mxu0 %v3849_v3 }
  0x33   :  { %3453 = vmatpush3.msra.mxu0 %v301_v55 }
  0x34   :  { %3454 = vmatprep.subr.mxu0 %v3849_v3 }
  0x35   :  { %3455 = vmatpush3.msra.mxu0 %v300_v57 }
  0xe2   :  { %v3155_v58 = vpop.f32.mrf.mxu0 }
  0xe4   :  { %v3156_v59 = vpop.f32.mrf.mxu0  ;;  %v286_v61 = vpop.f32.mrf.mxu1 }
  0xe5   :  { %v3157_v62 = vadd.f32 %v3156_v59, %v3155_v58 }
  0xe6   :  { %v3158_v63 = vpop.f32.mrf.mxu0  ;;  %v3431_v0 = vpop.f32.mrf.mxu1 }
  0xe7   :  { %v207_v1 = vadd.f32 %v3157_v62, %v2962_v60 }
  0xe8   :  { %v3159_v2 = vpop.f32.mrf.mxu0  ;;  %v291_v5 = vpop.f32.mrf.mxu1 }
  0xe9   :  { %v4107_v6 = vadd.f32 %v286_v61, %v207_v1  ;;  %v3160_v7 = vadd.f32 %v3159_v2, %v3158_v63  ;;  %v4200_v63 = vsel %vm50_vm4, 1.0, %v3849_v3  ;;  %vm561_vm4 = vcmask 1043456  }
  0xea   :  { %v3161_v8 = vpop.f32.mrf.mxu0  ;;  %v3434_v9 = vpop.f32.mrf.mxu1 }
  0xeb   :  { %v212_v10 = vadd.f32 %v3160_v7, %v2963_v4  ;;  %v364_v11 = vsel %vm363_vm1, %v4107_v6, 0.0  ;;  %v4204_v4 = vsub.f32 1.0, %v4200_v63 }
  0xec   :  { %v3162_v12 = vpop.f32.mrf.mxu0  ;;  %365 = vadd.xlane.f32.xlu0 %v364_v11  ;;  %v296_v14 = vpop.f32.mrf.mxu1 }
  0xed   :  { %v3163_v15 = vadd.f32 %v3162_v12, %v3161_v8  ;;  %v4114_v16 = vadd.f32 %v291_v5, %v212_v10 }
  0xee   :  { %v3437_v17 = vpop.f32.mrf.mxu1 }
  0xef   :  { %v217_v18 = vadd.f32 %v3163_v15, %v2964_v13  ;;  %v367_v19 = vsel %vm363_vm1, %v4114_v16, 0.0 }
  0xf0   :  { %368 = vadd.xlane.f32.xlu0 %v367_v19 }
  0xf1   :  { %v4118_v20 = vadd.f32 %v296_v14, %v217_v18 }
  0xf3   :  { %v371_v21 = vsel %vm370_vm2, %v4118_v20, 0.0 }
  0xf4   :  { %372 = vadd.xlane.f32.xlu1 %v371_v21 }
 0x175   :  { %v366_v22 = vpop.xlane.xlu0 %365 }
 0x176   :  { %v375_v23 = vmul.f32 0.03125, %v366_v22 }
 0x178   :  { %v4123_v24 = vsub.f32 %v4107_v6, %v375_v23 }
 0x179   :  { %v369_v25 = vpop.xlane.xlu0 %368 }
 0x17a   :  { %v376_v26 = vmul.f32 0.03125, %v369_v25  ;;  %v381_v27 = vmul.f32 %v4123_v24, %v4123_v24 }
 0x17c   :  { %v4128_v28 = vsub.f32 %v4114_v16, %v376_v26  ;;  %v384_v29 = vsel %vm363_vm1, %v381_v27, 0.0 }
 0x17d   :  { %385 = vadd.xlane.f32.xlu1 %v384_v29  ;;  %v373_v34 = vpop.xlane.xlu1 %372 }
 0x17e   :  { %v382_v30 = vmul.f32 %v4128_v28, %v4128_v28  ;;  %v377_v35 = vmul.f32 0.03125, %v373_v34 }
 0x180   :  { %v387_v31 = vsel %vm363_vm1, %v382_v30, 0.0  ;;  %v4149_v36 = vsub.f32 %v4118_v20, %v377_v35  ;;  %v62_v35 = vand.u32 127, %v45_v53 }
 0x181   :  { %388 = vadd.xlane.f32.xlu0 %v387_v31 }
 0x182   :  { %v383_v37 = vmul.f32 %v4149_v36, %v4149_v36  ;;  %vm64_vm8 = vcmp.lt.s32.totalorder %v62_v35, 8  ;;  %vm68_vm9 = vcmp.ge.s32.totalorder %v62_v35, 8  ;;  %vm69_vm10 = vcmp.lt.s32.totalorder %v62_v35, 16 }
 0x183   :  { %vm70_vm11 = vmand %vm68_vm9, %vm69_vm10  ;;  %vm78_vm12 = vcmp.ge.s32.totalorder %v62_v35, 24  ;;  %vm79_vm13 = vcmp.lt.s32.totalorder %v62_v35, 32  ;;  %vm73_vm14 = vcmp.ge.s32.totalorder %v62_v35, 16  ;;  %vm74_vm15 = vcmp.lt.s32.totalorder %v62_v35, 24 }
 0x184   :  { %v390_v38 = vsel %vm370_vm2, %v383_v37, 0.0  ;;  %vm75_vm9 = vmand %vm73_vm14, %vm74_vm15  ;;  %vm755_vm10 = vcmask 162816  }
 0x18e   :  { %413 = vrot.lane.b32.xlu1 %v4137_v32, %s3851_s24 }
 0x197   :  { %411 = vrot.lane.b32.xlu0 %v4144_v33, %s3851_s24 }
 0x1b2   :  { %391 = vadd.xlane.f32.xlu1 %v390_v38 }
 0x1c3   :  { %415 = vrot.lane.b32.xlu1 %v4157_v39, %s3851_s24 }
 0x206   :  { %v386_v47 = vpop.xlane.xlu1 %385 }
 0x207   :  { %v393_v48 = vmul.f32 0.03125, %v386_v47  ;;  %v4254_v47 = vsel %vm70_vm11, 1.0, %v3849_v3  ;;  %vm1421_vm11 = vcmask 7168  }
 0x209   :  { %v396_v49 = vadd.f32 1e-12, %v393_v48 }
 0x20a   :  { %v389_v50 = vpop.xlane.xlu0 %388  ;;  %v414_v7 = vpop.permute.xlu1 %413 }
 0x20b   :  { %3712 = vrsqrt.f32 %v396_v49  ;;  %v394_v51 = vmul.f32 0.03125, %v389_v50 }
 0x20d   :  { %v397_v52 = vadd.f32 1e-12, %v394_v51 }
 0x20e   :  { %v412_v60 = vpop.permute.xlu0 %411 }
 0x20f   :  { %3714 = vrsqrt.f32 %v397_v52 }
 0x218   :  { %v3713_v58 = vpop.eup %3712 }
 0x219   :  { %v402_v59 = vmul.f32 %v3713_v58, %v4123_v24 }
 0x21b   :  { %v405_v61 = vmul.f32 %v402_v59, %v4144_v33 }
 0x21c   :  { %v3715_v62 = vpop.eup %3714 }
 0x21d   :  { %v420_v0 = vadd.f32 %v412_v60, %v405_v61  ;;  %v403_v1 = vmul.f32 %v3715_v62, %v4128_v28  ;;  %v4278_v60 = vsel %vm75_vm9, 1.0, %v3849_v3 }
 0x21f   :  { %v426_v2 = vmul.f32 0.0, %v420_v0  ;;  %v406_v5 = vmul.f32 %v403_v1, %v4137_v32 }
 0x221   :  { %432 = vrot.lane.b32.xlu1 %v426_v2, %s3852_s25  ;;  %v421_v8 = vadd.f32 %v414_v7, %v406_v5 }
 0x223   :  { %v427_v9 = vmul.f32 %v421_v8, %v4204_v4  ;;  %v424_v24 = vmul.f32 %v4200_v63, %v421_v8 }
 0x225   :  { %434 = vrot.lane.b32.xlu0 %v427_v9, %s3852_s25 }
 0x23b   :  { %v392_v10 = vpop.xlane.xlu1 %391 }
 0x23c   :  { %v395_v11 = vmul.f32 0.03125, %v392_v10 }
 0x23e   :  { %v398_v12 = vadd.f32 1e-12, %v395_v11 }
 0x23f   :  { %v416_v15 = vpop.permute.xlu1 %415 }
 0x240   :  { %3716 = vrsqrt.f32 %v398_v12 }
 0x24d   :  { %v3717_v13 = vpop.eup %3716 }
 0x24e   :  { %v404_v14 = vmul.f32 %v3717_v13, %v4149_v36  ;;  %v4233_v36 = vsel %vm64_vm8, 1.0, %v3849_v3  ;;  %vm80_vm8 = vmand %vm78_vm12, %vm79_vm13  ;;  %vm1425_vm12 = vcmask 15360  }
 0x24f   :  { %v4274_v58 = vsel %vm80_vm8, 1.0, %v3849_v3 }
 0x250   :  { %v407_v17 = vmul.f32 %v404_v14, %v4157_v39 }
 0x252   :  { %v422_v18 = vadd.f32 %v416_v15, %v407_v17  ;;  %v36_v15 = vld [vmem:[%s5381_s7 + $0x8] sm:$0xff] }
 0x254   :  { %436 = vrot.lane.b32.xlu1 %v422_v18, %s3852_s25  ;;  %v425_v29 = vmul.f32 0.0, %v422_v18 }
 0x293   :  { %v433_v19 = vpop.permute.xlu1 %432 }
 0x294   :  { %v441_v21 = vsel %vm363_vm1, %v420_v0, %v433_v19  ;;  %v35_v19 = vld [vmem:[%s5381_s7] sm:$0xff] }
 0x295   :  { %v445_v22 = vsel %vm444_vm5, %v441_v21, 1.0 }
 0x296   :  { %v449_v23 = vsel %vm448_vm6, %v445_v22, 0.0 }
 0x297   :  { %3457 = vmatmul.mubr.msk.f32.vlgmr.msra.gmra.mxu0 %vm452_vm7, %v449_v23  ;;  %v435_v25 = vpop.permute.xlu0 %434 }
 0x298   :  { %v442_v26 = vsel %vm363_vm1, %v424_v24, %v435_v25  ;;  %3459 = vmatprep.mubr.msk.f32.mxu0 %vm3850_vm0, %v3849_v3 }
 0x299   :  { %v446_v27 = vsel %vm444_vm5, %v442_v26, %v4200_v63 }
 0x29a   :  { %v450_v28 = vsel %vm448_vm6, %v446_v27, %v4204_v4  ;;  %v37_v27 = vld [vmem:[%s5381_s7 + $0x10] sm:$0xff] }
 0x29b   :  { %3460 = vmatmul.mubr.msk.f32.gmra.mxu0 %vm452_vm7, %v450_v28 }
 0x29c   :  { %3462 = vmatprep.mubr.msk.f32.mxu0 %vm3850_vm0, %v3849_v3 }
 0x2c6   :  { %v437_v30 = vpop.permute.xlu1 %436 }
 0x2c7   :  { %v443_v31 = vsel %vm363_vm1, %v425_v29, %v437_v30 }
 0x2c8   :  { %v447_v32 = vsel %vm444_vm5, %v443_v31, 0.0 }
 0x2c9   :  { %v451_v34 = vsel %vm448_vm6, %v447_v32, 1.0  ;;  %v38_v32 = vld [vmem:[%s5381_s7 + $0x18] sm:$0xff] }
 0x2ca   :  { %3463 = vmatmul.mubr.msk.f32.gmra.mxu0 %vm452_vm7, %v451_v34 }
 0x357   :  { %v4235_v37 = vpop.f32.mrf.mxu0 }
 0x358   :  { %v546_v38 = vmul.f32 %v4233_v36, %v4235_v37  ;;  %v549_v49 = vmul.f32 %v4254_v47, %v4235_v37  ;;  %v555_v0 = vmul.f32 %v4274_v58, %v4235_v37  ;;  %v552_v1 = vmul.f32 %v4278_v60, %v4235_v37 }
 0x359   :  { %v3458_v40 = vpop.f32.mrf.mxu0 }
 0x35a   :  { %3471 = vmatprep.mubr.msk.f32.mxu1 %vm363_vm1, %v546_v38  ;;  %v562_v54 = vrot.slane %v549_v49, 4  ;;  %v571_v9 = vrot.slane %v555_v0, 4  ;;  %v39_v40 = vld [vmem:[%s5381_s7 + $0x20] sm:$0xff] }
 0x35b   :  { %v4240_v41 = vpop.f32.mrf.mxu0 }
 0x35c   :  { %584 = vrot.lane.b32.xlu1 %v4240_v41, %s3851_s24  ;;  %v550_v50 = vmul.f32 %v4254_v47, %v4240_v41  ;;  %v547_v53 = vmul.f32 %v4233_v36, %v4240_v41  ;;  %v556_v62 = vmul.f32 %v4274_v58, %v4240_v41  ;;  %v553_v2 = vmul.f32 %v4278_v60, %v4240_v41 }
 0x35d   :  { %v3461_v42 = vpop.f32.mrf.mxu0 }
 0x35e   :  { %v563_v55 = vrot.slane %v550_v50, 4  ;;  %v572_v8 = vrot.slane %v556_v62, 4 }
 0x360   :  { %v564_v59 = vsel %vm561_vm4, %v562_v54, %v563_v55  ;;  %v573_v12 = vsel %vm561_vm4, %v571_v9, %v572_v8 }
 0x38a   :  { %v4244_v43 = vpop.f32.mrf.mxu0 }
 0x38b   :  { %586 = vrot.lane.b32.xlu0 %v4244_v43, %s3851_s24  ;;  %v548_v51 = vmul.f32 %v4233_v36, %v4244_v43  ;;  %v551_v52 = vmul.f32 %v4254_v47, %v4244_v43  ;;  %v554_v5 = vmul.f32 %v4278_v60, %v4244_v43  ;;  %v557_v7 = vmul.f32 %v4274_v58, %v4244_v43 }
 0x38c   :  { %v3464_v44 = vpop.f32.mrf.mxu0 }
 0x38d   :  { %v577_v56 = vsel %vm561_vm4, %v548_v51, %v562_v54  ;;  %v565_v57 = vrot.slane %v551_v52, 4  ;;  %v578_v10 = vsel %vm561_vm4, %v554_v5, %v571_v9  ;;  %v574_v11 = vrot.slane %v557_v7, 4  ;;  %v41_v52 = vld [vmem:[%s5381_s7 + $0x30] sm:$0xff]  ;;  %v44_v9 = vld [vmem:[%s5381_s7 + $0x48] sm:$0xff] }
 0x38f   :  { %582 = vrot.lane.b32.xlu0 %v4235_v37, %s3851_s24  ;;  %v566_v61 = vsel %vm561_vm4, %v563_v55, %v565_v57  ;;  %v575_v13 = vsel %vm561_vm4, %v572_v8, %v574_v11 }
 0x3ce   :  { %v585_v46 = vpop.permute.xlu1 %584 }
 0x3fd   :  { %v587_v45 = vpop.permute.xlu0 %586 }
 0x3fe   :  { %3465 = vmatprep.subr.msk.mxu1 %vm363_vm1, %v587_v45 }
 0x3ff   :  { %3466 = vmatpush3.xpose.msk.msra.mxu1 %vm363_vm1, %v587_v45 }
 0x400   :  { %3467 = vmatprep.subr.msk.mxu1 %vm363_vm1, %v585_v46 }
 0x401   :  { %v583_v48 = vpop.permute.xlu0 %582 }
 0x403   :  { %3468 = vmatpush3.xpose.msk.msra.mxu1 %vm363_vm1, %v585_v46  ;;  %v40_v46 = vld [vmem:[%s5381_s7 + $0x28] sm:$0xff] }
 0x404   :  { %3469 = vmatprep.subr.msk.mxu1 %vm363_vm1, %v583_v48 }
 0x407   :  { %3470 = vmatpush3.xpose.msk.msra.mxu1 %vm363_vm1, %v583_v48 }
 0x408   :  { %3507 = vmatprep.subr.mxu1 %v3849_v3 }
 0x40a   :  { %3472 = vmatmul.mubr.msk.f32.vlgmr.msra.gmra.mxu1 %vm363_vm1, %v547_v53 }
 0x40b   :  { %3474 = vmatprep.mubr.msk.f32.mxu1 %vm363_vm1, %v577_v56 }
 0x40e   :  { %3475 = vmatmul.mubr.msk.f32.gmra.mxu1 %vm363_vm1, %v564_v59  ;;  %v42_v59 = vld [vmem:[%s5381_s7 + $0x38] sm:$0xff] }
 0x40f   :  { %3477 = vmatprep.mubr.msk.f32.mxu1 %vm363_vm1, %v566_v61 }
 0x412   :  { %3478 = vmatmul.mubr.msk.f32.gmra.mxu1 %vm363_vm1, %v552_v1  ;;  %v43_v1 = vld [vmem:[%s5381_s7 + $0x40] sm:$0xff] }
 0x413   :  { %3480 = vmatprep.mubr.msk.f32.mxu1 %vm363_vm1, %v553_v2 }
 0x416   :  { %3481 = vmatmul.mubr.msk.f32.gmra.mxu1 %vm363_vm1, %v578_v10 }
 0x417   :  { %3483 = vmatprep.mubr.msk.f32.mxu1 %vm363_vm1, %v573_v12 }
 0x41a   :  { %3484 = vmatmul.mubr.msk.f32.gmra.mxu1 %vm363_vm1, %v575_v13 }
 0x41b   :  { %3525 = vmatprep.mubr.msk.f32.mxu1 %vm3850_vm0, %v3849_v3 }
 0x4ca   :  { %v3473_v14 = vpop.f32.mrf.mxu1 }
 0x4cb   :  { %v736_v17 = vmul.f32 0.35355338, %v3473_v14 }
 0x4cc   :  { %v686_v18 = vpop.f32.mrf.mxu1 }
 0x4cd   :  { %v735_v21 = vmul.f32 0.35355338, %v686_v18  ;;  %v746_v22 = vadd.f32 %v736_v17, %v36_v15 }
 0x4ce   :  { %v3476_v23 = vpop.f32.mrf.mxu1 }
 0x4cf   :  { %v759_v24 = vsel %vm755_vm10, %v746_v22, -inf  ;;  %v745_v25 = vadd.f32 %v735_v21, %v35_v19  ;;  %v738_v28 = vmul.f32 0.35355338, %v3476_v23 }
 0x4d0   :  { %760 = vmax.xlane.f32.xlu0 %v759_v24  ;;  %v696_v26 = vpop.f32.mrf.mxu1 }
 0x4d1   :  { %v737_v29 = vmul.f32 0.35355338, %v696_v26  ;;  %v756_v30 = vsel %vm755_vm10, %v745_v25, -inf  ;;  %v748_v45 = vadd.f32 %v738_v28, %v38_v32 }
 0x4d2   :  { %757 = vmax.xlane.f32.xlu1 %v756_v30  ;;  %v3479_v31 = vpop.f32.mrf.mxu1 }
 0x4d3   :  { %v747_v34 = vadd.f32 %v737_v29, %v37_v27  ;;  %v740_v35 = vmul.f32 0.35355338, %v3479_v31  ;;  %v765_v55 = vsel %vm755_vm10, %v748_v45, -inf }
 0x4d4   :  { %v706_v38 = vpop.f32.mrf.mxu1 }
 0x4d5   :  { %v739_v42 = vmul.f32 0.35355338, %v706_v38  ;;  %v762_v44 = vsel %vm755_vm10, %v747_v34, -inf  ;;  %v750_v51 = vadd.f32 %v740_v35, %v40_v46 }
 0x4d6   :  { %763 = vmax.xlane.f32.xlu0 %v762_v44  ;;  %v3482_v48 = vpop.f32.mrf.mxu1 }
 0x4d7   :  { %v749_v49 = vadd.f32 %v739_v42, %v39_v40  ;;  %v742_v53 = vmul.f32 0.35355338, %v3482_v48  ;;  %v771_v0 = vsel %vm755_vm10, %v750_v51, -inf }
 0x4d8   :  { %v716_v50 = vpop.f32.mrf.mxu1 }
 0x4d9   :  { %v741_v54 = vmul.f32 0.35355338, %v716_v50  ;;  %v768_v56 = vsel %vm755_vm10, %v749_v49, -inf  ;;  %v752_v8 = vadd.f32 %v742_v53, %v42_v59 }
 0x4da   :  { %766 = vmax.xlane.f32.xlu0 %v765_v55  ;;  %769 = vmax.xlane.f32.xlu1 %v768_v56  ;;  %v3485_v57 = vpop.f32.mrf.mxu1 }
 0x4db   :  { %v751_v61 = vadd.f32 %v741_v54, %v41_v52  ;;  %v744_v2 = vmul.f32 0.35355338, %v3485_v57  ;;  %v777_v11 = vsel %vm755_vm10, %v752_v8, -inf }
 0x4dc   :  { %v726_v62 = vpop.f32.mrf.mxu1 }
 0x4dd   :  { %v743_v5 = vmul.f32 0.35355338, %v726_v62  ;;  %v774_v7 = vsel %vm755_vm10, %v751_v61, -inf  ;;  %v754_v13 = vadd.f32 %v744_v2, %v44_v9 }
 0x4de   :  { %772 = vmax.xlane.f32.xlu0 %v771_v0  ;;  %775 = vmax.xlane.f32.xlu1 %v774_v7 }
 0x4df   :  { %v753_v10 = vadd.f32 %v743_v5, %v43_v1  ;;  %v783_v14 = vsel %vm755_vm10, %v754_v13, -inf }
 0x4e1   :  { %v780_v12 = vsel %vm755_vm10, %v753_v10, -inf }
 0x4e2   :  { %778 = vmax.xlane.f32.xlu0 %v777_v11  ;;  %781 = vmax.xlane.f32.xlu1 %v780_v12 }
 0x4e6   :  { %784 = vmax.xlane.f32.xlu0 %v783_v14 }
 0x4f3   :  { %890 = vrot.lane.b32.xlu1 %v4244_v43, %s3853_s23 }
 0x559   :  { %v761_v15 = vpop.xlane.xlu0 %760 }
 0x55a   :  { %v787_v17 = vsub.f32 %v746_v22, %v761_v15 }
 0x55b   :  { %v758_v18 = vpop.xlane.xlu1 %757 }
 0x55c   :  { %v798_v19 = vmul.f32 1.442695, %v787_v17  ;;  %v786_v21 = vsub.f32 %v745_v25, %v758_v18 }
 0x55e   :  { %3718 = vpow2.f32 %v798_v19  ;;  %v796_v23 = vmul.f32 1.442695, %v786_v21 }
 0x55f   :  { %v764_v24 = vpop.xlane.xlu0 %763 }
 0x560   :  { %3720 = vpow2.f32 %v796_v23  ;;  %v788_v26 = vsub.f32 %v747_v34, %v764_v24 }
 0x562   :  { %v800_v27 = vmul.f32 1.442695, %v788_v26 }
 0x563   :  { %v767_v28 = vpop.xlane.xlu0 %766  ;;  %v770_v29 = vpop.xlane.xlu1 %769 }
 0x564   :  { %3722 = vpow2.f32 %v800_v27  ;;  %v789_v30 = vsub.f32 %v748_v45, %v767_v28  ;;  %v790_v31 = vsub.f32 %v749_v49, %v770_v29 }
 0x566   :  { %v802_v32 = vmul.f32 1.442695, %v789_v30  ;;  %v804_v35 = vmul.f32 1.442695, %v790_v31 }
 0x567   :  { %v773_v38 = vpop.xlane.xlu0 %772  ;;  %v776_v43 = vpop.xlane.xlu1 %775 }
 0x568   :  { %3724 = vpow2.f32 %v802_v32  ;;  %v791_v22 = vsub.f32 %v750_v51, %v773_v38  ;;  %v792_v40 = vsub.f32 %v751_v61, %v776_v43 }
 0x569   :  { %3726 = vpow2.f32 %v804_v35 }
 0x56a   :  { %v806_v25 = vmul.f32 1.442695, %v791_v22  ;;  %v808_v42 = vmul.f32 1.442695, %v792_v40 }
 0x56b   :  { %v3719_v44 = vpop.eup %3718  ;;  %v779_v46 = vpop.xlane.xlu0 %778 }
 0x56c   :  { %v782_v48 = vpop.xlane.xlu1 %781  ;;  %3728 = vpow2.f32 %v806_v25  ;;  %v793_v34 = vsub.f32 %v752_v8, %v779_v46  ;;  %v819_v52 = vsel %vm755_vm10, %v3719_v44, 0.0 }
 0x56d   :  { %v794_v50 = vsub.f32 %v753_v10, %v782_v48  ;;  %v3721_v45 = vpop.eup %3720  ;;  %3730 = vpow2.f32 %v808_v42  ;;  %820 = vadd.xlane.f32.xlu0 %v819_v52 }
 0x56e   :  { %v810_v49 = vmul.f32 1.442695, %v793_v34  ;;  %v816_v54 = vsel %vm755_vm10, %v3721_v45, 0.0 }
 0x56f   :  { %v812_v53 = vmul.f32 1.442695, %v794_v50  ;;  %v785_v51 = vpop.xlane.xlu0 %784  ;;  %817 = vadd.xlane.f32.xlu1 %v816_v54 }
 0x570   :  { %v891_v55 = vpop.permute.xlu1 %890  ;;  %3732 = vpow2.f32 %v810_v49  ;;  %v795_v56 = vsub.f32 %v754_v13, %v785_v51 }
 0x571   :  { %3486 = vmatprep.subr.msk.mxu0 %vm561_vm4, %v891_v55  ;;  %v3723_v57 = vpop.eup %3722  ;;  %3734 = vpow2.f32 %v812_v53 }
 0x572   :  { %3487 = vmatpush3.msk.msra.mxu0 %vm561_vm4, %v891_v55  ;;  %v814_v59 = vmul.f32 1.442695, %v795_v56  ;;  %v822_v61 = vsel %vm755_vm10, %v3723_v57, 0.0 }
 0x573   :  { %823 = vadd.xlane.f32.xlu1 %v822_v61 }
 0x574   :  { %3736 = vpow2.f32 %v814_v59 }
 0x575   :  { %v3725_v62 = vpop.eup %3724 }
 0x576   :  { %v3727_v0 = vpop.eup %3726  ;;  %v825_v1 = vsel %vm755_vm10, %v3725_v62, 0.0 }
 0x577   :  { %826 = vadd.xlane.f32.xlu0 %v825_v1  ;;  %v828_v2 = vsel %vm755_vm10, %v3727_v0, 0.0 }
 0x578   :  { %829 = vadd.xlane.f32.xlu1 %v828_v2 }
 0x579   :  { %v4354_v5 = vpop.eup %3728 }
 0x57a   :  { %v4356_v7 = vpop.eup %3730  ;;  %v831_v8 = vsel %vm755_vm10, %v4354_v5, 0.0 }
 0x57b   :  { %832 = vadd.xlane.f32.xlu0 %v831_v8  ;;  %v834_v9 = vsel %vm755_vm10, %v4356_v7, 0.0  ;;  %v315_v8 = vld [vmem:[%s5383_s4 + $0x30] sm:$0xff] }
 0x57c   :  { %835 = vadd.xlane.f32.xlu1 %v834_v9  ;;  %v314_v9 = vld [vmem:[%s5383_s4 + $0x28] sm:$0xff] }
 0x57d   :  { %v4362_v10 = vpop.eup %3732 }
 0x57e   :  { %v4364_v11 = vpop.eup %3734  ;;  %v837_v12 = vsel %vm755_vm10, %v4362_v10, 0.0 }
 0x57f   :  { %838 = vadd.xlane.f32.xlu0 %v837_v12  ;;  %v840_v13 = vsel %vm755_vm10, %v4364_v11, 0.0 }
 0x580   :  { %841 = vadd.xlane.f32.xlu1 %v840_v13 }
 0x581   :  { %v4370_v14 = vpop.eup %3736 }
 0x582   :  { %v843_v15 = vsel %vm755_vm10, %v4370_v14, 0.0 }
 0x583   :  { %844 = vadd.xlane.f32.xlu0 %v843_v15 }
 0x591   :  { %886 = vrot.lane.b32.xlu1 %v4235_v37, %s3853_s23 }
 0x599   :  { %888 = vrot.lane.b32.xlu0 %v4240_v41, %s3853_s23 }
 0x5f6   :  { %v821_v17 = vpop.xlane.xlu0 %820 }
 0x5f7   :  { %3738 = vrcp.f32 %v821_v17 }
 0x5f8   :  { %v818_v18 = vpop.xlane.xlu1 %817 }
 0x5f9   :  { %3740 = vrcp.f32 %v818_v18 }
 0x5fc   :  { %v824_v19 = vpop.xlane.xlu1 %823 }
 0x5fd   :  { %3742 = vrcp.f32 %v824_v19 }
 0x600   :  { %v827_v21 = vpop.xlane.xlu0 %826 }
 0x601   :  { %3744 = vrcp.f32 %v827_v21  ;;  %v830_v23 = vpop.xlane.xlu1 %829 }
 0x602   :  { %3746 = vrcp.f32 %v830_v23 }
 0x604   :  { %v3739_v24 = vpop.eup %3738  ;;  %v833_v26 = vpop.xlane.xlu0 %832 }
 0x605   :  { %v849_v27 = vmul.f32 %v3739_v24, %v3719_v44  ;;  %3748 = vrcp.f32 %v833_v26  ;;  %v836_v28 = vpop.xlane.xlu1 %835  ;;  %v312_v24 = vld [vmem:[%s5383_s4 + $0x18] sm:$0xff]  ;;  %v311_v26 = vld [vmem:[%s5383_s4 + $0x10] sm:$0xff] }
 0x606   :  { %v3741_v29 = vpop.eup %3740  ;;  %3750 = vrcp.f32 %v836_v28 }
 0x607   :  { %v867_v37 = vsel %vm755_vm10, %v849_v27, 0.0  ;;  %v847_v41 = vmul.f32 %v3741_v29, %v3721_v45 }
 0x608   :  { %877 = vst [vmem:[%s5382_s9 + $0x8] sm:$0xff] %v867_v37  ;;  %v839_v30 = vpop.xlane.xlu0 %838 }
 0x609   :  { %3752 = vrcp.f32 %v839_v30  ;;  %v842_v31 = vpop.xlane.xlu1 %841  ;;  %v866_v32 = vsel %vm755_vm10, %v847_v41, 0.0  ;;  %3492 = vmatprep.mubr.msk.f32.mxu0 %vm755_vm10, %v847_v41 }
 0x60a   :  { %v3743_v35 = vpop.eup %3742  ;;  %3754 = vrcp.f32 %v842_v31  ;;  %876 = vst [vmem:[%s5382_s9] sm:$0xff] %v866_v32  ;;  %v310_v32 = vld [vmem:[%s5383_s4 + $0x8] sm:$0xff] }
 0x60b   :  { %v851_v38 = vmul.f32 %v3743_v35, %v3723_v57 }
 0x60c   :  { %v845_v43 = vpop.xlane.xlu0 %844 }
 0x60d   :  { %3756 = vrcp.f32 %v845_v43  ;;  %v868_v22 = vsel %vm755_vm10, %v851_v38, 0.0  ;;  %v887_v50 = vpop.permute.xlu1 %886 }
 0x60e   :  { %v3745_v40 = vpop.eup %3744  ;;  %878 = vst [vmem:[%s5382_s9 + $0x10] sm:$0xff] %v868_v22 }
 0x60f   :  { %v3747_v25 = vpop.eup %3746  ;;  %v853_v42 = vmul.f32 %v3745_v40, %v3725_v62 }
 0x610   :  { %v889_v44 = vpop.permute.xlu0 %888  ;;  %v855_v46 = vmul.f32 %v3747_v25, %v3727_v0 }
 0x611   :  { %3488 = vmatprep.subr.mxu0 %v889_v44  ;;  %v869_v48 = vsel %vm755_vm10, %v853_v42, 0.0 }
 0x612   :  { %v3749_v34 = vpop.eup %3748  ;;  %3489 = vmatpush3.msra.mxu0 %v889_v44  ;;  %879 = vst [vmem:[%s5382_s9 + $0x18] sm:$0xff] %v869_v48  ;;  %v870_v52 = vsel %vm755_vm10, %v855_v46, 0.0 }
 0x613   :  { %v3751_v45 = vpop.eup %3750  ;;  %3490 = vmatprep.subr.mxu0 %v887_v50  ;;  %880 = vst [vmem:[%s5382_s9 + $0x20] sm:$0xff] %v870_v52  ;;  %v857_v49 = vmul.f32 %v3749_v34, %v4354_v5  ;;  %v317_v5 = vld [vmem:[%s5383_s4 + $0x40] sm:$0x3] }
 0x614   :  { %3491 = vmatpush3.msra.mxu0 %v887_v50  ;;  %v859_v53 = vmul.f32 %v3751_v45, %v4356_v7  ;;  %v316_v7 = vld [vmem:[%s5383_s4 + $0x38] sm:$0xff]  ;;  %3508 = vmatpush3.msk.msra.mxu1 %vm462_vm3, %v317_v5 }
 0x615   :  { %3493 = vmatmul.mubr.msk.f32.vlgmr.msra.gmra.mxu0 %vm755_vm10, %v849_v27  ;;  %v871_v54 = vsel %vm755_vm10, %v857_v49, 0.0  ;;  %3534 = vmatprep.subr.mxu0 %v3849_v3 }
 0x616   :  { %v3753_v51 = vpop.eup %3752  ;;  %3495 = vmatprep.mubr.msk.f32.mxu0 %vm755_vm10, %v851_v38  ;;  %881 = vst [vmem:[%s5382_s9 + $0x28] sm:$0xff] %v871_v54  ;;  %v872_v55 = vsel %vm755_vm10, %v859_v53, 0.0  ;;  %3509 = vmatprep.subr.mxu1 %v3849_v3 }
 0x617   :  { %v3755_v56 = vpop.eup %3754  ;;  %882 = vst [vmem:[%s5382_s9 + $0x30] sm:$0xff] %v872_v55  ;;  %v861_v57 = vmul.f32 %v3753_v51, %v4362_v10  ;;  %3510 = vmatpush3.msra.mxu1 %v316_v7  ;;  %v313_v10 = vld [vmem:[%s5383_s4 + $0x20] sm:$0xff] }
 0x618   :  { %v863_v59 = vmul.f32 %v3755_v56, %v4364_v11  ;;  %3511 = vmatprep.subr.mxu1 %v3849_v3 }
 0x619   :  { %3496 = vmatmul.mubr.msk.f32.gmra.mxu0 %vm755_vm10, %v853_v42  ;;  %v873_v61 = vsel %vm755_vm10, %v861_v57, 0.0  ;;  %3512 = vmatpush3.msra.mxu1 %v315_v8  ;;  %v309_v42 = vld [vmem:[%s5383_s4] sm:$0xff] }
 0x61a   :  { %v3757_v62 = vpop.eup %3756  ;;  %3498 = vmatprep.mubr.msk.f32.mxu0 %vm755_vm10, %v855_v46  ;;  %883 = vst [vmem:[%s5382_s9 + $0x38] sm:$0xff] %v873_v61  ;;  %v874_v0 = vsel %vm755_vm10, %v863_v59, 0.0  ;;  %3513 = vmatprep.subr.mxu1 %v3849_v3 }
 0x61b   :  { %884 = vst [vmem:[%s5382_s9 + $0x40] sm:$0xff] %v874_v0  ;;  %v865_v1 = vmul.f32 %v3757_v62, %v4370_v14  ;;  %3514 = vmatpush3.msra.mxu1 %v314_v9 }
 0x61c   :  { %3515 = vmatprep.subr.mxu1 %v3849_v3 }
 0x61d   :  { %3499 = vmatmul.mubr.msk.f32.gmra.mxu0 %vm755_vm10, %v857_v49  ;;  %v875_v2 = vsel %vm755_vm10, %v865_v1, 0.0  ;;  %3516 = vmatpush3.msra.mxu1 %v313_v10 }
 0x61e   :  { %3501 = vmatprep.mubr.msk.f32.mxu0 %vm755_vm10, %v859_v53  ;;  %885 = vst [vmem:[%s5382_s9 + $0x48] sm:$0xff] %v875_v2  ;;  %3517 = vmatprep.subr.mxu1 %v3849_v3 }
 0x61f   :  { %3518 = vmatpush3.msra.mxu1 %v312_v24 }
 0x620   :  { %3519 = vmatprep.subr.mxu1 %v3849_v3 }
 0x621   :  { %3502 = vmatmul.mubr.msk.f32.gmra.mxu0 %vm755_vm10, %v861_v57  ;;  %3520 = vmatpush3.msra.mxu1 %v311_v26 }
 0x622   :  { %3504 = vmatprep.mubr.msk.f32.mxu0 %vm755_vm10, %v863_v59  ;;  %3521 = vmatprep.subr.mxu1 %v3849_v3 }
 0x623   :  { %3522 = vmatpush3.msra.mxu1 %v310_v32 }
 0x624   :  { %3523 = vmatprep.subr.mxu1 %v3849_v3 }
 0x625   :  { %3505 = vmatmul.mubr.msk.f32.gmra.mxu0 %vm755_vm10, %v865_v1  ;;  %3524 = vmatpush3.msra.mxu1 %v309_v42 }
 0x626   :  { %3552 = vmatprep.mubr.msk.f32.mxu0 %vm3850_vm0, %v3849_v3 }
 0x6d5   :  { %v3494_v11 = vpop.f32.mrf.mxu0 }
 0x6d6   :  { %v1042_v44 = vmul.f32 %v3494_v11, %v4233_v36 }
 0x6d7   :  { %v992_v12 = vpop.f32.mrf.mxu0 }
 0x6d8   :  { %v1041_v35 = vmul.f32 %v4233_v36, %v992_v12 }
 0x6d9   :  { %v3497_v13 = vpop.f32.mrf.mxu0 }
 0x6da   :  { %v1045_v18 = vmul.f32 %v3497_v13, %v4254_v47 }
 0x6db   :  { %v1002_v14 = vpop.f32.mrf.mxu0 }
 0x6dc   :  { %v1044_v15 = vmul.f32 %v4254_v47, %v1002_v14  ;;  %v1051_v28 = vrot.slane %v1045_v18, 4  ;;  %v1043_v29 = vmul.f32 %v4233_v36, %v1002_v14 }
 0x6dd   :  { %v3500_v17 = vpop.f32.mrf.mxu0 }
 0x6de   :  { %v1050_v21 = vrot.slane %v1044_v15, 4  ;;  %v1061_v45 = vmul.f32 %v3500_v17, %v4278_v60 }
 0x6df   :  { %v1012_v19 = vpop.f32.mrf.mxu0 }
 0x6e0   :  { %v1046_v23 = vmul.f32 %v4254_v47, %v1012_v19  ;;  %v1052_v30 = vsel %vm561_vm4, %v1050_v21, %v1051_v28 }
 0x6e1   :  { %v3503_v27 = vpop.f32.mrf.mxu0  ;;  %v1058_v46 = vadd.f32 %v1052_v30, %v1041_v35 }
 0x6e2   :  { %v1053_v37 = vrot.slane %v1046_v23, 4  ;;  %v1063_v43 = vmul.f32 %v3503_v27, %v4278_v60  ;;  %v1067_v22 = vmul.f32 %v3503_v27, %v4274_v58 }
 0x6e3   :  { %v1022_v41 = vpop.f32.mrf.mxu0  ;;  %v1064_v56 = vadd.f32 %v1061_v45, %v1058_v46  ;;  %v3835_v45 = vld [vmem:[%s5379_s2] sm:$0xff] }
 0x6e4   :  { %v1060_v31 = vadd.f32 %v1053_v37, %v1043_v29  ;;  %v1054_v40 = vsel %vm561_vm4, %v1051_v28, %v1053_v37  ;;  %v1062_v53 = vmul.f32 %v4278_v60, %v1022_v41  ;;  %v1073_v54 = vrot.slane %v1067_v22, 4 }
 0x6e5   :  { %v3506_v38 = vpop.f32.mrf.mxu0  ;;  %v1059_v49 = vadd.f32 %v1054_v40, %v1042_v44 }
 0x6e6   :  { %v1069_v25 = vmul.f32 %v3506_v38, %v4274_v58  ;;  %v1066_v34 = vadd.f32 %v1063_v43, %v1060_v31 }
 0x6e7   :  { %v1032_v48 = vpop.f32.mrf.mxu0  ;;  %v1065_v61 = vadd.f32 %v1062_v53, %v1059_v49  ;;  %v326_v49 = vld [vmem:[%s5384_s5 + $0x40] sm:$0x3]  ;;  %v325_v53 = vld [vmem:[%s5384_s5 + $0x38] sm:$0xff] }
 0x6e8   :  { %v1076_v50 = vrot.slane %v1069_v25, 4  ;;  %v1068_v52 = vmul.f32 %v4274_v58, %v1032_v48  ;;  %3535 = vmatpush3.msk.msra.mxu0 %vm462_vm3, %v326_v49  ;;  %v357_v49 = vld [vmem:[%s5385_s6 + $0xf0] sm:$0xff] }
 0x6e9   :  { %3536 = vmatprep.subr.mxu0 %v3849_v3 }
 0x6ea   :  { %v1083_v51 = vadd.f32 %v1076_v50, %v1066_v34  ;;  %v1074_v55 = vrot.slane %v1068_v52, 4  ;;  %v3834_v52 = vld [vmem:[%s5379_s2 + $0x8] sm:$0xff]  ;;  %3537 = vmatpush3.msra.mxu0 %v325_v53  ;;  %v341_v53 = vld [vmem:[%s5385_s6 + $0x70] sm:$0xff] }
 0x6eb   :  { %3538 = vmatprep.subr.mxu0 %v3849_v3 }
 0x6ec   :  { %v1075_v57 = vsel %vm561_vm4, %v1073_v54, %v1074_v55  ;;  %v1077_v59 = vsel %vm561_vm4, %v1074_v55, %v1076_v50  ;;  %1097 = vrot.lane.b32.xlu0 %v1083_v51, %s3852_s25  ;;  %v1086_v10 = vmul.f32 0.0, %v1083_v51  ;;  %v324_v54 = vld [vmem:[%s5384_s5 + $0x30] sm:$0xff]  ;;  %v322_v51 = vld [vmem:[%s5384_s5 + $0x20] sm:$0xff]  ;;  %v321_v55 = vld [vmem:[%s5384_s5 + $0x18] sm:$0xff] }
 0x6ed   :  { %v1081_v62 = vadd.f32 %v1075_v57, %v1064_v56  ;;  %v1082_v1 = vadd.f32 %v1077_v59, %v1065_v61  ;;  %3539 = vmatpush3.msra.mxu0 %v324_v54  ;;  %v320_v56 = vld [vmem:[%s5384_s5 + $0x10] sm:$0xff]  ;;  %v356_v54 = vld [vmem:[%s5385_s6 + $0xe8] sm:$0xff] }
 0x6ee   :  { %3540 = vmatprep.subr.mxu0 %v3849_v3 }
 0x6ef   :  { %v1087_v0 = vmul.f32 0.0, %v1081_v62  ;;  %v1088_v2 = vmul.f32 %v1082_v1, %v4204_v4  ;;  %v1085_v12 = vmul.f32 %v4200_v63, %v1082_v1 }
 0x6f1   :  { %1093 = vrot.lane.b32.xlu1 %v1087_v0, %s3852_s25 }
 0x6f5   :  { %1095 = vrot.lane.b32.xlu1 %v1088_v2, %s3852_s25 }
 0x75e   :  { %v1098_v8 = vpop.permute.xlu0 %1097 }
 0x75f   :  { %v1104_v14 = vsel %vm363_vm1, %v1086_v10, %v1098_v8  ;;  %v319_v10 = vld [vmem:[%s5384_s5 + $0x8] sm:$0xff] }
 0x760   :  { %v1107_v19 = vsel %vm444_vm5, %v1104_v14, 0.0 }
 0x761   :  { %v1110_v21 = vsel %vm448_vm6, %v1107_v19, 1.0 }
 0x763   :  { %v1094_v5 = vpop.permute.xlu1 %1093 }
 0x764   :  { %v1102_v7 = vsel %vm363_vm1, %v1081_v62, %v1094_v5 }
 0x765   :  { %v1105_v9 = vsel %vm444_vm5, %v1102_v7, 1.0 }
 0x766   :  { %v1108_v11 = vsel %vm448_vm6, %v1105_v9, 0.0 }
 0x767   :  { %3526 = vmatmul.mubr.msk.f32.vlgmr.msra.gmra.mxu1 %vm452_vm7, %v1108_v11  ;;  %v1096_v13 = vpop.permute.xlu1 %1095  ;;  %v318_v11 = vld [vmem:[%s5384_s5] sm:$0xff] }
 0x768   :  { %v1103_v15 = vsel %vm363_vm1, %v1085_v12, %v1096_v13  ;;  %3528 = vmatprep.mubr.msk.f32.mxu1 %vm3850_vm0, %v3849_v3 }
 0x769   :  { %v1106_v17 = vsel %vm444_vm5, %v1103_v15, %v4200_v63 }
 0x76a   :  { %v1109_v18 = vsel %vm448_vm6, %v1106_v17, %v4204_v4 }
 0x76b   :  { %3529 = vmatmul.mubr.msk.f32.gmra.mxu1 %vm452_vm7, %v1109_v18 }
 0x76c   :  { %3531 = vmatprep.mubr.msk.f32.mxu1 %vm3850_vm0, %v3849_v3 }
 0x76f   :  { %3532 = vmatmul.mubr.msk.f32.gmra.mxu1 %vm452_vm7, %v1110_v21 }
 0x827   :  { %v1189_v23 = vpop.f32.mrf.mxu1 }
 0x828   :  { %v4512_v24 = vadd.f32 %v1189_v23, %v4107_v6 }
 0x829   :  { %v3527_v26 = vpop.f32.mrf.mxu1 }
 0x82a   :  { %v1206_v27 = vsel %vm363_vm1, %v4512_v24, 0.0 }
 0x82b   :  { %1207 = vadd.xlane.f32.xlu1 %v1206_v27  ;;  %v1194_v28 = vpop.f32.mrf.mxu1 }
 0x82c   :  { %v4517_v29 = vadd.f32 %v1194_v28, %v4114_v16 }
 0x82d   :  { %v3530_v37 = vpop.f32.mrf.mxu1 }
 0x82e   :  { %v1209_v41 = vsel %vm363_vm1, %v4517_v29, 0.0 }
 0x82f   :  { %1210 = vadd.xlane.f32.xlu0 %v1209_v41  ;;  %v1199_v30 = vpop.f32.mrf.mxu1 }
 0x830   :  { %v4522_v31 = vadd.f32 %v1199_v30, %v4118_v20 }
 0x831   :  { %v3533_v6 = vpop.f32.mrf.mxu1 }
 0x832   :  { %v1212_v32 = vsel %vm370_vm2, %v4522_v31, 0.0 }
 0x833   :  { %1213 = vadd.xlane.f32.xlu0 %v1212_v32 }
 0x83c   :  { %1245 = vrot.lane.b32.xlu1 %v4144_v33, %s3853_s23 }
 0x8b4   :  { %v1208_v35 = vpop.xlane.xlu1 %1207 }
 0x8b5   :  { %v1215_v16 = vmul.f32 0.03125, %v1208_v35 }
 0x8b7   :  { %v4529_v38 = vsub.f32 %v4512_v24, %v1215_v16 }
 0x8b8   :  { %v1211_v43 = vpop.xlane.xlu0 %1210  ;;  %v1246_v57 = vpop.permute.xlu1 %1245 }
 0x8b9   :  { %v1216_v22 = vmul.f32 0.03125, %v1211_v43  ;;  %v1221_v40 = vmul.f32 %v4529_v38, %v4529_v38 }
 0x8bb   :  { %v4534_v20 = vsub.f32 %v4517_v29, %v1216_v22  ;;  %v1224_v25 = vsel %vm363_vm1, %v1221_v40, 0.0 }
 0x8bc   :  { %v1214_v42 = vpop.xlane.xlu0 %1213  ;;  %1225 = vadd.xlane.f32.xlu0 %v1224_v25 }
 0x8bd   :  { %v1217_v44 = vmul.f32 0.03125, %v1214_v42  ;;  %v1222_v33 = vmul.f32 %v4534_v20, %v4534_v20 }
 0x8bf   :  { %v4540_v46 = vsub.f32 %v4522_v31, %v1217_v44  ;;  %v1227_v48 = vsel %vm363_vm1, %v1222_v33, 0.0 }
 0x8c0   :  { %1228 = vadd.xlane.f32.xlu1 %v1227_v48 }
 0x8c1   :  { %v1223_v34 = vmul.f32 %v4540_v46, %v4540_v46 }
 0x8c3   :  { %v1230_v50 = vsel %vm370_vm2, %v1223_v34, 0.0 }
 0x8c4   :  { %1231 = vadd.xlane.f32.xlu0 %v1230_v50 }
 0x8d1   :  { %1247 = vrot.lane.b32.xlu1 %v3834_v52, %s3853_s23 }
 0x8d5   :  { %1259 = vrot.lane.b32.xlu1 %v3834_v52, %s3852_s25  ;;  %v358_v52 = vld [vmem:[%s5385_s6 + $0xf8] sm:$0xff] }
 0x8d6   :  { %3245 = vmatprep.subr.mxu1 %v358_v52 }
 0x8d9   :  { %1249 = vrot.lane.b32.xlu1 %v4157_v39, %s3853_s23 }
 0x8da   :  { %1257 = vrot.lane.b32.xlu0 %v3835_v45, %s3852_s25  ;;  %v342_v45 = vld [vmem:[%s5385_s6 + $0x78] sm:$0xff] }
 0x8db   :  { %3246 = vmatpush3.msra.mxu1 %v342_v45 }
 0x8dc   :  { %3247 = vmatprep.subr.mxu1 %v357_v49 }
 0x8dd   :  { %3248 = vmatpush3.msra.mxu1 %v341_v53 }
 0x8de   :  { %1261 = vrot.lane.b32.xlu0 %v4157_v39, %s3852_s25  ;;  %v323_v39 = vld [vmem:[%s5384_s5 + $0x28] sm:$0xff]  ;;  %3249 = vmatprep.subr.mxu1 %v356_v54 }
 0x8df   :  { %3541 = vmatpush3.msra.mxu0 %v323_v39  ;;  %v340_v39 = vld [vmem:[%s5385_s6 + $0x68] sm:$0xff] }
 0x8e0   :  { %3542 = vmatprep.subr.mxu0 %v3849_v3  ;;  %3250 = vmatpush3.msra.mxu1 %v340_v39 }
 0x8e1   :  { %3543 = vmatpush3.msra.mxu0 %v322_v51  ;;  %v355_v51 = vld [vmem:[%s5385_s6 + $0xe0] sm:$0xff] }
 0x8e2   :  { %3544 = vmatprep.subr.mxu0 %v3849_v3  ;;  %3251 = vmatprep.subr.mxu1 %v355_v51 }
 0x8e3   :  { %3545 = vmatpush3.msra.mxu0 %v321_v55  ;;  %v339_v55 = vld [vmem:[%s5385_s6 + $0x60] sm:$0xff] }
 0x8e4   :  { %3546 = vmatprep.subr.mxu0 %v3849_v3  ;;  %3252 = vmatpush3.msra.mxu1 %v339_v55 }
 0x8e5   :  { %3547 = vmatpush3.msra.mxu0 %v320_v56  ;;  %v354_v56 = vld [vmem:[%s5385_s6 + $0xd8] sm:$0xff] }
 0x8e6   :  { %3548 = vmatprep.subr.mxu0 %v3849_v3  ;;  %3253 = vmatprep.subr.mxu1 %v354_v56 }
 0x8e7   :  { %3549 = vmatpush3.msra.mxu0 %v319_v10  ;;  %v348_v10 = vld [vmem:[%s5385_s6 + $0xa8] sm:$0xff] }
 0x8e8   :  { %3550 = vmatprep.subr.mxu0 %v3849_v3 }
 0x8e9   :  { %3551 = vmatpush3.msra.mxu0 %v318_v11  ;;  %v332_v11 = vld [vmem:[%s5385_s6 + $0x28] sm:$0xff] }
 0x8ea   :  { %3561 = vmatprep.subr.mxu0 %v3849_v3 }
 0x945   :  { %v1226_v59 = vpop.xlane.xlu0 %1225 }
 0x946   :  { %v1233_v61 = vmul.f32 0.03125, %v1226_v59  ;;  %v353_v59 = vld [vmem:[%s5385_s6 + $0xd0] sm:$0xff] }
 0x948   :  { %v1236_v62 = vadd.f32 1e-12, %v1233_v61  ;;  %v337_v61 = vld [vmem:[%s5385_s6 + $0x50] sm:$0xff] }
 0x949   :  { %v1229_v0 = vpop.xlane.xlu1 %1228 }
 0x94a   :  { %3758 = vrsqrt.f32 %v1236_v62  ;;  %v1234_v1 = vmul.f32 0.03125, %v1229_v0  ;;  %v352_v62 = vld [vmem:[%s5385_s6 + $0xc8] sm:$0xff] }
 0x94b   :  { %v336_v0 = vld [vmem:[%s5385_s6 + $0x48] sm:$0xff] }
 0x94c   :  { %v1237_v2 = vadd.f32 1e-12, %v1234_v1  ;;  %v351_v1 = vld [vmem:[%s5385_s6 + $0xc0] sm:$0xff] }
 0x94d   :  { %v1232_v5 = vpop.xlane.xlu0 %1231  ;;  %v1248_v9 = vpop.permute.xlu1 %1247 }
 0x94e   :  { %3760 = vrsqrt.f32 %v1237_v2  ;;  %v1235_v7 = vmul.f32 0.03125, %v1232_v5  ;;  %v335_v2 = vld [vmem:[%s5385_s6 + $0x40] sm:$0xff]  ;;  %v350_v5 = vld [vmem:[%s5385_s6 + $0xb8] sm:$0xff] }
 0x950   :  { %v1238_v8 = vadd.f32 1e-12, %v1235_v7  ;;  %v334_v7 = vld [vmem:[%s5385_s6 + $0x38] sm:$0xff] }
 0x951   :  { %v1258_v14 = vpop.permute.xlu0 %1257  ;;  %v1260_v15 = vpop.permute.xlu1 %1259 }
 0x952   :  { %3762 = vrsqrt.f32 %v1238_v8  ;;  %v349_v8 = vld [vmem:[%s5385_s6 + $0xb0] sm:$0xff] }
 0x955   :  { %v1250_v28 = vpop.permute.xlu1 %1249  ;;  %v1262_v30 = vpop.permute.xlu0 %1261 }
 0x957   :  { %v3759_v12 = vpop.eup %3758 }
 0x958   :  { %v1242_v13 = vmul.f32 %v3759_v12, %v4529_v38  ;;  %v347_v12 = vld [vmem:[%s5385_s6 + $0xa0] sm:$0xff] }
 0x95a   :  { %v1254_v17 = vmul.f32 %v1246_v57, %v1242_v13  ;;  %v338_v57 = vld [vmem:[%s5385_s6 + $0x58] sm:$0xff]  ;;  %v331_v13 = vld [vmem:[%s5385_s6 + $0x20] sm:$0xff] }
 0x95b   :  { %v3761_v18 = vpop.eup %3760  ;;  %3254 = vmatpush3.msra.mxu1 %v338_v57 }
 0x95c   :  { %v1243_v19 = vmul.f32 %v3761_v18, %v4534_v20  ;;  %v1266_v21 = vadd.f32 %v1258_v14, %v1254_v17  ;;  %3255 = vmatprep.subr.mxu1 %v353_v59  ;;  %v346_v14 = vld [vmem:[%s5385_s6 + $0x98] sm:$0xff]  ;;  %v345_v17 = vld [vmem:[%s5385_s6 + $0x90] sm:$0xff] }
 0x95d   :  { %3256 = vmatpush3.msra.mxu1 %v337_v61  ;;  %v329_v18 = vld [vmem:[%s5385_s6 + $0x10] sm:$0xff] }
 0x95e   :  { %v1255_v23 = vmul.f32 %v1248_v9, %v1243_v19  ;;  %v1272_v26 = vmul.f32 0.0, %v1266_v21  ;;  %3257 = vmatprep.subr.mxu1 %v352_v62  ;;  %v333_v9 = vld [vmem:[%s5385_s6 + $0x30] sm:$0xff]  ;;  %v344_v19 = vld [vmem:[%s5385_s6 + $0x88] sm:$0xff] }
 0x95f   :  { %v3763_v27 = vpop.eup %3762  ;;  %3258 = vmatpush3.msra.mxu1 %v336_v0 }
 0x960   :  { %v1267_v37 = vadd.f32 %v1260_v15, %v1255_v23  ;;  %1278 = vrot.lane.b32.xlu1 %v1272_v26, %s3852_s25  ;;  %v1244_v41 = vmul.f32 %v3763_v27, %v4540_v46  ;;  %3259 = vmatprep.subr.mxu1 %v351_v1  ;;  %v330_v15 = vld [vmem:[%s5385_s6 + $0x18] sm:$0xff]  ;;  %v343_v23 = vld [vmem:[%s5385_s6 + $0x80] sm:$0xff] }
 0x961   :  { %3260 = vmatpush3.msra.mxu1 %v335_v2  ;;  %v359_v26 = vld [vmem:[%s5385_s6 + $0x100] sm:$0x3] }
 0x962   :  { %v1273_v6 = vmul.f32 %v1267_v37, %v4204_v4  ;;  %v1256_v32 = vmul.f32 %v1250_v28, %v1244_v41  ;;  %v1270_v22 = vmul.f32 %v4200_v63, %v1267_v37  ;;  %3261 = vmatprep.subr.mxu1 %v350_v5  ;;  %v327_v27 = vld [vmem:[%s5385_s6] sm:$0xff]  ;;  %v4725_v28 = vsel %vm1421_vm11, 1.0, %v3849_v3 }
 0x963   :  { %3262 = vmatpush3.msra.mxu1 %v334_v7  ;;  %v4734_v37 = vsel %vm1421_vm11, %v4200_v63, %v4204_v4  ;;  %v3854_v41 = vmov 1.0  }
 0x964   :  { %v1268_v35 = vadd.f32 %v1262_v30, %v1256_v32  ;;  %1280 = vrot.lane.b32.xlu0 %v1273_v6, %s3852_s25  ;;  %3263 = vmatprep.subr.mxu1 %v349_v8  ;;  %v4740_v30 = vsel %vm1421_vm11, 0.0, %v3854_v41 }
 0x965   :  { %3264 = vmatpush3.msra.mxu1 %v333_v9 }
 0x966   :  { %1282 = vrot.lane.b32.xlu1 %v1268_v35, %s3852_s25  ;;  %v1271_v25 = vmul.f32 0.0, %v1268_v35  ;;  %3265 = vmatprep.subr.mxu1 %v348_v10 }
 0x967   :  { %3266 = vmatpush3.msra.mxu1 %v332_v11 }
 0x968   :  { %3267 = vmatprep.subr.mxu1 %v347_v12 }
 0x969   :  { %3268 = vmatpush3.msra.mxu1 %v331_v13 }
 0x96a   :  { %3269 = vmatprep.subr.mxu1 %v346_v14 }
 0x96b   :  { %3270 = vmatpush3.msra.mxu1 %v330_v15 }
 0x96c   :  { %3271 = vmatprep.subr.mxu1 %v345_v17 }
 0x96d   :  { %3272 = vmatpush3.msra.mxu1 %v329_v18 }
 0x96e   :  { %3273 = vmatprep.subr.mxu1 %v344_v19 }
 0x9d2   :  { %v1279_v16 = vpop.permute.xlu1 %1278 }
 0x9d3   :  { %v1287_v38 = vsel %vm363_vm1, %v1266_v21, %v1279_v16  ;;  %v328_v21 = vld [vmem:[%s5385_s6 + $0x8] sm:$0xff] }
 0x9d4   :  { %v1290_v43 = vsel %vm444_vm5, %v1287_v38, 1.0  ;;  %3274 = vmatpush3.msra.mxu1 %v328_v21 }
 0x9d5   :  { %v1293_v40 = vsel %vm448_vm6, %v1290_v43, 0.0  ;;  %3275 = vmatprep.subr.mxu1 %v343_v23 }
 0x9d6   :  { %v1281_v20 = vpop.permute.xlu0 %1280  ;;  %3553 = vmatmul.mubr.msk.f32.vlgmr.msra.gmra.mxu0 %vm452_vm7, %v1293_v40  ;;  %3276 = vmatpush3.msra.mxu1 %v327_v27 }
 0x9d7   :  { %v1288_v42 = vsel %vm363_vm1, %v1270_v22, %v1281_v20  ;;  %3555 = vmatprep.mubr.msk.f32.mxu0 %vm3850_vm0, %v3849_v3  ;;  %3562 = vmatpush3.msk.msra.mxu0 %vm462_vm3, %v359_v26 }
 0x9d8   :  { %v1291_v44 = vsel %vm444_vm5, %v1288_v42, %v4200_v63  ;;  %v1283_v33 = vpop.permute.xlu1 %1282  ;;  %3572 = vmatprep.subr.mxu0 %v3849_v3 }
 0x9d9   :  { %v1289_v46 = vsel %vm363_vm1, %v1271_v25, %v1283_v33  ;;  %v1294_v48 = vsel %vm448_vm6, %v1291_v44, %v4204_v4 }
 0x9da   :  { %v1292_v34 = vsel %vm444_vm5, %v1289_v46, 0.0  ;;  %3556 = vmatmul.mubr.msk.f32.gmra.mxu0 %vm452_vm7, %v1294_v48 }
 0x9db   :  { %3558 = vmatprep.mubr.msk.f32.mxu0 %vm3850_vm0, %v3849_v3  ;;  %v1295_v50 = vsel %vm448_vm6, %v1292_v34, 1.0 }
 0x9de   :  { %3559 = vmatmul.mubr.msk.f32.gmra.mxu0 %vm452_vm7, %v1295_v50 }
 0x9df   :  { %3563 = vmatprep.mubr.msk.f32.mxu0 %vm3850_vm0, %v3849_v3 }
 0x9e2   :  { %3564 = vmatmul.mubr.msk.f32.vlgmr.msra.gmra.mxu0 %vm1425_vm12, %v4725_v28 }
 0x9e3   :  { %3566 = vmatprep.mubr.msk.f32.mxu0 %vm3850_vm0, %v3849_v3 }
 0x9e6   :  { %3567 = vmatmul.mubr.msk.f32.gmra.mxu0 %vm1425_vm12, %v4734_v37 }
 0x9e7   :  { %3569 = vmatprep.mubr.msk.f32.mxu0 %vm3850_vm0, %v3849_v3 }
 0x9ea   :  { %3570 = vmatmul.mubr.msk.f32.gmra.mxu0 %vm1425_vm12, %v4740_v30 }
 0x9eb   :  { %3590 = vmatprep.mubr.msk.f32.mxu0 %vm3850_vm0, %v3849_v3 }
 0xa96   :  { %v1374_v6 = vpop.f32.mrf.mxu0 }
 0xa97   :  { %v1388_v32 = vmul.f32 %v1374_v6, %v1374_v6 }
 0xa98   :  { %v3554_v35 = vpop.f32.mrf.mxu0 }
 0xa99   :  { %v1391_v16 = vmul.f32 %v1388_v32, %v1374_v6 }
 0xa9a   :  { %v1379_v38 = vpop.f32.mrf.mxu0 }
 0xa9b   :  { %v1394_v43 = vmul.f32 0.044715, %v1391_v16  ;;  %v1389_v22 = vmul.f32 %v1379_v38, %v1379_v38 }
 0xa9c   :  { %v3557_v40 = vpop.f32.mrf.mxu0 }
 0xa9d   :  { %v1397_v20 = vadd.f32 %v1394_v43, %v1374_v6  ;;  %v1392_v25 = vmul.f32 %v1389_v22, %v1379_v38 }
 0xa9e   :  { %v1384_v42 = vpop.f32.mrf.mxu0 }
 0xa9f   :  { %v1400_v44 = vmul.f32 0.7978846, %v1397_v20  ;;  %v1395_v33 = vmul.f32 0.044715, %v1392_v25  ;;  %v1390_v46 = vmul.f32 %v1384_v42, %v1384_v42  ;;  %v4766_v25 = vld [vmem:[%s5379_s2 + $0x20] sm:$0xff] }
 0xaa0   :  { %v3560_v48 = vpop.f32.mrf.mxu0 }
 0xaa1   :  { %3764 = vtanh.f32 %v1400_v44  ;;  %v1398_v34 = vadd.f32 %v1395_v33, %v1379_v38  ;;  %v1393_v50 = vmul.f32 %v1390_v46, %v1384_v42 }
 0xaa2   :  { %v1584_v10 = vpop.f32.mrf.mxu0 }
 0xaa3   :  { %v1401_v52 = vmul.f32 0.7978846, %v1398_v34  ;;  %v1396_v45 = vmul.f32 0.044715, %v1393_v50 }
 0xaa4   :  { %v3565_v11 = vpop.f32.mrf.mxu0 }
 0xaa5   :  { %3766 = vtanh.f32 %v1401_v52  ;;  %v1399_v49 = vadd.f32 %v1396_v45, %v1384_v42 }
 0xaa6   :  { %v1589_v12 = vpop.f32.mrf.mxu0 }
 0xaa7   :  { %v1402_v53 = vmul.f32 0.7978846, %v1399_v49 }
 0xaa8   :  { %v3568_v13 = vpop.f32.mrf.mxu0 }
 0xaa9   :  { %3768 = vtanh.f32 %v1402_v53 }
 0xaaa   :  { %v1594_v14 = vpop.f32.mrf.mxu0 }
 0xaac   :  { %v3571_v15 = vpop.f32.mrf.mxu0 }
 0xaad   :  { %v3011_v15 = vld [vmem:[%s5380_s3 + $0x50] sm:$0xff] }
 0xaae   :  { %v3765_v54 = vpop.eup %3764 }
 0xaaf   :  { %v1406_v39 = vadd.f32 1.0, %v3765_v54 }
 0xab1   :  { %v1409_v51 = vmul.f32 0.5, %v1406_v39 }
 0xab2   :  { %v3767_v55 = vpop.eup %3766 }
 0xab3   :  { %v1412_v56 = vmul.f32 %v1409_v51, %v1374_v6  ;;  %v1407_v57 = vadd.f32 1.0, %v3767_v55  ;;  %v4779_v51 = vld [vmem:[%s5379_s2 + $0x28] sm:$0xf]  ;;  %v4784_v55 = vld [vmem:[%s5379_s2 + $0x18] sm:$0xff] }
 0xab5   :  { %v1410_v59 = vmul.f32 0.5, %v1407_v57  ;;  %v1418_v61 = vmul.f32 0.0, %v1412_v56  ;;  %v3017_v57 = vld [vmem:[%s5380_s3 + $0x80] sm:$0xff] }
 0xab6   :  { %v3769_v62 = vpop.eup %3768 }
 0xab7   :  { %v1413_v0 = vmul.f32 %v1410_v59, %v1379_v38  ;;  %1502 = vmatprep.mubr.f32.mxu1 %v1418_v61  ;;  %v1408_v1 = vadd.f32 1.0, %v3769_v62  ;;  %v3016_v59 = vld [vmem:[%s5380_s3 + $0x78] sm:$0xff]  ;;  %v3015_v61 = vld [vmem:[%s5380_s3 + $0x70] sm:$0xff]  ;;  %v3014_v62 = vld [vmem:[%s5380_s3 + $0x68] sm:$0xff] }
 0xab8   :  { %1503 = vmatmul.mubr.f32.vlgmr.msra.gmra.mxu1 %v1412_v56  ;;  %v3018_v56 = vld [vmem:[%s5380_s3 + $0x88] sm:$0x3] }
 0xab9   :  { %v1419_v2 = vmul.f32 %v1413_v0, %v4204_v4  ;;  %v1416_v5 = vmul.f32 %v4200_v63, %v1413_v0  ;;  %v1411_v7 = vmul.f32 0.5, %v1408_v1  ;;  %3573 = vmatpush3.msk.msra.mxu0 %vm462_vm3, %v3018_v56  ;;  %v3013_v0 = vld [vmem:[%s5380_s3 + $0x60] sm:$0xff]  ;;  %v3012_v1 = vld [vmem:[%s5380_s3 + $0x58] sm:$0xff] }
 0xaba   :  { %3574 = vmatprep.subr.mxu0 %v3849_v3 }
 0xabb   :  { %1507 = vmatprep.mubr.f32.mxu1 %v1419_v2  ;;  %v1414_v8 = vmul.f32 %v1411_v7, %v1384_v42  ;;  %3575 = vmatpush3.msra.mxu0 %v3017_v57 }
 0xabc   :  { %1508 = vmatmul.mubr.f32.gmra.mxu1 %v1416_v5  ;;  %3576 = vmatprep.subr.mxu0 %v3849_v3 }
 0xabd   :  { %1512 = vmatprep.mubr.f32.mxu1 %v1414_v8  ;;  %v1417_v9 = vmul.f32 0.0, %v1414_v8  ;;  %3577 = vmatpush3.msra.mxu0 %v3016_v59 }
 0xabe   :  { %3578 = vmatprep.subr.mxu0 %v3849_v3 }
 0xabf   :  { %3579 = vmatpush3.msra.mxu0 %v3015_v61 }
 0xac0   :  { %1513 = vmatmul.mubr.f32.gmra.mxu1 %v1417_v9  ;;  %3580 = vmatprep.subr.mxu0 %v3849_v3 }
 0xac1   :  { %3581 = vmatpush3.msra.mxu0 %v3014_v62 }
 0xac2   :  { %3582 = vmatprep.subr.mxu0 %v3849_v3 }
 0xac3   :  { %3583 = vmatpush3.msra.mxu0 %v3013_v0 }
 0xac4   :  { %3584 = vmatprep.subr.mxu0 %v3849_v3 }
 0xac5   :  { %3585 = vmatpush3.msra.mxu0 %v3012_v1 }
 0xac6   :  { %3586 = vmatprep.subr.mxu0 %v3849_v3 }
 0xac7   :  { %3587 = vmatpush3.msra.mxu0 %v3011_v15 }
 0xac8   :  { %3588 = vmatprep.subr.mxu0 %v3849_v3 }
 0xb78   :  { %v3277_v17 = vpop.f32.mrf.mxu1 }
 0xb7a   :  { %v3278_v18 = vpop.f32.mrf.mxu1 }
 0xb7b   :  { %v3279_v19 = vadd.f32 %v3278_v18, %v3277_v17  ;;  %v3010_v17 = vld [vmem:[%s5380_s3 + $0x48] sm:$0xff] }
 0xb7c   :  { %v3280_v21 = vpop.f32.mrf.mxu1  ;;  %3589 = vmatpush3.msra.mxu0 %v3010_v17 }
 0xb7d   :  { %v1585_v23 = vadd.f32 %v3279_v19, %v1584_v10 }
 0xb7e   :  { %v3281_v26 = vpop.f32.mrf.mxu1 }
 0xb7f   :  { %v4749_v27 = vadd.f32 %v1585_v23, %v4512_v24  ;;  %v3282_v41 = vadd.f32 %v3281_v26, %v3280_v21 }
 0xb80   :  { %v3283_v6 = vpop.f32.mrf.mxu1 }
 0xb81   :  { %v1590_v32 = vadd.f32 %v3282_v41, %v1589_v12  ;;  %v1669_v35 = vsel %vm363_vm1, %v4749_v27, 0.0 }
 0xb82   :  { %v3284_v16 = vpop.f32.mrf.mxu1  ;;  %1670 = vadd.xlane.f32.xlu0 %v1669_v35 }
 0xb83   :  { %v4754_v38 = vadd.f32 %v1590_v32, %v4517_v29  ;;  %v3285_v43 = vadd.f32 %v3284_v16, %v3283_v6 }
 0xb85   :  { %v1595_v22 = vadd.f32 %v3285_v43, %v1594_v14  ;;  %v1672_v40 = vsel %vm363_vm1, %v4754_v38, 0.0 }
 0xb86   :  { %1673 = vadd.xlane.f32.xlu1 %v1672_v40 }
 0xb87   :  { %v4759_v24 = vadd.f32 %v1595_v22, %v4522_v31 }
 0xb89   :  { %v1675_v20 = vsel %vm370_vm2, %v4759_v24, 0.0 }
 0xb8a   :  { %1676 = vadd.xlane.f32.xlu0 %v1675_v20 }
 0xb97   :  { %1716 = vrot.lane.b32.xlu1 %v4766_v25, %s3851_s24 }
 0xc0b   :  { %v1671_v29 = vpop.xlane.xlu0 %1670 }
 0xc0c   :  { %v1678_v42 = vmul.f32 0.03125, %v1671_v29 }
 0xc0e   :  { %v1681_v44 = vsub.f32 %v4749_v27, %v1678_v42 }
 0xc0f   :  { %v1674_v33 = vpop.xlane.xlu1 %1673 }
 0xc10   :  { %v1679_v46 = vmul.f32 0.03125, %v1674_v33  ;;  %v1684_v31 = vmul.f32 %v1681_v44, %v1681_v44 }
 0xc12   :  { %v1682_v48 = vsub.f32 %v4754_v38, %v1679_v46  ;;  %v1687_v34 = vsel %vm363_vm1, %v1684_v31, 0.0 }
 0xc13   :  { %1688 = vadd.xlane.f32.xlu0 %v1687_v34  ;;  %v1677_v50 = vpop.xlane.xlu0 %1676  ;;  %v1717_v8 = vpop.permute.xlu1 %1716 }
 0xc14   :  { %v1680_v52 = vmul.f32 0.03125, %v1677_v50  ;;  %v1685_v45 = vmul.f32 %v1682_v48, %v1682_v48 }
 0xc16   :  { %v1683_v49 = vsub.f32 %v4759_v24, %v1680_v52  ;;  %v1690_v53 = vsel %vm363_vm1, %v1685_v45, 0.0 }
 0xc17   :  { %1691 = vadd.xlane.f32.xlu0 %v1690_v53 }
 0xc18   :  { %v1686_v54 = vmul.f32 %v1683_v49, %v1683_v49 }
 0xc1a   :  { %v1693_v39 = vsel %vm370_vm2, %v1686_v54, 0.0 }
 0xc1b   :  { %1694 = vadd.xlane.f32.xlu1 %v1693_v39 }
 0xc2c   :  { %1718 = vrot.lane.b32.xlu1 %v4779_v51, %s3851_s24 }
 0xc2d   :  { %1714 = vrot.lane.b32.xlu0 %v4784_v55, %s3851_s24 }
 0xc9c   :  { %v1689_v2 = vpop.xlane.xlu0 %1688 }
 0xc9d   :  { %v1696_v5 = vmul.f32 0.03125, %v1689_v2 }
 0xc9f   :  { %v1699_v7 = vadd.f32 1e-12, %v1696_v5 }
 0xca0   :  { %v1692_v9 = vpop.xlane.xlu0 %1691 }
 0xca1   :  { %3770 = vrsqrt.f32 %v1699_v7  ;;  %v1697_v10 = vmul.f32 0.03125, %v1692_v9 }
 0xca3   :  { %v1700_v11 = vadd.f32 1e-12, %v1697_v10 }
 0xca4   :  { %v1695_v12 = vpop.xlane.xlu1 %1694  ;;  %v1715_v21 = vpop.permute.xlu0 %1714 }
 0xca5   :  { %3772 = vrsqrt.f32 %v1700_v11  ;;  %v1698_v13 = vmul.f32 0.03125, %v1695_v12 }
 0xca7   :  { %v1701_v14 = vadd.f32 1e-12, %v1698_v13 }
 0xca8   :  { %v1719_v40 = vpop.permute.xlu1 %1718 }
 0xca9   :  { %3774 = vrsqrt.f32 %v1701_v14 }
 0xcae   :  { %v3771_v18 = vpop.eup %3770 }
 0xcaf   :  { %v1705_v19 = vmul.f32 %v3771_v18, %v1681_v44 }
 0xcb1   :  { %v1708_v23 = vmul.f32 %v4784_v55, %v1705_v19 }
 0xcb2   :  { %v3773_v26 = vpop.eup %3772 }
 0xcb3   :  { %v1723_v41 = vadd.f32 %v1715_v21, %v1708_v23  ;;  %v1706_v6 = vmul.f32 %v3773_v26, %v1682_v48 }
 0xcb5   :  { %v1729_v32 = vmul.f32 0.0, %v1723_v41  ;;  %v1709_v35 = vmul.f32 %v4766_v25, %v1706_v6 }
 0xcb6   :  { %v3775_v16 = vpop.eup %3774 }
 0xcb7   :  { %1735 = vrot.lane.b32.xlu1 %v1729_v32, %s3852_s25  ;;  %v1707_v43 = vmul.f32 %v3775_v16, %v1683_v49  ;;  %v1724_v22 = vadd.f32 %v1717_v8, %v1709_v35 }
 0xcb9   :  { %v1710_v20 = vmul.f32 %v4779_v51, %v1707_v43  ;;  %v1730_v29 = vmul.f32 %v1724_v22, %v4204_v4  ;;  %v1727_v48 = vmul.f32 %v4200_v63, %v1724_v22 }
 0xcbb   :  { %v1725_v42 = vadd.f32 %v1719_v40, %v1710_v20  ;;  %1737 = vrot.lane.b32.xlu0 %v1730_v29, %s3852_s25 }
 0xcbd   :  { %1739 = vrot.lane.b32.xlu1 %v1725_v42, %s3852_s25  ;;  %v1728_v50 = vmul.f32 0.0, %v1725_v42 }
 0xd29   :  { %v1736_v44 = vpop.permute.xlu1 %1735 }
 0xd2a   :  { %v1744_v33 = vsel %vm363_vm1, %v1723_v41, %v1736_v44 }
 0xd2b   :  { %v1747_v46 = vsel %vm444_vm5, %v1744_v33, 1.0 }
 0xd2c   :  { %v1750_v31 = vsel %vm448_vm6, %v1747_v46, 0.0 }
 0xd2d   :  { %3591 = vmatmul.mubr.msk.f32.vlgmr.msra.gmra.mxu0 %vm452_vm7, %v1750_v31  ;;  %v1738_v34 = vpop.permute.xlu0 %1737  ;;  %v3836_v31 = vld [vmem:[%s5381_s7 + $0x8] sm:$0xff] }
 0xd2e   :  { %v1745_v52 = vsel %vm363_vm1, %v1727_v48, %v1738_v34  ;;  %3593 = vmatprep.mubr.msk.f32.mxu0 %vm3850_vm0, %v3849_v3 }
 0xd2f   :  { %v1748_v45 = vsel %vm444_vm5, %v1745_v52, %v4200_v63  ;;  %v1740_v49 = vpop.permute.xlu1 %1739  ;;  %v3837_v52 = vld [vmem:[%s5381_s7] sm:$0xff] }
 0xd30   :  { %v1746_v53 = vsel %vm363_vm1, %v1728_v50, %v1740_v49  ;;  %v1751_v54 = vsel %vm448_vm6, %v1748_v45, %v4204_v4 }
 0xd31   :  { %v1749_v39 = vsel %vm444_vm5, %v1746_v53, 0.0  ;;  %3594 = vmatmul.mubr.msk.f32.gmra.mxu0 %vm452_vm7, %v1751_v54 }
 0xd32   :  { %3596 = vmatprep.mubr.msk.f32.mxu0 %vm3850_vm0, %v3849_v3  ;;  %v1752_v56 = vsel %vm448_vm6, %v1749_v39, 1.0 }
 0xd35   :  { %3597 = vmatmul.mubr.msk.f32.gmra.mxu0 %vm452_vm7, %v1752_v56 }
 0xded   :  { %v4852_v57 = vpop.f32.mrf.mxu0 }
 0xdee   :  { %v1845_v59 = vmul.f32 %v4233_v36, %v4852_v57  ;;  %v1848_v9 = vmul.f32 %v4254_v47, %v4852_v57  ;;  %v1854_v26 = vmul.f32 %v4274_v58, %v4852_v57  ;;  %v1851_v41 = vmul.f32 %v4278_v60, %v4852_v57 }
 0xdef   :  { %v3592_v61 = vpop.f32.mrf.mxu0 }
 0xdf0   :  { %3605 = vmatprep.mubr.msk.f32.mxu1 %vm363_vm1, %v1845_v59  ;;  %v1860_v14 = vrot.slane %v1848_v9, 4  ;;  %v1869_v43 = vrot.slane %v1854_v26, 4  ;;  %v3838_v59 = vld [vmem:[%s5381_s7 + $0x10] sm:$0xff] }
 0xdf1   :  { %v4857_v62 = vpop.f32.mrf.mxu0  ;;  %v3842_v26 = vld [vmem:[%s5381_s7 + $0x30] sm:$0xff] }
 0xdf2   :  { %1882 = vrot.lane.b32.xlu1 %v4857_v62, %s3851_s24  ;;  %v1849_v10 = vmul.f32 %v4254_v47, %v4857_v62  ;;  %v1846_v13 = vmul.f32 %v4233_v36, %v4857_v62  ;;  %v1855_v23 = vmul.f32 %v4274_v58, %v4857_v62  ;;  %v1852_v6 = vmul.f32 %v4278_v60, %v4857_v62 }
 0xdf3   :  { %v3595_v0 = vpop.f32.mrf.mxu0 }
 0xdf4   :  { %v1861_v15 = vrot.slane %v1849_v10, 4  ;;  %v1870_v16 = vrot.slane %v1855_v23, 4 }
 0xdf5   :  { %v4861_v1 = vpop.f32.mrf.mxu0 }
 0xdf6   :  { %1884 = vrot.lane.b32.xlu0 %v4861_v1, %s3851_s24  ;;  %v1847_v11 = vmul.f32 %v4233_v36, %v4861_v1  ;;  %v1850_v12 = vmul.f32 %v4254_v47, %v4861_v1  ;;  %v1862_v19 = vsel %vm561_vm4, %v1860_v14, %v1861_v15  ;;  %v1853_v32 = vmul.f32 %v4278_v60, %v4861_v1 }
 0xdf7   :  { %v3598_v2 = vpop.f32.mrf.mxu0  ;;  %v1856_v35 = vmul.f32 %v4274_v58, %v4861_v1  ;;  %v1871_v20 = vsel %vm561_vm4, %v1869_v43, %v1870_v16 }
 0xdf8   :  { %v1875_v17 = vsel %vm561_vm4, %v1847_v11, %v1860_v14  ;;  %v1863_v18 = vrot.slane %v1850_v12, 4  ;;  %v1876_v22 = vsel %vm561_vm4, %v1853_v32, %v1869_v43  ;;  %v3840_v11 = vld [vmem:[%s5381_s7 + $0x20] sm:$0xff]  ;;  %v3841_v14 = vld [vmem:[%s5381_s7 + $0x28] sm:$0xff] }
 0xdf9   :  { %v1872_v40 = vrot.slane %v1856_v35, 4 }
 0xdfa   :  { %1880 = vrot.lane.b32.xlu0 %v4852_v57, %s3851_s24  ;;  %v1864_v21 = vsel %vm561_vm4, %v1861_v15, %v1863_v18 }
 0xdfb   :  { %v1873_v29 = vsel %vm561_vm4, %v1870_v16, %v1872_v40 }
 0xe64   :  { %v1883_v7 = vpop.permute.xlu1 %1882 }
 0xe68   :  { %v1885_v5 = vpop.permute.xlu0 %1884 }
 0xe69   :  { %3599 = vmatprep.subr.msk.mxu1 %vm363_vm1, %v1885_v5 }
 0xe6a   :  { %3600 = vmatpush3.xpose.msk.msra.mxu1 %vm363_vm1, %v1885_v5 }
 0xe6b   :  { %3601 = vmatprep.subr.msk.mxu1 %vm363_vm1, %v1883_v7 }
 0xe6c   :  { %v1881_v8 = vpop.permute.xlu0 %1880 }
 0xe6e   :  { %3602 = vmatpush3.xpose.msk.msra.mxu1 %vm363_vm1, %v1883_v7 }
 0xe6f   :  { %3603 = vmatprep.subr.msk.mxu1 %vm363_vm1, %v1881_v8 }
 0xe72   :  { %3604 = vmatpush3.xpose.msk.msra.mxu1 %vm363_vm1, %v1881_v8  ;;  %v3839_v8 = vld [vmem:[%s5381_s7 + $0x18] sm:$0xff] }
 0xe73   :  { %3641 = vmatprep.subr.mxu1 %v3849_v3 }
 0xe75   :  { %3606 = vmatmul.mubr.msk.f32.vlgmr.msra.gmra.mxu1 %vm363_vm1, %v1846_v13 }
 0xe76   :  { %3608 = vmatprep.mubr.msk.f32.mxu1 %vm363_vm1, %v1875_v17 }
 0xe79   :  { %3609 = vmatmul.mubr.msk.f32.gmra.mxu1 %vm363_vm1, %v1862_v19 }
 0xe7a   :  { %3611 = vmatprep.mubr.msk.f32.mxu1 %vm363_vm1, %v1864_v21 }
 0xe7d   :  { %3612 = vmatmul.mubr.msk.f32.gmra.mxu1 %vm363_vm1, %v1851_v41 }
 0xe7e   :  { %3614 = vmatprep.mubr.msk.f32.mxu1 %vm363_vm1, %v1852_v6 }
 0xe81   :  { %3615 = vmatmul.mubr.msk.f32.gmra.mxu1 %vm363_vm1, %v1876_v22  ;;  %v3843_v22 = vld [vmem:[%s5381_s7 + $0x38] sm:$0xff] }
 0xe82   :  { %3617 = vmatprep.mubr.msk.f32.mxu1 %vm363_vm1, %v1871_v20  ;;  %v3844_v20 = vld [vmem:[%s5381_s7 + $0x40] sm:$0xff] }
 0xe85   :  { %3618 = vmatmul.mubr.msk.f32.gmra.mxu1 %vm363_vm1, %v1873_v29 }
 0xe86   :  { %3659 = vmatprep.mubr.msk.f32.mxu1 %vm3850_vm0, %v3849_v3 }
 0xf35   :  { %v3607_v42 = vpop.f32.mrf.mxu1 }
 0xf36   :  { %v2034_v44 = vmul.f32 0.35355338, %v3607_v42 }
 0xf37   :  { %v1984_v33 = vpop.f32.mrf.mxu1 }
 0xf38   :  { %v2033_v46 = vmul.f32 0.35355338, %v1984_v33  ;;  %v2044_v48 = vadd.f32 %v3836_v31, %v2034_v44  ;;  %v3845_v33 = vld [vmem:[%s5381_s7 + $0x48] sm:$0xff] }
 0xf39   :  { %v3610_v34 = vpop.f32.mrf.mxu1 }
 0xf3a   :  { %v2056_v50 = vsel %vm755_vm10, %v2044_v48, -inf  ;;  %v2043_v45 = vadd.f32 %v3837_v52, %v2033_v46  ;;  %v2036_v53 = vmul.f32 0.35355338, %v3610_v34 }
 0xf3b   :  { %2057 = vmax.xlane.f32.xlu0 %v2056_v50  ;;  %v1994_v49 = vpop.f32.mrf.mxu1 }
 0xf3c   :  { %v2035_v54 = vmul.f32 0.35355338, %v1994_v49  ;;  %v2053_v39 = vsel %vm755_vm10, %v2043_v45, -inf  ;;  %v2046_v9 = vadd.f32 %v3839_v8, %v2036_v53 }
 0xf3d   :  { %2054 = vmax.xlane.f32.xlu1 %v2053_v39  ;;  %v3613_v56 = vpop.f32.mrf.mxu1 }
 0xf3e   :  { %v2045_v61 = vadd.f32 %v3838_v59, %v2035_v54  ;;  %v2038_v0 = vmul.f32 0.35355338, %v3613_v56  ;;  %v2062_v19 = vsel %vm755_vm10, %v2046_v9, -inf }
 0xf3f   :  { %v2004_v2 = vpop.f32.mrf.mxu1 }
 0xf40   :  { %v2037_v5 = vmul.f32 0.35355338, %v2004_v2  ;;  %v2059_v7 = vsel %vm755_vm10, %v2045_v61, -inf  ;;  %v2048_v15 = vadd.f32 %v3841_v14, %v2038_v0 }
 0xf41   :  { %2060 = vmax.xlane.f32.xlu0 %v2059_v7  ;;  %v3616_v10 = vpop.f32.mrf.mxu1 }
 0xf42   :  { %v2047_v12 = vadd.f32 %v3840_v11, %v2037_v5  ;;  %v2040_v17 = vmul.f32 0.35355338, %v3616_v10  ;;  %v2068_v32 = vsel %vm755_vm10, %v2048_v15, -inf }
 0xf43   :  { %v2014_v13 = vpop.f32.mrf.mxu1 }
 0xf44   :  { %v2039_v18 = vmul.f32 0.35355338, %v2014_v13  ;;  %v2065_v21 = vsel %vm755_vm10, %v2047_v12, -inf  ;;  %v2050_v40 = vadd.f32 %v3843_v22, %v2040_v17 }
 0xf45   :  { %2063 = vmax.xlane.f32.xlu0 %v2062_v19  ;;  %2066 = vmax.xlane.f32.xlu1 %v2065_v21  ;;  %v3619_v23 = vpop.f32.mrf.mxu1 }
 0xf46   :  { %v2049_v41 = vadd.f32 %v3842_v26, %v2039_v18  ;;  %v2042_v35 = vmul.f32 0.35355338, %v3619_v23  ;;  %v2074_v42 = vsel %vm755_vm10, %v2050_v40, -inf }
 0xf47   :  { %v2024_v6 = vpop.f32.mrf.mxu1 }
 0xf48   :  { %v2041_v16 = vmul.f32 0.35355338, %v2024_v6  ;;  %v2071_v43 = vsel %vm755_vm10, %v2049_v41, -inf  ;;  %v2052_v46 = vadd.f32 %v3845_v33, %v2042_v35 }
 0xf49   :  { %2069 = vmax.xlane.f32.xlu0 %v2068_v32  ;;  %2072 = vmax.xlane.f32.xlu1 %v2071_v43 }
 0xf4a   :  { %v2051_v29 = vadd.f32 %v3844_v20, %v2041_v16  ;;  %v2080_v31 = vsel %vm755_vm10, %v2052_v46, -inf }
 0xf4c   :  { %v2077_v44 = vsel %vm755_vm10, %v2051_v29, -inf }
 0xf4d   :  { %2075 = vmax.xlane.f32.xlu0 %v2074_v42  ;;  %2078 = vmax.xlane.f32.xlu1 %v2077_v44 }
 0xf51   :  { %2081 = vmax.xlane.f32.xlu0 %v2080_v31 }
 0xf5e   :  { %2188 = vrot.lane.b32.xlu1 %v4861_v1, %s3853_s23 }
 0xfc4   :  { %v2058_v34 = vpop.xlane.xlu0 %2057 }
 0xfc5   :  { %v2084_v50 = vsub.f32 %v2044_v48, %v2058_v34 }
 0xfc6   :  { %v2055_v52 = vpop.xlane.xlu1 %2054 }
 0xfc7   :  { %v2095_v49 = vmul.f32 1.442695, %v2084_v50  ;;  %v2083_v53 = vsub.f32 %v2043_v45, %v2055_v52 }
 0xfc9   :  { %3776 = vpow2.f32 %v2095_v49  ;;  %v2093_v54 = vmul.f32 1.442695, %v2083_v53 }
 0xfca   :  { %v2061_v39 = vpop.xlane.xlu0 %2060 }
 0xfcb   :  { %3778 = vpow2.f32 %v2093_v54  ;;  %v2085_v56 = vsub.f32 %v2045_v61, %v2061_v39 }
 0xfcd   :  { %v2097_v59 = vmul.f32 1.442695, %v2085_v56 }
 0xfce   :  { %v2064_v0 = vpop.xlane.xlu0 %2063  ;;  %v2067_v2 = vpop.xlane.xlu1 %2066 }
 0xfcf   :  { %3780 = vpow2.f32 %v2097_v59  ;;  %v2086_v5 = vsub.f32 %v2046_v9, %v2064_v0  ;;  %v2087_v7 = vsub.f32 %v2047_v12, %v2067_v2 }
 0xfd1   :  { %v2099_v8 = vmul.f32 1.442695, %v2086_v5  ;;  %v2101_v10 = vmul.f32 1.442695, %v2087_v7 }
 0xfd2   :  { %v2070_v11 = vpop.xlane.xlu0 %2069  ;;  %v2073_v1 = vpop.xlane.xlu1 %2072 }
 0xfd3   :  { %3782 = vpow2.f32 %v2099_v8  ;;  %v2088_v48 = vsub.f32 %v2048_v15, %v2070_v11  ;;  %v2089_v13 = vsub.f32 %v2049_v41, %v2073_v1 }
 0xfd4   :  { %3784 = vpow2.f32 %v2101_v10 }
 0xfd5   :  { %v2103_v45 = vmul.f32 1.442695, %v2088_v48  ;;  %v2105_v14 = vmul.f32 1.442695, %v2089_v13 }
 0xfd6   :  { %v3777_v17 = vpop.eup %3776  ;;  %v2076_v18 = vpop.xlane.xlu0 %2075 }
 0xfd7   :  { %v2079_v19 = vpop.xlane.xlu1 %2078  ;;  %3786 = vpow2.f32 %v2103_v45  ;;  %v2090_v61 = vsub.f32 %v2050_v40, %v2076_v18  ;;  %v2116_v23 = vsel %vm755_vm10, %v3777_v17, 0.0 }
 0xfd8   :  { %v2091_v21 = vsub.f32 %v2051_v29, %v2079_v19  ;;  %v3779_v9 = vpop.eup %3778  ;;  %3788 = vpow2.f32 %v2105_v14  ;;  %2117 = vadd.xlane.f32.xlu0 %v2116_v23 }
 0xfd9   :  { %v2107_v12 = vmul.f32 1.442695, %v2090_v61  ;;  %v2113_v6 = vsel %vm755_vm10, %v3779_v9, 0.0 }
 0xfda   :  { %v2109_v26 = vmul.f32 1.442695, %v2091_v21  ;;  %v2082_v15 = vpop.xlane.xlu0 %2081  ;;  %2114 = vadd.xlane.f32.xlu1 %v2113_v6 }
 0xfdb   :  { %v2189_v41 = vpop.permute.xlu1 %2188  ;;  %3790 = vpow2.f32 %v2107_v12  ;;  %v2092_v32 = vsub.f32 %v2052_v46, %v2082_v15 }
 0xfdc   :  { %3620 = vmatprep.subr.msk.mxu0 %vm561_vm4, %v2189_v41  ;;  %v3781_v35 = vpop.eup %3780  ;;  %3792 = vpow2.f32 %v2109_v26 }
 0xfdd   :  { %3621 = vmatpush3.msk.msra.mxu0 %vm561_vm4, %v2189_v41  ;;  %v2111_v16 = vmul.f32 1.442695, %v2092_v32  ;;  %v2119_v43 = vsel %vm755_vm10, %v3781_v35, 0.0 }
 0xfde   :  { %2120 = vadd.xlane.f32.xlu1 %v2119_v43 }
 0xfdf   :  { %3794 = vpow2.f32 %v2111_v16 }
 0xfe0   :  { %v3783_v22 = vpop.eup %3782 }
 0xfe1   :  { %v3785_v40 = vpop.eup %3784  ;;  %v2122_v20 = vsel %vm755_vm10, %v3783_v22, 0.0 }
 0xfe2   :  { %2123 = vadd.xlane.f32.xlu0 %v2122_v20  ;;  %v2125_v29 = vsel %vm755_vm10, %v3785_v40, 0.0 }
 0xfe3   :  { %2126 = vadd.xlane.f32.xlu1 %v2125_v29 }
 0xfe4   :  { %v4962_v42 = vpop.eup %3786 }
 0xfe5   :  { %v4964_v44 = vpop.eup %3788  ;;  %v2128_v33 = vsel %vm755_vm10, %v4962_v42, 0.0 }
 0xfe6   :  { %2129 = vadd.xlane.f32.xlu0 %v2128_v33  ;;  %v2131_v46 = vsel %vm755_vm10, %v4964_v44, 0.0 }
 0xfe7   :  { %2132 = vadd.xlane.f32.xlu1 %v2131_v46 }
 0xfe8   :  { %v4970_v31 = vpop.eup %3790 }
 0xfe9   :  { %v4972_v34 = vpop.eup %3792  ;;  %v2134_v50 = vsel %vm755_vm10, %v4970_v31, 0.0 }
 0xfea   :  { %2135 = vadd.xlane.f32.xlu0 %v2134_v50  ;;  %v2137_v52 = vsel %vm755_vm10, %v4972_v34, 0.0  ;;  %v3025_v50 = vld [vmem:[%s5383_s4 + $0x78] sm:$0xff] }
 0xfeb   :  { %2138 = vadd.xlane.f32.xlu1 %v2137_v52  ;;  %v3024_v52 = vld [vmem:[%s5383_s4 + $0x70] sm:$0xff] }
 0xfec   :  { %v4978_v49 = vpop.eup %3794 }
 0xfed   :  { %v2140_v53 = vsel %vm755_vm10, %v4978_v49, 0.0 }
 0xfee   :  { %2141 = vadd.xlane.f32.xlu0 %v2140_v53 }
 0xffc   :  { %2184 = vrot.lane.b32.xlu1 %v4852_v57, %s3853_s23 }
0x1004   :  { %2186 = vrot.lane.b32.xlu0 %v4857_v62, %s3853_s23 }
0x1061   :  { %v2118_v54 = vpop.xlane.xlu0 %2117 }
0x1062   :  { %3796 = vrcp.f32 %v2118_v54 }
0x1063   :  { %v2115_v39 = vpop.xlane.xlu1 %2114 }
0x1064   :  { %3798 = vrcp.f32 %v2115_v39 }
0x1067   :  { %v2121_v56 = vpop.xlane.xlu1 %2120 }
0x1068   :  { %3800 = vrcp.f32 %v2121_v56 }
0x106b   :  { %v2124_v59 = vpop.xlane.xlu0 %2123 }
0x106c   :  { %3802 = vrcp.f32 %v2124_v59  ;;  %v2127_v0 = vpop.xlane.xlu1 %2126 }
0x106d   :  { %3804 = vrcp.f32 %v2127_v0 }
0x106f   :  { %v3797_v2 = vpop.eup %3796  ;;  %v2130_v5 = vpop.xlane.xlu0 %2129 }
0x1070   :  { %v2146_v7 = vmul.f32 %v3797_v2, %v3777_v17  ;;  %3806 = vrcp.f32 %v2130_v5  ;;  %v2133_v8 = vpop.xlane.xlu1 %2132 }
0x1071   :  { %v3799_v10 = vpop.eup %3798  ;;  %3808 = vrcp.f32 %v2133_v8 }
0x1072   :  { %v2164_v57 = vsel %vm755_vm10, %v2146_v7, 0.0  ;;  %v2144_v62 = vmul.f32 %v3799_v10, %v3779_v9  ;;  %v3022_v10 = vld [vmem:[%s5383_s4 + $0x60] sm:$0xff] }
0x1073   :  { %3091 = vst [vmem:[%s5382_s9 + $0x58] sm:$0xff] %v2164_v57  ;;  %v2136_v11 = vpop.xlane.xlu0 %2135  ;;  %v3021_v57 = vld [vmem:[%s5383_s4 + $0x58] sm:$0xff] }
0x1074   :  { %3810 = vrcp.f32 %v2136_v11  ;;  %v2139_v1 = vpop.xlane.xlu1 %2138  ;;  %v2163_v48 = vsel %vm755_vm10, %v2144_v62, 0.0  ;;  %3626 = vmatprep.mubr.msk.f32.mxu0 %vm755_vm10, %v2144_v62 }
0x1075   :  { %v3801_v13 = vpop.eup %3800  ;;  %3812 = vrcp.f32 %v2139_v1  ;;  %3090 = vst [vmem:[%s5382_s9 + $0x50] sm:$0xff] %v2163_v48 }
0x1076   :  { %v2148_v45 = vmul.f32 %v3801_v13, %v3781_v35 }
0x1077   :  { %v2142_v14 = vpop.xlane.xlu0 %2141 }
0x1078   :  { %3814 = vrcp.f32 %v2142_v14  ;;  %v2165_v17 = vsel %vm755_vm10, %v2148_v45, 0.0  ;;  %v2185_v26 = vpop.permute.xlu1 %2184  ;;  %v3020_v14 = vld [vmem:[%s5383_s4 + $0x50] sm:$0xff] }
0x1079   :  { %v3803_v18 = vpop.eup %3802  ;;  %3092 = vst [vmem:[%s5382_s9 + $0x60] sm:$0xff] %v2165_v17 }
0x107a   :  { %v3805_v19 = vpop.eup %3804  ;;  %v2150_v61 = vmul.f32 %v3803_v18, %v3783_v22 }
0x107b   :  { %v2187_v21 = vpop.permute.xlu0 %2186  ;;  %v2152_v23 = vmul.f32 %v3805_v19, %v3785_v40 }
0x107c   :  { %3622 = vmatprep.subr.mxu0 %v2187_v21  ;;  %v2166_v9 = vsel %vm755_vm10, %v2150_v61, 0.0 }
0x107d   :  { %v3807_v12 = vpop.eup %3806  ;;  %3623 = vmatpush3.msra.mxu0 %v2187_v21  ;;  %3093 = vst [vmem:[%s5382_s9 + $0x68] sm:$0xff] %v2166_v9  ;;  %v2167_v6 = vsel %vm755_vm10, %v2152_v23, 0.0  ;;  %v3019_v9 = vld [vmem:[%s5383_s4 + $0x48] sm:$0xff] }
0x107e   :  { %v3809_v15 = vpop.eup %3808  ;;  %3624 = vmatprep.subr.mxu0 %v2185_v26  ;;  %3094 = vst [vmem:[%s5382_s9 + $0x70] sm:$0xff] %v2167_v6  ;;  %v2154_v41 = vmul.f32 %v3807_v12, %v4962_v42 }
0x107f   :  { %3625 = vmatpush3.msra.mxu0 %v2185_v26  ;;  %v2156_v32 = vmul.f32 %v3809_v15, %v4964_v44 }
0x1080   :  { %3627 = vmatmul.mubr.msk.f32.vlgmr.msra.gmra.mxu0 %vm755_vm10, %v2146_v7  ;;  %v2168_v35 = vsel %vm755_vm10, %v2154_v41, 0.0  ;;  %3668 = vmatprep.subr.mxu0 %v3849_v3 }
0x1081   :  { %v3811_v16 = vpop.eup %3810  ;;  %3629 = vmatprep.mubr.msk.f32.mxu0 %vm755_vm10, %v2148_v45  ;;  %3095 = vst [vmem:[%s5382_s9 + $0x78] sm:$0xff] %v2168_v35  ;;  %v2169_v43 = vsel %vm755_vm10, %v2156_v32, 0.0 }
0x1082   :  { %v3813_v22 = vpop.eup %3812  ;;  %3096 = vst [vmem:[%s5382_s9 + $0x80] sm:$0xff] %v2169_v43  ;;  %v2158_v40 = vmul.f32 %v3811_v16, %v4970_v31  ;;  %v3027_v31 = vld [vmem:[%s5383_s4 + $0x88] sm:$0x3] }
0x1083   :  { %v2160_v20 = vmul.f32 %v3813_v22, %v4972_v34  ;;  %v3026_v34 = vld [vmem:[%s5383_s4 + $0x80] sm:$0xff]  ;;  %3642 = vmatpush3.msk.msra.mxu1 %vm462_vm3, %v3027_v31 }
0x1084   :  { %3630 = vmatmul.mubr.msk.f32.gmra.mxu0 %vm755_vm10, %v2150_v61  ;;  %v2170_v29 = vsel %vm755_vm10, %v2158_v40, 0.0  ;;  %3643 = vmatprep.subr.mxu1 %v3849_v3 }
0x1085   :  { %v3815_v42 = vpop.eup %3814  ;;  %3632 = vmatprep.mubr.msk.f32.mxu0 %vm755_vm10, %v2152_v23  ;;  %3097 = vst [vmem:[%s5382_s9 + $0x88] sm:$0xff] %v2170_v29  ;;  %v2171_v44 = vsel %vm755_vm10, %v2160_v20, 0.0  ;;  %3644 = vmatpush3.msra.mxu1 %v3026_v34 }
0x1086   :  { %3098 = vst [vmem:[%s5382_s9 + $0x90] sm:$0xff] %v2171_v44  ;;  %v2162_v33 = vmul.f32 %v3815_v42, %v4978_v49  ;;  %3645 = vmatprep.subr.mxu1 %v3849_v3  ;;  %v3023_v49 = vld [vmem:[%s5383_s4 + $0x68] sm:$0xff] }
0x1087   :  { %3646 = vmatpush3.msra.mxu1 %v3025_v50 }
0x1088   :  { %3633 = vmatmul.mubr.msk.f32.gmra.mxu0 %vm755_vm10, %v2154_v41  ;;  %v2172_v46 = vsel %vm755_vm10, %v2162_v33, 0.0  ;;  %3647 = vmatprep.subr.mxu1 %v3849_v3 }
0x1089   :  { %3635 = vmatprep.mubr.msk.f32.mxu0 %vm755_vm10, %v2156_v32  ;;  %3099 = vst [vmem:[%s5382_s9 + $0x98] sm:$0xff] %v2172_v46  ;;  %3648 = vmatpush3.msra.mxu1 %v3024_v52 }
0x108a   :  { %3649 = vmatprep.subr.mxu1 %v3849_v3 }
0x108b   :  { %3650 = vmatpush3.msra.mxu1 %v3023_v49 }
0x108c   :  { %3636 = vmatmul.mubr.msk.f32.gmra.mxu0 %vm755_vm10, %v2158_v40  ;;  %3651 = vmatprep.subr.mxu1 %v3849_v3 }
0x108d   :  { %3638 = vmatprep.mubr.msk.f32.mxu0 %vm755_vm10, %v2160_v20  ;;  %3652 = vmatpush3.msra.mxu1 %v3022_v10 }
0x108e   :  { %3653 = vmatprep.subr.mxu1 %v3849_v3 }
0x108f   :  { %3654 = vmatpush3.msra.mxu1 %v3021_v57 }
0x1090   :  { %3639 = vmatmul.mubr.msk.f32.gmra.mxu0 %vm755_vm10, %v2162_v33  ;;  %3655 = vmatprep.subr.mxu1 %v3849_v3 }
0x1091   :  { %3686 = vmatprep.mubr.msk.f32.mxu0 %vm3850_vm0, %v3849_v3  ;;  %3656 = vmatpush3.msra.mxu1 %v3020_v14 }
0x1092   :  { %3657 = vmatprep.subr.mxu1 %v3849_v3 }
0x1093   :  { %3658 = vmatpush3.msra.mxu1 %v3019_v9 }
0x1140   :  { %v3628_v53 = vpop.f32.mrf.mxu0 }
0x1141   :  { %v2340_v12 = vmul.f32 %v3628_v53, %v4233_v36 }
0x1142   :  { %v2290_v54 = vpop.f32.mrf.mxu0 }
0x1143   :  { %v2339_v17 = vmul.f32 %v4233_v36, %v2290_v54 }
0x1144   :  { %v3631_v39 = vpop.f32.mrf.mxu0 }
0x1145   :  { %v2343_v2 = vmul.f32 %v3631_v39, %v4254_v47 }
0x1146   :  { %v2300_v56 = vpop.f32.mrf.mxu0 }
0x1147   :  { %v2342_v59 = vmul.f32 %v4254_v47, %v2300_v56  ;;  %v2349_v11 = vrot.slane %v2343_v2, 4  ;;  %v2341_v1 = vmul.f32 %v4233_v36, %v2300_v56 }
0x1148   :  { %v3634_v0 = vpop.f32.mrf.mxu0 }
0x1149   :  { %v2348_v7 = vrot.slane %v2342_v59, 4  ;;  %v2359_v35 = vmul.f32 %v3634_v0, %v4278_v60 }
0x114a   :  { %v2310_v5 = vpop.f32.mrf.mxu0 }
0x114b   :  { %v2344_v8 = vmul.f32 %v4254_v47, %v2310_v5  ;;  %v2350_v47 = vsel %vm561_vm4, %v2348_v7, %v2349_v11 }
0x114c   :  { %v3637_v62 = vpop.f32.mrf.mxu0  ;;  %v2356_v26 = vadd.f32 %v2350_v47, %v2339_v17 }
0x114d   :  { %v2351_v48 = vrot.slane %v2344_v8, 4  ;;  %v2361_v19 = vmul.f32 %v3637_v62, %v4278_v60  ;;  %v2365_v61 = vmul.f32 %v3637_v62, %v4274_v58 }
0x114e   :  { %v2320_v13 = vpop.f32.mrf.mxu0  ;;  %v2362_v29 = vadd.f32 %v2359_v35, %v2356_v26  ;;  %v3036_v35 = vld [vmem:[%s5384_s5 + $0x88] sm:$0x3] }
0x114f   :  { %v2358_v45 = vadd.f32 %v2351_v48, %v2341_v1  ;;  %v2352_v21 = vsel %vm561_vm4, %v2349_v11, %v2351_v48  ;;  %v2360_v43 = vmul.f32 %v4278_v60, %v2320_v13  ;;  %v2371_v22 = vrot.slane %v2365_v61, 4  ;;  %3669 = vmatpush3.msk.msra.mxu0 %vm462_vm3, %v3036_v35  ;;  %v3051_v35 = vld [vmem:[%s5385_s6 + $0x178] sm:$0xff] }
0x1150   :  { %v3640_v18 = vpop.f32.mrf.mxu0  ;;  %v2357_v16 = vadd.f32 %v2352_v21, %v2340_v12  ;;  %3670 = vmatprep.subr.mxu0 %v3849_v3 }
0x1151   :  { %v2367_v23 = vmul.f32 %v3640_v18, %v4274_v58  ;;  %v2364_v15 = vadd.f32 %v2361_v19, %v2358_v45 }
0x1152   :  { %v2330_v6 = vpop.f32.mrf.mxu0  ;;  %v2363_v44 = vadd.f32 %v2360_v43, %v2357_v16  ;;  %v3035_v16 = vld [vmem:[%s5384_s5 + $0x80] sm:$0xff] }
0x1153   :  { %v2374_v41 = vrot.slane %v2367_v23, 4  ;;  %v2366_v32 = vmul.f32 %v4274_v58, %v2330_v6  ;;  %3671 = vmatpush3.msra.mxu0 %v3035_v16  ;;  %v3031_v43 = vld [vmem:[%s5384_s5 + $0x60] sm:$0xff]  ;;  %v3066_v16 = vld [vmem:[%s5385_s6 + $0x1f0] sm:$0xff] }
0x1154   :  { %3672 = vmatprep.subr.mxu0 %v3849_v3 }
0x1155   :  { %v2381_v40 = vadd.f32 %v2374_v41, %v2364_v15  ;;  %v2372_v20 = vrot.slane %v2366_v32, 4 }
0x1157   :  { %v2373_v42 = vsel %vm561_vm4, %v2371_v22, %v2372_v20  ;;  %v2375_v36 = vsel %vm561_vm4, %v2372_v20, %v2374_v41  ;;  %2395 = vrot.lane.b32.xlu0 %v2381_v40, %s3852_s25  ;;  %v2384_v49 = vmul.f32 0.0, %v2381_v40  ;;  %v3030_v22 = vld [vmem:[%s5384_s5 + $0x58] sm:$0xff] }
0x1158   :  { %v2379_v33 = vadd.f32 %v2373_v42, %v2362_v29  ;;  %v2380_v31 = vadd.f32 %v2375_v36, %v2363_v44 }
0x115a   :  { %v2385_v46 = vmul.f32 0.0, %v2379_v33  ;;  %v2386_v58 = vmul.f32 %v2380_v31, %v4204_v4  ;;  %v2383_v54 = vmul.f32 %v4200_v63, %v2380_v31 }
0x115c   :  { %2391 = vrot.lane.b32.xlu1 %v2385_v46, %s3852_s25 }
0x1160   :  { %2393 = vrot.lane.b32.xlu1 %v2386_v58, %s3852_s25 }
0x11c9   :  { %v2396_v50 = vpop.permute.xlu0 %2395 }
0x11ca   :  { %v2402_v56 = vsel %vm363_vm1, %v2384_v49, %v2396_v50  ;;  %v3028_v50 = vld [vmem:[%s5384_s5 + $0x48] sm:$0xff] }
0x11cb   :  { %v2405_v5 = vsel %vm444_vm5, %v2402_v56, 0.0 }
0x11cc   :  { %v2408_v7 = vsel %vm448_vm6, %v2405_v5, 1.0 }
0x11ce   :  { %v2392_v60 = vpop.permute.xlu1 %2391 }
0x11cf   :  { %v2400_v34 = vsel %vm363_vm1, %v2379_v33, %v2392_v60 }
0x11d0   :  { %v2403_v52 = vsel %vm444_vm5, %v2400_v34, 1.0  ;;  %v3029_v34 = vld [vmem:[%s5384_s5 + $0x50] sm:$0xff] }
0x11d1   :  { %v2406_v53 = vsel %vm448_vm6, %v2403_v52, 0.0 }
0x11d2   :  { %3660 = vmatmul.mubr.msk.f32.vlgmr.msra.gmra.mxu1 %vm452_vm7, %v2406_v53  ;;  %v2394_v39 = vpop.permute.xlu1 %2393 }
0x11d3   :  { %v2401_v59 = vsel %vm363_vm1, %v2383_v54, %v2394_v39  ;;  %3662 = vmatprep.mubr.msk.f32.mxu1 %vm3850_vm0, %v3849_v3 }
0x11d4   :  { %v2404_v0 = vsel %vm444_vm5, %v2401_v59, %v4200_v63 }
0x11d5   :  { %v2407_v2 = vsel %vm448_vm6, %v2404_v0, %v4204_v4 }
0x11d6   :  { %3663 = vmatmul.mubr.msk.f32.gmra.mxu1 %vm452_vm7, %v2407_v2 }
0x11d7   :  { %3665 = vmatprep.mubr.msk.f32.mxu1 %vm3850_vm0, %v3849_v3 }
0x11da   :  { %3666 = vmatmul.mubr.msk.f32.gmra.mxu1 %vm452_vm7, %v2408_v7 }
0x1292   :  { %v2487_v8 = vpop.f32.mrf.mxu1 }
0x1293   :  { %v5120_v10 = vadd.f32 %v2487_v8, %v4749_v27 }
0x1294   :  { %v3661_v57 = vpop.f32.mrf.mxu1 }
0x1295   :  { %v2504_v62 = vsel %vm363_vm1, %v5120_v10, 0.0 }
0x1296   :  { %2505 = vadd.xlane.f32.xlu1 %v2504_v62  ;;  %v2492_v11 = vpop.f32.mrf.mxu1 }
0x1297   :  { %v5125_v1 = vadd.f32 %v2492_v11, %v4754_v38 }
0x1298   :  { %v3664_v48 = vpop.f32.mrf.mxu1 }
0x1299   :  { %v2507_v13 = vsel %vm363_vm1, %v5125_v1, 0.0 }
0x129a   :  { %2508 = vadd.xlane.f32.xlu0 %v2507_v13  ;;  %v2497_v47 = vpop.f32.mrf.mxu1 }
0x129b   :  { %v5130_v45 = vadd.f32 %v2497_v47, %v4759_v24 }
0x129c   :  { %v3667_v27 = vpop.f32.mrf.mxu1 }
0x129d   :  { %v2510_v14 = vsel %vm370_vm2, %v5130_v45, 0.0 }
0x129e   :  { %2511 = vadd.xlane.f32.xlu0 %v2510_v14 }
0x12a7   :  { %2543 = vrot.lane.b32.xlu1 %v4784_v55, %s3853_s23 }
0x131f   :  { %v2506_v17 = vpop.xlane.xlu1 %2505 }
0x1320   :  { %v2513_v38 = vmul.f32 0.03125, %v2506_v17 }
0x1322   :  { %v5137_v18 = vsub.f32 %v5120_v10, %v2513_v38 }
0x1323   :  { %v2509_v19 = vpop.xlane.xlu0 %2508  ;;  %v2544_v40 = vpop.permute.xlu1 %2543 }
0x1324   :  { %v2514_v61 = vmul.f32 0.03125, %v2509_v19  ;;  %v2519_v21 = vmul.f32 %v5137_v18, %v5137_v18 }
0x1326   :  { %v5142_v24 = vsub.f32 %v5125_v1, %v2514_v61  ;;  %v2522_v23 = vsel %vm363_vm1, %v2519_v21, 0.0 }
0x1327   :  { %v2512_v9 = vpop.xlane.xlu0 %2511  ;;  %2523 = vadd.xlane.f32.xlu0 %v2522_v23 }
0x1328   :  { %v2515_v12 = vmul.f32 0.03125, %v2512_v9  ;;  %v2520_v26 = vmul.f32 %v5142_v24, %v5142_v24 }
0x132a   :  { %v5148_v6 = vsub.f32 %v5130_v45, %v2515_v12  ;;  %v2525_v15 = vsel %vm363_vm1, %v2520_v26, 0.0 }
0x132b   :  { %2526 = vadd.xlane.f32.xlu1 %v2525_v15  ;;  %v3068_v15 = vld [vmem:[%s5385_s6 + $0x200] sm:$0xff] }
0x132c   :  { %v2521_v41 = vmul.f32 %v5148_v6, %v5148_v6  ;;  %3352 = vmatprep.subr.mxu1 %v3068_v15 }
0x132e   :  { %v2528_v32 = vsel %vm370_vm2, %v2521_v41, 0.0  ;;  %v3052_v41 = vld [vmem:[%s5385_s6 + $0x180] sm:$0xff] }
0x132f   :  { %2529 = vadd.xlane.f32.xlu0 %v2528_v32  ;;  %3353 = vmatpush3.msra.mxu1 %v3052_v41  ;;  %v3067_v32 = vld [vmem:[%s5385_s6 + $0x1f8] sm:$0xff] }
0x1330   :  { %3354 = vmatprep.subr.mxu1 %v3067_v32 }
0x1331   :  { %3355 = vmatpush3.msra.mxu1 %v3051_v35 }
0x1332   :  { %3356 = vmatprep.subr.mxu1 %v3066_v16 }
0x133c   :  { %2545 = vrot.lane.b32.xlu1 %v4766_v25, %s3853_s23 }
0x1340   :  { %2557 = vrot.lane.b32.xlu1 %v4766_v25, %s3852_s25  ;;  %v3034_v25 = vld [vmem:[%s5384_s5 + $0x78] sm:$0xff] }
0x1341   :  { %3673 = vmatpush3.msra.mxu0 %v3034_v25  ;;  %v3050_v25 = vld [vmem:[%s5385_s6 + $0x170] sm:$0xff] }
0x1342   :  { %3674 = vmatprep.subr.mxu0 %v3849_v3  ;;  %3357 = vmatpush3.msra.mxu1 %v3050_v25 }
0x1344   :  { %2547 = vrot.lane.b32.xlu1 %v4779_v51, %s3853_s23 }
0x1345   :  { %2555 = vrot.lane.b32.xlu0 %v4784_v55, %s3852_s25  ;;  %v3032_v55 = vld [vmem:[%s5384_s5 + $0x68] sm:$0xff] }
0x1349   :  { %2559 = vrot.lane.b32.xlu0 %v4779_v51, %s3852_s25  ;;  %v3033_v51 = vld [vmem:[%s5384_s5 + $0x70] sm:$0xff] }
0x134a   :  { %3675 = vmatpush3.msra.mxu0 %v3033_v51  ;;  %v3065_v51 = vld [vmem:[%s5385_s6 + $0x1e8] sm:$0xff] }
0x134b   :  { %3676 = vmatprep.subr.mxu0 %v3849_v3  ;;  %3358 = vmatprep.subr.mxu1 %v3065_v51 }
0x134c   :  { %3677 = vmatpush3.msra.mxu0 %v3032_v55  ;;  %v3049_v55 = vld [vmem:[%s5385_s6 + $0x168] sm:$0xff] }
0x134d   :  { %3678 = vmatprep.subr.mxu0 %v3849_v3  ;;  %3359 = vmatpush3.msra.mxu1 %v3049_v55 }
0x134e   :  { %3679 = vmatpush3.msra.mxu0 %v3031_v43  ;;  %v3064_v43 = vld [vmem:[%s5385_s6 + $0x1e0] sm:$0xff] }
0x134f   :  { %3680 = vmatprep.subr.mxu0 %v3849_v3  ;;  %3360 = vmatprep.subr.mxu1 %v3064_v43 }
0x1350   :  { %3681 = vmatpush3.msra.mxu0 %v3030_v22  ;;  %v3048_v22 = vld [vmem:[%s5385_s6 + $0x160] sm:$0xff] }
0x1351   :  { %3682 = vmatprep.subr.mxu0 %v3849_v3  ;;  %3361 = vmatpush3.msra.mxu1 %v3048_v22 }
0x1352   :  { %3683 = vmatpush3.msra.mxu0 %v3029_v34  ;;  %v3042_v34 = vld [vmem:[%s5385_s6 + $0x130] sm:$0xff] }
0x1353   :  { %3684 = vmatprep.subr.mxu0 %v3849_v3 }
0x1354   :  { %3685 = vmatpush3.msra.mxu0 %v3028_v50  ;;  %v3057_v50 = vld [vmem:[%s5385_s6 + $0x1a8] sm:$0xff] }
0x1355   :  { %3695 = vmatprep.subr.mxu0 %v3849_v3 }
0x13b0   :  { %v2524_v20 = vpop.xlane.xlu0 %2523 }
0x13b1   :  { %v2531_v29 = vmul.f32 0.03125, %v2524_v20  ;;  %v3047_v20 = vld [vmem:[%s5385_s6 + $0x158] sm:$0xff] }
0x13b3   :  { %v2534_v42 = vadd.f32 1e-12, %v2531_v29  ;;  %v3062_v29 = vld [vmem:[%s5385_s6 + $0x1d0] sm:$0xff] }
0x13b4   :  { %v2527_v36 = vpop.xlane.xlu1 %2526 }
0x13b5   :  { %3816 = vrsqrt.f32 %v2534_v42  ;;  %v2532_v44 = vmul.f32 0.03125, %v2527_v36  ;;  %v3046_v42 = vld [vmem:[%s5385_s6 + $0x150] sm:$0xff]  ;;  %v3061_v36 = vld [vmem:[%s5385_s6 + $0x1c8] sm:$0xff] }
0x13b7   :  { %v2535_v33 = vadd.f32 1e-12, %v2532_v44  ;;  %v3045_v44 = vld [vmem:[%s5385_s6 + $0x148] sm:$0xff] }
0x13b8   :  { %v2530_v46 = vpop.xlane.xlu0 %2529  ;;  %v2546_v60 = vpop.permute.xlu1 %2545 }
0x13b9   :  { %3818 = vrsqrt.f32 %v2535_v33  ;;  %v2533_v31 = vmul.f32 0.03125, %v2530_v46  ;;  %v3060_v33 = vld [vmem:[%s5385_s6 + $0x1c0] sm:$0xff] }
0x13ba   :  { %v3044_v46 = vld [vmem:[%s5385_s6 + $0x140] sm:$0xff] }
0x13bb   :  { %v2536_v58 = vadd.f32 1e-12, %v2533_v31  ;;  %v3059_v31 = vld [vmem:[%s5385_s6 + $0x1b8] sm:$0xff] }
0x13bc   :  { %v2556_v53 = vpop.permute.xlu0 %2555  ;;  %v2558_v54 = vpop.permute.xlu1 %2557 }
0x13bd   :  { %3820 = vrsqrt.f32 %v2536_v58  ;;  %v3043_v58 = vld [vmem:[%s5385_s6 + $0x138] sm:$0xff] }
0x13c0   :  { %v2548_v8 = vpop.permute.xlu1 %2547  ;;  %v2560_v11 = vpop.permute.xlu0 %2559 }
0x13c2   :  { %v3817_v52 = vpop.eup %3816 }
0x13c3   :  { %v2540_v49 = vmul.f32 %v3817_v52, %v5137_v18  ;;  %v3041_v52 = vld [vmem:[%s5385_s6 + $0x128] sm:$0xff] }
0x13c5   :  { %v2552_v39 = vmul.f32 %v2544_v40, %v2540_v49  ;;  %v3063_v40 = vld [vmem:[%s5385_s6 + $0x1d8] sm:$0xff]  ;;  %v3056_v49 = vld [vmem:[%s5385_s6 + $0x1a0] sm:$0xff] }
0x13c6   :  { %v3819_v56 = vpop.eup %3818  ;;  %3362 = vmatprep.subr.mxu1 %v3063_v40 }
0x13c7   :  { %v2541_v59 = vmul.f32 %v3819_v56, %v5142_v24  ;;  %v2564_v0 = vadd.f32 %v2556_v53, %v2552_v39  ;;  %3363 = vmatpush3.msra.mxu1 %v3047_v20  ;;  %v3040_v53 = vld [vmem:[%s5385_s6 + $0x120] sm:$0xff]  ;;  %v3039_v39 = vld [vmem:[%s5385_s6 + $0x118] sm:$0xff]  ;;  %v3054_v56 = vld [vmem:[%s5385_s6 + $0x190] sm:$0xff] }
0x13c8   :  { %3364 = vmatprep.subr.mxu1 %v3062_v29 }
0x13c9   :  { %v2553_v2 = vmul.f32 %v2546_v60, %v2541_v59  ;;  %v2570_v5 = vmul.f32 0.0, %v2564_v0  ;;  %3365 = vmatpush3.msra.mxu1 %v3046_v42  ;;  %v3058_v60 = vld [vmem:[%s5385_s6 + $0x1b0] sm:$0xff] }
0x13ca   :  { %v3821_v7 = vpop.eup %3820  ;;  %3366 = vmatprep.subr.mxu1 %v3061_v36  ;;  %v3038_v59 = vld [vmem:[%s5385_s6 + $0x110] sm:$0xff] }
0x13cb   :  { %v2565_v57 = vadd.f32 %v2558_v54, %v2553_v2  ;;  %2576 = vrot.lane.b32.xlu1 %v2570_v5, %s3852_s25  ;;  %v2542_v62 = vmul.f32 %v3821_v7, %v5148_v6  ;;  %3367 = vmatpush3.msra.mxu1 %v3045_v44  ;;  %v3055_v54 = vld [vmem:[%s5385_s6 + $0x198] sm:$0xff]  ;;  %v3069_v2 = vld [vmem:[%s5385_s6 + $0x208] sm:$0x3] }
0x13cc   :  { %3368 = vmatprep.subr.mxu1 %v3060_v33  ;;  %v3037_v5 = vld [vmem:[%s5385_s6 + $0x108] sm:$0xff] }
0x13cd   :  { %v2571_v48 = vmul.f32 %v2565_v57, %v4204_v4  ;;  %v2554_v13 = vmul.f32 %v2548_v8, %v2542_v62  ;;  %v2568_v38 = vmul.f32 %v4200_v63, %v2565_v57  ;;  %3369 = vmatpush3.msra.mxu1 %v3044_v46 }
0x13ce   :  { %3370 = vmatprep.subr.mxu1 %v3059_v31 }
0x13cf   :  { %v2566_v47 = vadd.f32 %v2560_v11, %v2554_v13  ;;  %2578 = vrot.lane.b32.xlu0 %v2571_v48, %s3852_s25  ;;  %3371 = vmatpush3.msra.mxu1 %v3043_v58 }
0x13d0   :  { %3372 = vmatprep.subr.mxu1 %v3058_v60 }
0x13d1   :  { %2580 = vrot.lane.b32.xlu1 %v2566_v47, %s3852_s25  ;;  %v2569_v61 = vmul.f32 0.0, %v2566_v47  ;;  %3373 = vmatpush3.msra.mxu1 %v3042_v34 }
0x13d2   :  { %3374 = vmatprep.subr.mxu1 %v3057_v50 }
0x13d3   :  { %3375 = vmatpush3.msra.mxu1 %v3041_v52 }
0x13d4   :  { %3376 = vmatprep.subr.mxu1 %v3056_v49 }
0x13d5   :  { %3377 = vmatpush3.msra.mxu1 %v3040_v53 }
0x13d6   :  { %3378 = vmatprep.subr.mxu1 %v3055_v54 }
0x13d7   :  { %3379 = vmatpush3.msra.mxu1 %v3039_v39 }
0x13d8   :  { %3380 = vmatprep.subr.mxu1 %v3054_v56 }
0x13d9   :  { %3381 = vmatpush3.msra.mxu1 %v3038_v59 }
0x143d   :  { %v2577_v27 = vpop.permute.xlu1 %2576 }
0x143e   :  { %v2585_v14 = vsel %vm363_vm1, %v2564_v0, %v2577_v27  ;;  %v3053_v0 = vld [vmem:[%s5385_s6 + $0x188] sm:$0xff] }
0x143f   :  { %v2588_v17 = vsel %vm444_vm5, %v2585_v14, 1.0  ;;  %3382 = vmatprep.subr.mxu1 %v3053_v0 }
0x1440   :  { %v2591_v18 = vsel %vm448_vm6, %v2588_v17, 0.0  ;;  %3383 = vmatpush3.msra.mxu1 %v3037_v5 }
0x1441   :  { %v2579_v19 = vpop.permute.xlu0 %2578  ;;  %3687 = vmatmul.mubr.msk.f32.vlgmr.msra.gmra.mxu0 %vm452_vm7, %v2591_v18 }
0x1442   :  { %v2586_v21 = vsel %vm363_vm1, %v2568_v38, %v2579_v19  ;;  %3689 = vmatprep.mubr.msk.f32.mxu0 %vm3850_vm0, %v3849_v3  ;;  %3696 = vmatpush3.msk.msra.mxu0 %vm462_vm3, %v3069_v2 }
0x1443   :  { %v2589_v24 = vsel %vm444_vm5, %v2586_v21, %v4200_v63  ;;  %v2581_v23 = vpop.permute.xlu1 %2580 }
0x1444   :  { %v2587_v9 = vsel %vm363_vm1, %v2569_v61, %v2581_v23  ;;  %v2592_v12 = vsel %vm448_vm6, %v2589_v24, %v4204_v4 }
0x1445   :  { %v2590_v26 = vsel %vm444_vm5, %v2587_v9, 0.0  ;;  %3690 = vmatmul.mubr.msk.f32.gmra.mxu0 %vm452_vm7, %v2592_v12 }
0x1446   :  { %3692 = vmatprep.mubr.msk.f32.mxu0 %vm3850_vm0, %v3849_v3  ;;  %v2593_v6 = vsel %vm448_vm6, %v2590_v26, 1.0 }
0x1449   :  { %3693 = vmatmul.mubr.msk.f32.gmra.mxu0 %vm452_vm7, %v2593_v6 }
0x144a   :  { %3697 = vmatprep.mubr.msk.f32.mxu0 %vm3850_vm0, %v3849_v3 }
0x144d   :  { %3698 = vmatmul.mubr.msk.f32.vlgmr.msra.gmra.mxu0 %vm1425_vm12, %v4725_v28 }
0x144e   :  { %3700 = vmatprep.mubr.msk.f32.mxu0 %vm3850_vm0, %v3849_v3 }
0x1451   :  { %3701 = vmatmul.mubr.msk.f32.gmra.mxu0 %vm1425_vm12, %v4734_v37 }
0x1452   :  { %3703 = vmatprep.mubr.msk.f32.mxu0 %vm3850_vm0, %v3849_v3 }
0x1455   :  { %3704 = vmatmul.mubr.msk.f32.gmra.mxu0 %vm1425_vm12, %v4740_v30 }
0x1501   :  { %v2672_v7 = vpop.f32.mrf.mxu0 }
0x1502   :  { %v2686_v8 = vmul.f32 %v2672_v7, %v2672_v7 }
0x1503   :  { %v3688_v57 = vpop.f32.mrf.mxu0 }
0x1504   :  { %v2689_v62 = vmul.f32 %v2686_v8, %v2672_v7 }
0x1505   :  { %v2677_v11 = vpop.f32.mrf.mxu0 }
0x1506   :  { %v2692_v48 = vmul.f32 0.044715, %v2689_v62  ;;  %v2687_v13 = vmul.f32 %v2677_v11, %v2677_v11 }
0x1507   :  { %v3691_v28 = vpop.f32.mrf.mxu0 }
0x1508   :  { %v2695_v47 = vadd.f32 %v2692_v48, %v2672_v7  ;;  %v2690_v27 = vmul.f32 %v2687_v13, %v2677_v11 }
0x1509   :  { %v2682_v14 = vpop.f32.mrf.mxu0 }
0x150a   :  { %v2698_v17 = vmul.f32 0.7978846, %v2695_v47  ;;  %v2693_v38 = vmul.f32 0.044715, %v2690_v27  ;;  %v2688_v37 = vmul.f32 %v2682_v14, %v2682_v14 }
0x150b   :  { %v3694_v18 = vpop.f32.mrf.mxu0 }
0x150c   :  { %3822 = vtanh.f32 %v2698_v17  ;;  %v2696_v3 = vadd.f32 %v2693_v38, %v2677_v11  ;;  %v2691_v19 = vmul.f32 %v2688_v37, %v2682_v14 }
0x150d   :  { %v2868_v20 = vpop.f32.mrf.mxu0 }
0x150e   :  { %v2699_v61 = vmul.f32 0.7978846, %v2696_v3  ;;  %v2694_v30 = vmul.f32 0.044715, %v2691_v19 }
0x150f   :  { %v3699_v29 = vpop.f32.mrf.mxu0 }
0x1510   :  { %3824 = vtanh.f32 %v2699_v61  ;;  %v2697_v21 = vadd.f32 %v2694_v30, %v2682_v14 }
0x1511   :  { %v2873_v42 = vpop.f32.mrf.mxu0 }
0x1512   :  { %v2700_v24 = vmul.f32 0.7978846, %v2697_v21 }
0x1513   :  { %v3702_v36 = vpop.f32.mrf.mxu0 }
0x1514   :  { %3826 = vtanh.f32 %v2700_v24 }
0x1515   :  { %v2878_v44 = vpop.f32.mrf.mxu0 }
0x1517   :  { %v3705_v33 = vpop.f32.mrf.mxu0 }
0x1519   :  { %v3823_v23 = vpop.eup %3822 }
0x151a   :  { %v2704_v9 = vadd.f32 1.0, %v3823_v23 }
0x151c   :  { %v2707_v12 = vmul.f32 0.5, %v2704_v9 }
0x151d   :  { %v3825_v26 = vpop.eup %3824 }
0x151e   :  { %v2710_v6 = vmul.f32 %v2707_v12, %v2672_v7  ;;  %v2705_v15 = vadd.f32 1.0, %v3825_v26  ;;  %v3848_v7 = vld [vmem:[%s5379_s2 + $0x30] sm:$0xff] }
0x1520   :  { %v2708_v41 = vmul.f32 0.5, %v2705_v15  ;;  %v2716_v32 = vmul.f32 0.0, %v2710_v6 }
0x1521   :  { %v3827_v35 = vpop.eup %3826 }
0x1522   :  { %v2711_v16 = vmul.f32 %v2708_v41, %v2677_v11  ;;  %2786 = vmatprep.mubr.f32.mxu1 %v2716_v32  ;;  %v2706_v25 = vadd.f32 1.0, %v3827_v35 }
0x1523   :  { %2787 = vmatmul.mubr.f32.vlgmr.msra.gmra.mxu1 %v2710_v6 }
0x1524   :  { %v2717_v51 = vmul.f32 %v2711_v16, %v4204_v4  ;;  %v2714_v55 = vmul.f32 %v4200_v63, %v2711_v16  ;;  %v2709_v43 = vmul.f32 0.5, %v2706_v25 }
0x1526   :  { %2791 = vmatprep.mubr.f32.mxu1 %v2717_v51  ;;  %v2712_v22 = vmul.f32 %v2709_v43, %v2682_v14 }
0x1527   :  { %2792 = vmatmul.mubr.f32.gmra.mxu1 %v2714_v55 }
0x1528   :  { %2796 = vmatprep.mubr.f32.mxu1 %v2712_v22  ;;  %v2715_v40 = vmul.f32 0.0, %v2712_v22 }
0x152b   :  { %2797 = vmatmul.mubr.f32.gmra.mxu1 %v2715_v40 }
0x15e3   :  { %v3384_v46 = vpop.f32.mrf.mxu1 }
0x15e5   :  { %v3385_v31 = vpop.f32.mrf.mxu1 }
0x15e6   :  { %v3386_v58 = vadd.f32 %v3385_v31, %v3384_v46 }
0x15e7   :  { %v3387_v60 = vpop.f32.mrf.mxu1 }
0x15e8   :  { %v2869_v4 = vadd.f32 %v3386_v58, %v2868_v20 }
0x15e9   :  { %v3388_v34 = vpop.f32.mrf.mxu1 }
0x15ea   :  { %v2882_v63 = vadd.f32 %v2869_v4, %v5120_v10  ;;  %v3389_v50 = vadd.f32 %v3388_v34, %v3387_v60  ;;  %v3846_v10 = vld [vmem:[%s5379_s2 + $0x38] sm:$0xff] }
0x15eb   :  { %v3390_v52 = vpop.f32.mrf.mxu1 }
0x15ec   :  { %v2874_v49 = vadd.f32 %v3389_v50, %v2873_v42  ;;  %v2885_v53 = vsel %vm363_vm1, %v2882_v63, 0.0 }
0x15ed   :  { %v3391_v54 = vpop.f32.mrf.mxu1  ;;  %2886 = vadd.xlane.f32.xlu0 %v2885_v53 }
0x15ee   :  { %v2883_v39 = vadd.f32 %v2874_v49, %v5125_v1  ;;  %v3392_v56 = vadd.f32 %v3391_v54, %v3390_v52  ;;  %v3847_v1 = vld [vmem:[%s5379_s2 + $0x40] sm:$0xf] }
0x15f0   :  { %v2879_v59 = vadd.f32 %v3392_v56, %v2878_v44  ;;  %v2888_v0 = vsel %vm363_vm1, %v2883_v39, 0.0 }
0x15f1   :  { %2889 = vadd.xlane.f32.xlu1 %v2888_v0 }
0x15f2   :  { %v2884_v2 = vadd.f32 %v2879_v59, %v5130_v45 }
0x15f4   :  { %v2891_v5 = vsel %vm370_vm2, %v2884_v2, 0.0 }
0x15f5   :  { %2892 = vadd.xlane.f32.xlu0 %v2891_v5 }
0x1602   :  { %2929 = vrot.lane.b32.xlu1 %v3846_v10, %s3851_s24 }
0x1606   :  { %2931 = vrot.lane.b32.xlu1 %v3847_v1, %s3851_s24 }
0x160a   :  { %2939 = vrot.lane.b32.xlu1 %v3848_v7, %s3853_s23 }
0x1676   :  { %v2887_v45 = vpop.xlane.xlu0 %2886 }
0x1677   :  { %v2894_v8 = vmul.f32 0.03125, %v2887_v45 }
0x1679   :  { %v2897_v57 = vsub.f32 %v2882_v63, %v2894_v8 }
0x167a   :  { %v2890_v62 = vpop.xlane.xlu1 %2889 }
0x167b   :  { %v2895_v11 = vmul.f32 0.03125, %v2890_v62  ;;  %v2900_v48 = vmul.f32 %v2897_v57, %v2897_v57 }
0x167d   :  { %v2898_v13 = vsub.f32 %v2883_v39, %v2895_v11  ;;  %v2903_v28 = vsel %vm363_vm1, %v2900_v48, 0.0 }
0x167e   :  { %2904 = vadd.xlane.f32.xlu0 %v2903_v28  ;;  %v2893_v47 = vpop.xlane.xlu0 %2892  ;;  %v2930_v3 = vpop.permute.xlu1 %2929 }
0x167f   :  { %v2896_v27 = vmul.f32 0.03125, %v2893_v47  ;;  %v2901_v14 = vmul.f32 %v2898_v13, %v2898_v13 }
0x1681   :  { %v2899_v17 = vsub.f32 %v2884_v2, %v2896_v27  ;;  %v2906_v38 = vsel %vm363_vm1, %v2901_v14, 0.0 }
0x1682   :  { %2907 = vadd.xlane.f32.xlu0 %v2906_v38  ;;  %v2932_v19 = vpop.permute.xlu1 %2931 }
0x1683   :  { %v2902_v37 = vmul.f32 %v2899_v17, %v2899_v17 }
0x1685   :  { %v2909_v18 = vsel %vm370_vm2, %v2902_v37, 0.0 }
0x1686   :  { %2910 = vadd.xlane.f32.xlu1 %v2909_v18  ;;  %v2940_v24 = vpop.permute.xlu1 %2939 }
0x1697   :  { %2943 = vrot.lane.b32.xlu1 %v3847_v1, %s3853_s23 }
0x1698   :  { %2927 = vrot.lane.b32.xlu0 %v3848_v7, %s3851_s24 }
0x169c   :  { %2941 = vrot.lane.b32.xlu0 %v3846_v10, %s3853_s23 }
0x1707   :  { %v2905_v61 = vpop.xlane.xlu0 %2904 }
0x1708   :  { %v2912_v30 = vmul.f32 0.03125, %v2905_v61 }
0x170a   :  { %v2915_v21 = vadd.f32 1e-12, %v2912_v30 }
0x170b   :  { %v2908_v23 = vpop.xlane.xlu0 %2907 }
0x170c   :  { %3828 = vrsqrt.f32 %v2915_v21  ;;  %v2913_v9 = vmul.f32 0.03125, %v2908_v23 }
0x170e   :  { %v2916_v12 = vadd.f32 1e-12, %v2913_v9 }
0x170f   :  { %v2911_v26 = vpop.xlane.xlu1 %2910  ;;  %v2928_v32 = vpop.permute.xlu0 %2927 }
0x1710   :  { %3830 = vrsqrt.f32 %v2916_v12  ;;  %v2914_v6 = vmul.f32 0.03125, %v2911_v26 }
0x1712   :  { %v2917_v15 = vadd.f32 1e-12, %v2914_v6 }
0x1713   :  { %v2942_v43 = vpop.permute.xlu0 %2941  ;;  %v2944_v42 = vpop.permute.xlu1 %2943 }
0x1714   :  { %3832 = vrsqrt.f32 %v2917_v15 }
0x1719   :  { %v3829_v41 = vpop.eup %3828 }
0x171a   :  { %v2921_v35 = vmul.f32 %v3829_v41, %v2897_v57 }
0x171c   :  { %v2936_v16 = vmul.f32 %v2928_v32, %v2921_v35 }
0x171d   :  { %v3831_v25 = vpop.eup %3830 }
0x171e   :  { %v2948_v51 = vadd.f32 %v2940_v24, %v2936_v16  ;;  %v2922_v55 = vmul.f32 %v3831_v25, %v2898_v13 }
0x1720   :  { %2951 = vst.msk [vmem:[%s5386_s8] sm:$0xff] %vm363_vm1, %v2948_v51  ;;  %v2937_v22 = vmul.f32 %v2930_v3, %v2922_v55 }
0x1721   :  { %v3833_v40 = vpop.eup %3832 }
0x1722   :  { %v2949_v20 = vadd.f32 %v2942_v43, %v2937_v22  ;;  %v2923_v29 = vmul.f32 %v3833_v40, %v2899_v17 }
0x1724   :  { %2952 = vst.msk [vmem:[%s5386_s8 + $0x8] sm:$0xff] %vm363_vm1, %v2949_v20  ;;  %v2938_v36 = vmul.f32 %v2932_v19, %v2923_v29 }
0x1726   :  { %v2950_v44 = vadd.f32 %v2944_v42, %v2938_v36 }
0x1728   :  { %2953 = vst.msk [vmem:[%s5386_s8 + $0x10] sm:$0xf] %vm370_vm2, %v2950_v44 }

</bundles_post_ra>
